<compile_context>
chip_gen: v5e
topology: v5e:2x2
jax: 0.10.0
libtpu: 0.0.40
codegen_flags: <defaults>
</compile_context>

<pallas_src>
import functools
import math

import jax
import jax.numpy as jnp
from jax.experimental import pallas as pl
from jax.experimental.pallas import tpu as pltpu


# ----------------------------------------------------------------------------
# Fused kernel: whole decoder stack + final linear.
# ----------------------------------------------------------------------------
def _fused_decoder_kernel(
    tgt_ref, mem_ref,
    sa_wqkv_ref, sa_woh_ref,
    ca_wq_ref, ca_wkv_ref, ca_woh_ref,
    ff1_w_ref, ff2_w_ref,
    vecs_ref,
    fc_w_ref, fc_b_ref,
    out_ref,
    *, num_layers, num_heads, d_model, ff_dim, nb, batch_leading, eps,
):
    E, H, F = d_model, num_heads, ff_dim
    dh = E // H
    f32, bf16 = jnp.float32, jnp.bfloat16

    def mm(a, w_bf16):
        # MXU matmul: bf16 operands, f32 accumulate.
        return jnp.dot(a.astype(bf16), w_bf16, preferred_element_type=f32)

    def vec(l, row, width):
        # Packed per-layer bias / LN vector: (1, width) f32 slice of the
        # single "vecs" operand.
        return vecs_ref[l, row:row + 1, 0:width]

    def layernorm(x, g, b):
        # One-pass: var = E[x^2] - mean^2 (independent lane reductions).
        mean = jnp.mean(x, axis=-1, keepdims=True)
        msq = jnp.mean(x * x, axis=-1, keepdims=True)
        var = msq - mean * mean
        return (x - mean) * jax.lax.rsqrt(var + eps) * g + b

    def split_heads(x2):
        # (L, E) -> (H, L, dh), head-leading so attention matmuls can be
        # head-batched (single dot_general with leading batch dim).
        return jnp.stack([x2[:, h * dh:(h + 1) * dh] for h in range(H)], axis=0)

    def mha(q2d, k2d, v2d, lq, lk, woh, bo):
        # q2d: (nb*lq, E), k2d/v2d: (nb*lk, E); batch-major rows.
        # The softmax scale 1/sqrt(dh) is pre-folded into the Q weights/bias.
        outs = []
        for n in range(nb):  # nb <= 2, static
            qh = split_heads(q2d[n * lq:(n + 1) * lq, :]).astype(bf16)  # (H, lq, dh)
            kh = split_heads(k2d[n * lk:(n + 1) * lk, :]).astype(bf16)  # (H, lk, dh)
            vh = split_heads(v2d[n * lk:(n + 1) * lk, :]).astype(bf16)  # (H, lk, dh)
            s = jnp.einsum('hqd,hkd->hqk', qh, kh,
                           preferred_element_type=f32)                  # (H, lq, lk)
            s = s - jnp.max(s, axis=-1, keepdims=True)
            p = jnp.exp(s)
            p = p * pl.reciprocal(jnp.sum(p, axis=-1, keepdims=True), approx=True)
            o = jnp.einsum('hqk,hkd->hqd', p.astype(bf16), vh,
                           preferred_element_type=f32)                  # (H, lq, dh)
            # Out-projection folded per head as ONE head-batched matmul:
            #   concat_h(o_h) @ Wo^T == sum_h o_h @ Wo^T[h*dh:(h+1)*dh, :]
            c = jnp.einsum('hqd,hde->hqe', o.astype(bf16), woh,
                           preferred_element_type=f32)                  # (H, lq, E)
            acc = c[0]
            for h in range(1, H):
                acc = acc + c[h]
            outs.append(acc)                                            # (lq, E)
        out = outs[0] if nb == 1 else jnp.concatenate(outs, axis=0)
        return out + bo

    def to_rows(ref):
        # -> (nb*L, E) batch-major rows, f32.
        if batch_leading:                     # block (1, L, E)
            return ref[0].astype(f32)
        L = ref.shape[0]                      # block (L, nb, E): seq-first layout
        cols = [ref[:, n:n + 1, :].reshape(L, E) for n in range(nb)]
        x = cols[0] if nb == 1 else jnp.concatenate(cols, axis=0)
        return x.astype(f32)

    T = tgt_ref.shape[1] if batch_leading else tgt_ref.shape[0]
    S = mem_ref.shape[1] if batch_leading else mem_ref.shape[0]

    x = to_rows(tgt_ref)      # (nb*T, E)
    mem = to_rows(mem_ref)    # (nb*S, E)

    # TODO(synk): for deeper stacks, switch this static unroll to lax.fori_loop
    # with dynamic ref[l] indexing; at num_layers == 2 full unroll is fine.
    for l in range(num_layers):
        # ---- self attention (fused QKV projection) ----
        qkv = mm(x, sa_wqkv_ref[l]) + vec(l, 0, 3 * E)                  # (nb*T, 3E)
        sa = mha(qkv[:, 0:E], qkv[:, E:2 * E], qkv[:, 2 * E:3 * E],
                 T, T, sa_woh_ref[l], vec(l, 1, E))
        x = layernorm(x + sa, vec(l, 7, E), vec(l, 8, E))

        # ---- cross attention (q from tgt, fused KV from memory) ----
        q = mm(x, ca_wq_ref[l]) + vec(l, 2, E)                          # (nb*T, E)
        kv = mm(mem, ca_wkv_ref[l]) + vec(l, 3, 2 * E)                  # (nb*S, 2E)
        ca = mha(q, kv[:, 0:E], kv[:, E:2 * E],
                 T, S, ca_woh_ref[l], vec(l, 4, E))
        x = layernorm(x + ca, vec(l, 9, E), vec(l, 10, E))

        # ---- feed-forward: linear2(relu(linear1(x))) ----
        h1 = jnp.maximum(mm(x, ff1_w_ref[l]) + vec(l, 5, F), 0.0)       # (nb*T, F)
        ff = mm(h1, ff2_w_ref[l]) + vec(l, 6, E)                        # (nb*T, E)
        x = layernorm(x + ff, vec(l, 11, E), vec(l, 12, E))

    # Final linear on the last target position of each batch row: fc(x[-1]).
    lasts = [x[n * T + (T - 1): n * T + T, :] for n in range(nb)]
    last = lasts[0] if nb == 1 else jnp.concatenate(lasts, axis=0)      # (nb, E)
    res = mm(last, fc_w_ref[...]) + fc_b_ref[...]                       # (nb, E)
    out_ref[...] = res[:, None, :]


# ----------------------------------------------------------------------------
# Wrapper
# ----------------------------------------------------------------------------
def _multi_tensorcore_chip():
    """True on chips with >1 TensorCore per device (v7x; v4/v5p megacore)."""
    try:
        kind = jax.devices()[0].device_kind.lower()
    except Exception:
        return False
    return ("v7" in kind) or ("v4" in kind) or ("v5p" in kind)


def transformer_decoder_forward(tgt, memory, kp, *, num_heads, num_layers):
    return _forward_impl(tgt, memory, kp, num_heads=num_heads,
                         num_layers=num_layers,
                         multi_tc=_multi_tensorcore_chip())


@functools.partial(jax.jit, static_argnames=("num_heads", "num_layers", "multi_tc"))
def _forward_impl(tgt, memory, kp, *, num_heads, num_layers, multi_tc):
    # tgt: (T, N, E), memory: (S, N, E) -- PyTorch seq-first layout.
    T, N, E = tgt.shape
    S = memory.shape[0]
    F = kp["ff1_w"].shape[-1]

    if multi_tc:
        # v7x / megacore: one batch row per grid step, sharded across cores.
        # Batch-leading blocks (proven layout): last two block dims (T, E) /
        # (S, E) satisfy the (8,128)/full-dim constraint.
        nb, batch_leading, grid = 1, True, (N,)
        tgt_in = jnp.transpose(tgt, (1, 0, 2)).astype(jnp.float32)      # (N, T, E)
        mem_in = jnp.transpose(memory, (1, 0, 2)).astype(jnp.float32)   # (N, S, E)
        tgt_spec = pl.BlockSpec((1, T, E), lambda g: (g, 0, 0))
        mem_spec = pl.BlockSpec((1, S, E), lambda g: (g, 0, 0))
        out_spec = pl.BlockSpec((1, 1, E), lambda g: (g, 0, 0))
    else:
        # Single-TC chips (v5e / v6e): fold the whole batch into one grid step.
        # Seq-first inputs are read directly (no wrapper transpose); the block
        # equals the full array so there is a single DMA-bookkeeping step and
        # projection/FFN matmuls run with M = N*T rows.
        nb, batch_leading, grid = N, False, (1,)
        tgt_in = tgt.astype(jnp.float32)
        mem_in = memory.astype(jnp.float32)
        tgt_spec = pl.BlockSpec((T, N, E), lambda g: (0, 0, 0))
        mem_spec = pl.BlockSpec((S, N, E), lambda g: (0, 0, 0))
        out_spec = pl.BlockSpec((N, 1, E), lambda g: (0, 0, 0))

    weights = (kp["sa_wqkv"], kp["sa_woh"], kp["ca_wq"], kp["ca_wkv"],
               kp["ca_woh"], kp["ff1_w"], kp["ff2_w"], kp["vecs"],
               kp["fc_w"], kp["fc_b"])

    def const_spec(arr):
        # Whole array VMEM-resident; constant index map -> fetched once.
        # (Weights total ~60 KB, so buffering cost is irrelevant at grid<=2.)
        return pl.BlockSpec(arr.shape, lambda g, nd=arr.ndim: (0,) * nd)

    in_specs = [tgt_spec, mem_spec] + [const_spec(w) for w in weights]

    kern = functools.partial(
        _fused_decoder_kernel,
        num_layers=num_layers, num_heads=num_heads, d_model=E, ff_dim=F,
        nb=nb, batch_leading=batch_leading, eps=1e-5)

    out = pl.pallas_call(
        kern,
        out_shape=jax.ShapeDtypeStruct((N, 1, E), jnp.float32),
        grid=grid,
        in_specs=in_specs,
        out_specs=out_spec,
        compiler_params=pltpu.CompilerParams(
            dimension_semantics=("parallel",)),
    )(tgt_in, mem_in, *weights)
    return out.reshape(N, E)


# ----------------------------------------------------------------------------
# Parameter init (PyTorch layout) + one-time kernel-ready preprocessing
# ----------------------------------------------------------------------------
def init_params(key, output_dim, num_heads, num_layers, dim_feedforward):
    E, F = output_dim, dim_feedforward

    def normal(k, shape, scale=0.02):
        return scale * jax.random.normal(k, shape, dtype=jnp.float32)

    layers = []
    for _ in range(num_layers):
        key, *ks = jax.random.split(key, 11)
        layers.append({
            "self_attn": {
                "in_proj_weight": normal(ks[0], (3 * E, E)),
                "in_proj_bias": normal(ks[1], (3 * E,)),
                "out_proj_weight": normal(ks[2], (E, E)),
                "out_proj_bias": jnp.zeros((E,), jnp.float32),
            },
            "cross_attn": {
                "in_proj_weight": normal(ks[3], (3 * E, E)),
                "in_proj_bias": normal(ks[4], (3 * E,)),
                "out_proj_weight": normal(ks[5], (E, E)),
                "out_proj_bias": jnp.zeros((E,), jnp.float32),
            },
            "linear1_w": normal(ks[6], (F, E)),
            "linear1_b": normal(ks[7], (F,)),
            "linear2_w": normal(ks[8], (E, F)),
            "linear2_b": normal(ks[9], (E,)),
            "norm1_g": jnp.ones((E,), jnp.float32),
            "norm1_b": jnp.zeros((E,), jnp.float32),
            "norm2_g": jnp.ones((E,), jnp.float32),
            "norm2_b": jnp.zeros((E,), jnp.float32),
            "norm3_g": jnp.ones((E,), jnp.float32),
            "norm3_b": jnp.zeros((E,), jnp.float32),
        })

    key, k1, k2 = jax.random.split(key, 3)
    return {"layers": layers, "fc_w": normal(k1, (E, E)), "fc_b": normal(k2, (E,))}


def prepare_params(params, num_heads):
    """One-time preprocessing: transpose, fuse QKV, fold softmax scale into Q,
    split out-proj per head, pack all tiny vectors into one buffer, cast the
    matmul weights to bf16."""
    E = params["fc_w"].shape[0]
    H = num_heads
    dh = E // H
    scale = 1.0 / math.sqrt(dh)
    F = params["layers"][0]["linear1_w"].shape[0]

    vec_w = max(128, -(-max(3 * E, 2 * E, F, E) // 128) * 128)
    n_rows = 16   # 13 rows used, padded to a multiple of 8

    def t_bf16(w):  # PyTorch (out, in) -> (in, out), bf16 for the MXU
        return jnp.asarray(w, jnp.float32).T.astype(jnp.bfloat16)

    def row(v):
        v = jnp.asarray(v, jnp.float32).reshape(-1)
        return jnp.pad(v, (0, vec_w - v.shape[0]))

    sa_wqkv, sa_woh = [], []
    ca_wq, ca_wkv, ca_woh = [], [], []
    ff1, ff2, vecs = [], [], []
    for p in params["layers"]:
        sa_w = jnp.asarray(p["self_attn"]["in_proj_weight"], jnp.float32)   # (3E, E)
        sa_b = jnp.asarray(p["self_attn"]["in_proj_bias"], jnp.float32)     # (3E,)
        sa_w = sa_w.at[:E].multiply(scale)          # fold 1/sqrt(dh) into Wq
        sa_b = sa_b.at[:E].multiply(scale)          # ... and into bq
        sa_wqkv.append(sa_w.T.astype(jnp.bfloat16))                         # (E, 3E)
        sa_woh.append(t_bf16(p["self_attn"]["out_proj_weight"]).reshape(H, dh, E))

        ca_w = jnp.asarray(p["cross_attn"]["in_proj_weight"], jnp.float32)
        ca_b = jnp.asarray(p["cross_attn"]["in_proj_bias"], jnp.float32)
        ca_wq.append((ca_w[:E] * scale).T.astype(jnp.bfloat16))             # (E, E)
        ca_wkv.append(ca_w[E:].T.astype(jnp.bfloat16))                      # (E, 2E)
        ca_woh.append(t_bf16(p["cross_attn"]["out_proj_weight"]).reshape(H, dh, E))

        ff1.append(t_bf16(p["linear1_w"]))                                  # (E, F)
        ff2.append(t_bf16(p["linear2_w"]))                                  # (F, E)

        rows = [
            row(sa_b),                               # 0: QKV bias (Q pre-scaled)
            row(p["self_attn"]["out_proj_bias"]),    # 1
            row(ca_b[:E] * scale),                   # 2: Q bias (pre-scaled)
            row(ca_b[E:]),                           # 3: KV bias
            row(p["cross_attn"]["out_proj_bias"]),   # 4
            row(p["linear1_b"]),                     # 5
            row(p["linear2_b"]),                     # 6
            row(p["norm1_g"]), row(p["norm1_b"]),    # 7, 8
            row(p["norm2_g"]), row(p["norm2_b"]),    # 9, 10
            row(p["norm3_g"]), row(p["norm3_b"]),    # 11, 12
        ]
        rows += [jnp.zeros((vec_w,), jnp.float32)] * (n_rows - len(rows))
        vecs.append(jnp.stack(rows, axis=0))

    return {
        "sa_wqkv": jnp.stack(sa_wqkv), "sa_woh": jnp.stack(sa_woh),
        "ca_wq": jnp.stack(ca_wq), "ca_wkv": jnp.stack(ca_wkv),
        "ca_woh": jnp.stack(ca_woh),
        "ff1_w": jnp.stack(ff1), "ff2_w": jnp.stack(ff2),
        "vecs": jnp.stack(vecs),                      # (L, 16, 128) f32 packed
        "fc_w": t_bf16(params["fc_w"]),
        "fc_b": jnp.asarray(params["fc_b"], jnp.float32).reshape(1, E),
    }


# ----------------------------------------------------------------------------
# Pure-JAX reference (matches nn.TransformerDecoder, post-norm, eval mode)
# ----------------------------------------------------------------------------
def _reference_forward(tgt, memory, params, num_heads):
    E = tgt.shape[-1]
    H = num_heads
    dh = E // H

    def mha_ref(q_in, kv_in, ap):
        w, b = ap["in_proj_weight"], ap["in_proj_bias"]
        q = q_in @ w[:E].T + b[:E]
        k = kv_in @ w[E:2 * E].T + b[E:2 * E]
        v = kv_in @ w[2 * E:].T + b[2 * E:]
        q = q.reshape(-1, H, dh).transpose(1, 0, 2)
        k = k.reshape(-1, H, dh).transpose(1, 0, 2)
        v = v.reshape(-1, H, dh).transpose(1, 0, 2)
        s = jnp.einsum('hqd,hkd->hqk', q, k) / math.sqrt(dh)
        p = jax.nn.softmax(s, axis=-1)
        o = jnp.einsum('hqk,hkd->hqd', p, v)
        o = o.transpose(1, 0, 2).reshape(-1, E)
        return o @ ap["out_proj_weight"].T + ap["out_proj_bias"]

    def ln(x, g, b):
        m = x.mean(-1, keepdims=True)
        v = ((x - m) ** 2).mean(-1, keepdims=True)
        return (x - m) / jnp.sqrt(v + 1e-5) * g + b

    T, N, _ = tgt.shape
    outs = []
    for n in range(N):
        x, mem = tgt[:, n, :], memory[:, n, :]
        for p in params["layers"]:
            x = ln(x + mha_ref(x, x, p["self_attn"]), p["norm1_g"], p["norm1_b"])
            x = ln(x + mha_ref(x, mem, p["cross_attn"]), p["norm2_g"], p["norm2_b"])
            h = jax.nn.relu(x @ p["linear1_w"].T + p["linear1_b"])
            f = h @ p["linear2_w"].T + p["linear2_b"]
            x = ln(x + f, p["norm3_g"], p["norm3_b"])
        outs.append(x[-1] @ params["fc_w"].T + params["fc_b"])
    return jnp.stack(outs, axis=0)


# ----------------------------------------------------------------------------
# Main
# ----------------------------------------------------------------------------
if __name__ == "__main__":
    # Module hyper-parameters
    output_dim = 32       # d_model
    num_heads = 4
    num_layers = 2
    dim_feedforward = 64
    # dropout = 0.1       # identity in the deterministic (eval-mode) forward

    # Small shapes: tgt (T, N, E), memory (S, N, E) — seq-first layout.
    T, S, N = 8, 8, 2

    key = jax.random.PRNGKey(0)
    key, k_tgt, k_mem, k_par = jax.random.split(key, 4)
    tgt = jax.random.normal(k_tgt, (T, N, output_dim), dtype=jnp.float32)
    memory = jax.random.normal(k_mem, (S, N, output_dim), dtype=jnp.float32)

    params = init_params(k_par, output_dim, num_heads, num_layers, dim_feedforward)
    kparams = prepare_params(params, num_heads)   # one-time weight preprocessing

    out = transformer_decoder_forward(
        tgt, memory, kparams, num_heads=num_heads, num_layers=num_layers)
    out = jax.block_until_ready(out)

    assert out.shape == (N, output_dim), out.shape
    assert bool(jnp.all(jnp.isfinite(out)))

    # Loose-tolerance check vs. a pure-JAX f32 reference (kernel uses bf16
    # matmuls + approx reciprocal, per the review's correctness notes).
    ref = _reference_forward(tgt, memory, params, num_heads)
    max_err = float(jnp.max(jnp.abs(out - ref)))
    assert max_err < 5e-2, f"max abs error vs reference: {max_err}"

    # TODO(synk): dropout is identity (eval mode); no tgt/memory masks, matching the reference call.
    print("KERNEL_OK")
</pallas_src>

<mosaic_0001>
module attributes {stable_mosaic.version = 11 : i64} {
  func.func @_fused_decoder_kernel(%arg0: i32, %arg1: memref<8x2x32xf32, #tpu.memory_space<vmem>>, %arg2: memref<8x2x32xf32, #tpu.memory_space<vmem>>, %arg3: memref<2x32x96xbf16, #tpu.memory_space<vmem>>, %arg4: memref<2x4x8x32xbf16, #tpu.memory_space<vmem>>, %arg5: memref<2x32x32xbf16, #tpu.memory_space<vmem>>, %arg6: memref<2x32x64xbf16, #tpu.memory_space<vmem>>, %arg7: memref<2x4x8x32xbf16, #tpu.memory_space<vmem>>, %arg8: memref<2x32x64xbf16, #tpu.memory_space<vmem>>, %arg9: memref<2x64x32xbf16, #tpu.memory_space<vmem>>, %arg10: memref<2x16x128xf32, #tpu.memory_space<vmem>>, %arg11: memref<32x32xbf16, #tpu.memory_space<vmem>>, %arg12: memref<1x32xf32, #tpu.memory_space<vmem>>, %arg13: memref<2x1x32xf32, #tpu.memory_space<vmem>>) attributes {dimension_semantics = [#tpu.dimension_semantics<parallel>], iteration_bounds = array<i64: 1>, scalar_prefetch = 0 : i64, scratch_operands = 0 : i64, tpu.core_type = #tpu.core_type<tc>, window_params = [{pipeline_mode = #tpu.pipeline_mode<synchronous>, transform_indices = @transform_0, window_bounds = array<i64: 8, 2, 32>}, {pipeline_mode = #tpu.pipeline_mode<synchronous>, transform_indices = @transform_1, window_bounds = array<i64: 8, 2, 32>}, {pipeline_mode = #tpu.pipeline_mode<synchronous>, transform_indices = @transform_2, window_bounds = array<i64: 2, 32, 96>}, {pipeline_mode = #tpu.pipeline_mode<synchronous>, transform_indices = @transform_3, window_bounds = array<i64: 2, 4, 8, 32>}, {pipeline_mode = #tpu.pipeline_mode<synchronous>, transform_indices = @transform_4, window_bounds = array<i64: 2, 32, 32>}, {pipeline_mode = #tpu.pipeline_mode<synchronous>, transform_indices = @transform_5, window_bounds = array<i64: 2, 32, 64>}, {pipeline_mode = #tpu.pipeline_mode<synchronous>, transform_indices = @transform_6, window_bounds = array<i64: 2, 4, 8, 32>}, {pipeline_mode = #tpu.pipeline_mode<synchronous>, transform_indices = @transform_7, window_bounds = array<i64: 2, 32, 64>}, {pipeline_mode = #tpu.pipeline_mode<synchronous>, transform_indices = @transform_8, window_bounds = array<i64: 2, 64, 32>}, {pipeline_mode = #tpu.pipeline_mode<synchronous>, transform_indices = @transform_9, window_bounds = array<i64: 2, 16, 128>}, {pipeline_mode = #tpu.pipeline_mode<synchronous>, transform_indices = @transform_10, window_bounds = array<i64: 32, 32>}, {pipeline_mode = #tpu.pipeline_mode<synchronous>, transform_indices = @transform_11, window_bounds = array<i64: 1, 32>}, {pipeline_mode = #tpu.pipeline_mode<synchronous>, transform_indices = @transform_12, window_bounds = array<i64: 2, 1, 32>}]} {
    %c0 = arith.constant 0 : index
    %c0_0 = arith.constant 0 : index
    %c0_1 = arith.constant 0 : index
    %0 = vector.load %arg1[%c0, %c0_0, %c0_1] : memref<8x2x32xf32, #tpu.memory_space<vmem>>, vector<8x1x32xf32>
    %1 = vector.shape_cast %0 : vector<8x1x32xf32> to vector<8x32xf32>
    %c0_2 = arith.constant 0 : index
    %c1 = arith.constant 1 : index
    %c0_3 = arith.constant 0 : index
    %2 = vector.load %arg1[%c0_2, %c1, %c0_3] : memref<8x2x32xf32, #tpu.memory_space<vmem>>, vector<8x1x32xf32>
    %3 = vector.shape_cast %2 : vector<8x1x32xf32> to vector<8x32xf32>
    %4 = tpu.concatenate %1, %3 in 0 : vector<8x32xf32>, vector<8x32xf32> -> vector<16x32xf32>
    %c0_4 = arith.constant 0 : index
    %c0_5 = arith.constant 0 : index
    %c0_6 = arith.constant 0 : index
    %5 = vector.load %arg2[%c0_4, %c0_5, %c0_6] : memref<8x2x32xf32, #tpu.memory_space<vmem>>, vector<8x1x32xf32>
    %6 = vector.shape_cast %5 : vector<8x1x32xf32> to vector<8x32xf32>
    %c0_7 = arith.constant 0 : index
    %c1_8 = arith.constant 1 : index
    %c0_9 = arith.constant 0 : index
    %7 = vector.load %arg2[%c0_7, %c1_8, %c0_9] : memref<8x2x32xf32, #tpu.memory_space<vmem>>, vector<8x1x32xf32>
    %8 = vector.shape_cast %7 : vector<8x1x32xf32> to vector<8x32xf32>
    %9 = tpu.concatenate %6, %8 in 0 : vector<8x32xf32>, vector<8x32xf32> -> vector<16x32xf32>
    %c0_10 = arith.constant 0 : index
    %c0_11 = arith.constant 0 : index
    %c0_12 = arith.constant 0 : index
    %10 = vector.load %arg3[%c0_10, %c0_11, %c0_12] : memref<2x32x96xbf16, #tpu.memory_space<vmem>>, vector<1x32x96xbf16>
    %11 = vector.shape_cast %10 : vector<1x32x96xbf16> to vector<32x96xbf16>
    %12 = arith.truncf %4 : vector<16x32xf32> to vector<16x32xbf16>
    %cst = arith.constant dense<0.000000e+00> : vector<16x96xf32>
    %13 = tpu.matmul %12, %11, %cst {dimension_numbers = #tpu.dot_dimension_numbers<[1], [0], [0], [1], [0, 0, 1, 1], [], []>} : vector<16x32xbf16>, vector<32x96xbf16>, vector<16x96xf32> -> vector<16x96xf32>
    %c0_13 = arith.constant 0 : index
    %c0_14 = arith.constant 0 : index
    %c0_15 = arith.constant 0 : index
    %14 = vector.load %arg10[%c0_13, %c0_14, %c0_15] : memref<2x16x128xf32, #tpu.memory_space<vmem>>, vector<1x1x96xf32>
    %15 = vector.shape_cast %14 : vector<1x1x96xf32> to vector<1x96xf32>
    %16 = vector.broadcast %15 : vector<1x96xf32> to vector<16x96xf32>
    %17 = arith.addf %13, %16 : vector<16x96xf32>
    %18 = vector.extract_strided_slice %17 {offsets = [0, 0], sizes = [16, 32], strides = [1, 1]} : vector<16x96xf32> to vector<16x32xf32>
    %19 = vector.extract_strided_slice %17 {offsets = [0, 32], sizes = [16, 32], strides = [1, 1]} : vector<16x96xf32> to vector<16x32xf32>
    %20 = vector.extract_strided_slice %17 {offsets = [0, 64], sizes = [16, 32], strides = [1, 1]} : vector<16x96xf32> to vector<16x32xf32>
    %c0_16 = arith.constant 0 : index
    %c0_17 = arith.constant 0 : index
    %c0_18 = arith.constant 0 : index
    %c0_19 = arith.constant 0 : index
    %21 = vector.load %arg4[%c0_16, %c0_17, %c0_18, %c0_19] : memref<2x4x8x32xbf16, #tpu.memory_space<vmem>>, vector<1x4x8x32xbf16>
    %22 = vector.shape_cast %21 : vector<1x4x8x32xbf16> to vector<4x8x32xbf16>
    %c0_20 = arith.constant 0 : index
    %c1_21 = arith.constant 1 : index
    %c0_22 = arith.constant 0 : index
    %23 = vector.load %arg10[%c0_20, %c1_21, %c0_22] : memref<2x16x128xf32, #tpu.memory_space<vmem>>, vector<1x1x32xf32>
    %24 = vector.shape_cast %23 : vector<1x1x32xf32> to vector<1x32xf32>
    %25 = vector.extract_strided_slice %18 {offsets = [0, 0], sizes = [8, 32], strides = [1, 1]} : vector<16x32xf32> to vector<8x32xf32>
    %26 = vector.extract_strided_slice %25 {offsets = [0, 0], sizes = [8, 8], strides = [1, 1]} : vector<8x32xf32> to vector<8x8xf32>
    %27 = vector.extract_strided_slice %25 {offsets = [0, 8], sizes = [8, 8], strides = [1, 1]} : vector<8x32xf32> to vector<8x8xf32>
    %28 = vector.extract_strided_slice %25 {offsets = [0, 16], sizes = [8, 8], strides = [1, 1]} : vector<8x32xf32> to vector<8x8xf32>
    %29 = vector.extract_strided_slice %25 {offsets = [0, 24], sizes = [8, 8], strides = [1, 1]} : vector<8x32xf32> to vector<8x8xf32>
    %30 = vector.shape_cast %26 : vector<8x8xf32> to vector<1x8x8xf32>
    %31 = vector.shape_cast %27 : vector<8x8xf32> to vector<1x8x8xf32>
    %32 = vector.shape_cast %28 : vector<8x8xf32> to vector<1x8x8xf32>
    %33 = vector.shape_cast %29 : vector<8x8xf32> to vector<1x8x8xf32>
    %34 = tpu.concatenate %30, %31, %32, %33 in 0 : vector<1x8x8xf32>, vector<1x8x8xf32>, vector<1x8x8xf32>, vector<1x8x8xf32> -> vector<4x8x8xf32>
    %35 = arith.truncf %34 : vector<4x8x8xf32> to vector<4x8x8xbf16>
    %36 = vector.extract_strided_slice %19 {offsets = [0, 0], sizes = [8, 32], strides = [1, 1]} : vector<16x32xf32> to vector<8x32xf32>
    %37 = vector.extract_strided_slice %36 {offsets = [0, 0], sizes = [8, 8], strides = [1, 1]} : vector<8x32xf32> to vector<8x8xf32>
    %38 = vector.extract_strided_slice %36 {offsets = [0, 8], sizes = [8, 8], strides = [1, 1]} : vector<8x32xf32> to vector<8x8xf32>
    %39 = vector.extract_strided_slice %36 {offsets = [0, 16], sizes = [8, 8], strides = [1, 1]} : vector<8x32xf32> to vector<8x8xf32>
    %40 = vector.extract_strided_slice %36 {offsets = [0, 24], sizes = [8, 8], strides = [1, 1]} : vector<8x32xf32> to vector<8x8xf32>
    %41 = vector.shape_cast %37 : vector<8x8xf32> to vector<1x8x8xf32>
    %42 = vector.shape_cast %38 : vector<8x8xf32> to vector<1x8x8xf32>
    %43 = vector.shape_cast %39 : vector<8x8xf32> to vector<1x8x8xf32>
    %44 = vector.shape_cast %40 : vector<8x8xf32> to vector<1x8x8xf32>
    %45 = tpu.concatenate %41, %42, %43, %44 in 0 : vector<1x8x8xf32>, vector<1x8x8xf32>, vector<1x8x8xf32>, vector<1x8x8xf32> -> vector<4x8x8xf32>
    %46 = arith.truncf %45 : vector<4x8x8xf32> to vector<4x8x8xbf16>
    %47 = vector.extract_strided_slice %20 {offsets = [0, 0], sizes = [8, 32], strides = [1, 1]} : vector<16x32xf32> to vector<8x32xf32>
    %48 = vector.extract_strided_slice %47 {offsets = [0, 0], sizes = [8, 8], strides = [1, 1]} : vector<8x32xf32> to vector<8x8xf32>
    %49 = vector.extract_strided_slice %47 {offsets = [0, 8], sizes = [8, 8], strides = [1, 1]} : vector<8x32xf32> to vector<8x8xf32>
    %50 = vector.extract_strided_slice %47 {offsets = [0, 16], sizes = [8, 8], strides = [1, 1]} : vector<8x32xf32> to vector<8x8xf32>
    %51 = vector.extract_strided_slice %47 {offsets = [0, 24], sizes = [8, 8], strides = [1, 1]} : vector<8x32xf32> to vector<8x8xf32>
    %52 = vector.shape_cast %48 : vector<8x8xf32> to vector<1x8x8xf32>
    %53 = vector.shape_cast %49 : vector<8x8xf32> to vector<1x8x8xf32>
    %54 = vector.shape_cast %50 : vector<8x8xf32> to vector<1x8x8xf32>
    %55 = vector.shape_cast %51 : vector<8x8xf32> to vector<1x8x8xf32>
    %56 = tpu.concatenate %52, %53, %54, %55 in 0 : vector<1x8x8xf32>, vector<1x8x8xf32>, vector<1x8x8xf32>, vector<1x8x8xf32> -> vector<4x8x8xf32>
    %57 = arith.truncf %56 : vector<4x8x8xf32> to vector<4x8x8xbf16>
    "tpu.trace_start"() <{level = 10 : i32, message = "hqd,hkd->hqk"}> : () -> ()
    %cst_23 = arith.constant dense<0.000000e+00> : vector<4x8x8xf32>
    %58 = tpu.matmul %35, %46, %cst_23 {dimension_numbers = #tpu.dot_dimension_numbers<[2], [2], [1], [1], [0, 0, 0, 1, 1, 1], [0], [0]>} : vector<4x8x8xbf16>, vector<4x8x8xbf16>, vector<4x8x8xf32> -> vector<4x8x8xf32>
    "tpu.trace_stop"() : () -> ()
    %cst_24 = arith.constant dense<0xFF800000> : vector<4x8xf32>
    %59 = vector.multi_reduction <maximumf>, %58, %cst_24 [2] : vector<4x8x8xf32> to vector<4x8xf32>
    %60 = vector.shape_cast %59 : vector<4x8xf32> to vector<4x8x1xf32>
    %61 = vector.broadcast %60 : vector<4x8x1xf32> to vector<4x8x8xf32>
    %62 = arith.subf %58, %61 : vector<4x8x8xf32>
    %63 = math.exp %62 : vector<4x8x8xf32>
    %cst_25 = arith.constant dense<0.000000e+00> : vector<4x8xf32>
    %64 = vector.multi_reduction <add>, %63, %cst_25 [2] : vector<4x8x8xf32> to vector<4x8xf32>
    %65 = vector.shape_cast %64 : vector<4x8xf32> to vector<4x8x1xf32>
    %66 = tpu.reciprocal %65 {approx = true} : vector<4x8x1xf32> -> vector<4x8x1xf32>
    %67 = vector.broadcast %66 : vector<4x8x1xf32> to vector<4x8x8xf32>
    %68 = arith.mulf %63, %67 : vector<4x8x8xf32>
    %69 = arith.truncf %68 : vector<4x8x8xf32> to vector<4x8x8xbf16>
    "tpu.trace_start"() <{level = 10 : i32, message = "hqk,hkd->hqd"}> : () -> ()
    %cst_26 = arith.constant dense<0.000000e+00> : vector<4x8x8xf32>
    %70 = tpu.matmul %69, %57, %cst_26 {dimension_numbers = #tpu.dot_dimension_numbers<[2], [1], [1], [2], [0, 0, 0, 1, 1, 2], [0], [0]>} : vector<4x8x8xbf16>, vector<4x8x8xbf16>, vector<4x8x8xf32> -> vector<4x8x8xf32>
    "tpu.trace_stop"() : () -> ()
    %71 = arith.truncf %70 : vector<4x8x8xf32> to vector<4x8x8xbf16>
    "tpu.trace_start"() <{level = 10 : i32, message = "hqd,hde->hqe"}> : () -> ()
    %cst_27 = arith.constant dense<0.000000e+00> : vector<4x8x32xf32>
    %72 = tpu.matmul %71, %22, %cst_27 {dimension_numbers = #tpu.dot_dimension_numbers<[2], [1], [1], [2], [0, 0, 0, 1, 1, 2], [0], [0]>} : vector<4x8x8xbf16>, vector<4x8x32xbf16>, vector<4x8x32xf32> -> vector<4x8x32xf32>
    "tpu.trace_stop"() : () -> ()
    %73 = vector.extract_strided_slice %72 {offsets = [0, 0, 0], sizes = [1, 8, 32], strides = [1, 1, 1]} : vector<4x8x32xf32> to vector<1x8x32xf32>
    %74 = vector.shape_cast %73 : vector<1x8x32xf32> to vector<8x32xf32>
    %75 = vector.extract_strided_slice %72 {offsets = [1, 0, 0], sizes = [1, 8, 32], strides = [1, 1, 1]} : vector<4x8x32xf32> to vector<1x8x32xf32>
    %76 = vector.shape_cast %75 : vector<1x8x32xf32> to vector<8x32xf32>
    %77 = arith.addf %74, %76 : vector<8x32xf32>
    %78 = vector.extract_strided_slice %72 {offsets = [2, 0, 0], sizes = [1, 8, 32], strides = [1, 1, 1]} : vector<4x8x32xf32> to vector<1x8x32xf32>
    %79 = vector.shape_cast %78 : vector<1x8x32xf32> to vector<8x32xf32>
    %80 = arith.addf %77, %79 : vector<8x32xf32>
    %81 = vector.extract_strided_slice %72 {offsets = [3, 0, 0], sizes = [1, 8, 32], strides = [1, 1, 1]} : vector<4x8x32xf32> to vector<1x8x32xf32>
    %82 = vector.shape_cast %81 : vector<1x8x32xf32> to vector<8x32xf32>
    %83 = arith.addf %80, %82 : vector<8x32xf32>
    %84 = vector.extract_strided_slice %18 {offsets = [8, 0], sizes = [8, 32], strides = [1, 1]} : vector<16x32xf32> to vector<8x32xf32>
    %85 = vector.extract_strided_slice %84 {offsets = [0, 0], sizes = [8, 8], strides = [1, 1]} : vector<8x32xf32> to vector<8x8xf32>
    %86 = vector.extract_strided_slice %84 {offsets = [0, 8], sizes = [8, 8], strides = [1, 1]} : vector<8x32xf32> to vector<8x8xf32>
    %87 = vector.extract_strided_slice %84 {offsets = [0, 16], sizes = [8, 8], strides = [1, 1]} : vector<8x32xf32> to vector<8x8xf32>
    %88 = vector.extract_strided_slice %84 {offsets = [0, 24], sizes = [8, 8], strides = [1, 1]} : vector<8x32xf32> to vector<8x8xf32>
    %89 = vector.shape_cast %85 : vector<8x8xf32> to vector<1x8x8xf32>
    %90 = vector.shape_cast %86 : vector<8x8xf32> to vector<1x8x8xf32>
    %91 = vector.shape_cast %87 : vector<8x8xf32> to vector<1x8x8xf32>
    %92 = vector.shape_cast %88 : vector<8x8xf32> to vector<1x8x8xf32>
    %93 = tpu.concatenate %89, %90, %91, %92 in 0 : vector<1x8x8xf32>, vector<1x8x8xf32>, vector<1x8x8xf32>, vector<1x8x8xf32> -> vector<4x8x8xf32>
    %94 = arith.truncf %93 : vector<4x8x8xf32> to vector<4x8x8xbf16>
    %95 = vector.extract_strided_slice %19 {offsets = [8, 0], sizes = [8, 32], strides = [1, 1]} : vector<16x32xf32> to vector<8x32xf32>
    %96 = vector.extract_strided_slice %95 {offsets = [0, 0], sizes = [8, 8], strides = [1, 1]} : vector<8x32xf32> to vector<8x8xf32>
    %97 = vector.extract_strided_slice %95 {offsets = [0, 8], sizes = [8, 8], strides = [1, 1]} : vector<8x32xf32> to vector<8x8xf32>
    %98 = vector.extract_strided_slice %95 {offsets = [0, 16], sizes = [8, 8], strides = [1, 1]} : vector<8x32xf32> to vector<8x8xf32>
    %99 = vector.extract_strided_slice %95 {offsets = [0, 24], sizes = [8, 8], strides = [1, 1]} : vector<8x32xf32> to vector<8x8xf32>
    %100 = vector.shape_cast %96 : vector<8x8xf32> to vector<1x8x8xf32>
    %101 = vector.shape_cast %97 : vector<8x8xf32> to vector<1x8x8xf32>
    %102 = vector.shape_cast %98 : vector<8x8xf32> to vector<1x8x8xf32>
    %103 = vector.shape_cast %99 : vector<8x8xf32> to vector<1x8x8xf32>
    %104 = tpu.concatenate %100, %101, %102, %103 in 0 : vector<1x8x8xf32>, vector<1x8x8xf32>, vector<1x8x8xf32>, vector<1x8x8xf32> -> vector<4x8x8xf32>
    %105 = arith.truncf %104 : vector<4x8x8xf32> to vector<4x8x8xbf16>
    %106 = vector.extract_strided_slice %20 {offsets = [8, 0], sizes = [8, 32], strides = [1, 1]} : vector<16x32xf32> to vector<8x32xf32>
    %107 = vector.extract_strided_slice %106 {offsets = [0, 0], sizes = [8, 8], strides = [1, 1]} : vector<8x32xf32> to vector<8x8xf32>
    %108 = vector.extract_strided_slice %106 {offsets = [0, 8], sizes = [8, 8], strides = [1, 1]} : vector<8x32xf32> to vector<8x8xf32>
    %109 = vector.extract_strided_slice %106 {offsets = [0, 16], sizes = [8, 8], strides = [1, 1]} : vector<8x32xf32> to vector<8x8xf32>
    %110 = vector.extract_strided_slice %106 {offsets = [0, 24], sizes = [8, 8], strides = [1, 1]} : vector<8x32xf32> to vector<8x8xf32>
    %111 = vector.shape_cast %107 : vector<8x8xf32> to vector<1x8x8xf32>
    %112 = vector.shape_cast %108 : vector<8x8xf32> to vector<1x8x8xf32>
    %113 = vector.shape_cast %109 : vector<8x8xf32> to vector<1x8x8xf32>
    %114 = vector.shape_cast %110 : vector<8x8xf32> to vector<1x8x8xf32>
    %115 = tpu.concatenate %111, %112, %113, %114 in 0 : vector<1x8x8xf32>, vector<1x8x8xf32>, vector<1x8x8xf32>, vector<1x8x8xf32> -> vector<4x8x8xf32>
    %116 = arith.truncf %115 : vector<4x8x8xf32> to vector<4x8x8xbf16>
    "tpu.trace_start"() <{level = 10 : i32, message = "hqd,hkd->hqk"}> : () -> ()
    %cst_28 = arith.constant dense<0.000000e+00> : vector<4x8x8xf32>
    %117 = tpu.matmul %94, %105, %cst_28 {dimension_numbers = #tpu.dot_dimension_numbers<[2], [2], [1], [1], [0, 0, 0, 1, 1, 1], [0], [0]>} : vector<4x8x8xbf16>, vector<4x8x8xbf16>, vector<4x8x8xf32> -> vector<4x8x8xf32>
    "tpu.trace_stop"() : () -> ()
    %cst_29 = arith.constant dense<0xFF800000> : vector<4x8xf32>
    %118 = vector.multi_reduction <maximumf>, %117, %cst_29 [2] : vector<4x8x8xf32> to vector<4x8xf32>
    %119 = vector.shape_cast %118 : vector<4x8xf32> to vector<4x8x1xf32>
    %120 = vector.broadcast %119 : vector<4x8x1xf32> to vector<4x8x8xf32>
    %121 = arith.subf %117, %120 : vector<4x8x8xf32>
    %122 = math.exp %121 : vector<4x8x8xf32>
    %cst_30 = arith.constant dense<0.000000e+00> : vector<4x8xf32>
    %123 = vector.multi_reduction <add>, %122, %cst_30 [2] : vector<4x8x8xf32> to vector<4x8xf32>
    %124 = vector.shape_cast %123 : vector<4x8xf32> to vector<4x8x1xf32>
    %125 = tpu.reciprocal %124 {approx = true} : vector<4x8x1xf32> -> vector<4x8x1xf32>
    %126 = vector.broadcast %125 : vector<4x8x1xf32> to vector<4x8x8xf32>
    %127 = arith.mulf %122, %126 : vector<4x8x8xf32>
    %128 = arith.truncf %127 : vector<4x8x8xf32> to vector<4x8x8xbf16>
    "tpu.trace_start"() <{level = 10 : i32, message = "hqk,hkd->hqd"}> : () -> ()
    %cst_31 = arith.constant dense<0.000000e+00> : vector<4x8x8xf32>
    %129 = tpu.matmul %128, %116, %cst_31 {dimension_numbers = #tpu.dot_dimension_numbers<[2], [1], [1], [2], [0, 0, 0, 1, 1, 2], [0], [0]>} : vector<4x8x8xbf16>, vector<4x8x8xbf16>, vector<4x8x8xf32> -> vector<4x8x8xf32>
    "tpu.trace_stop"() : () -> ()
    %130 = arith.truncf %129 : vector<4x8x8xf32> to vector<4x8x8xbf16>
    "tpu.trace_start"() <{level = 10 : i32, message = "hqd,hde->hqe"}> : () -> ()
    %cst_32 = arith.constant dense<0.000000e+00> : vector<4x8x32xf32>
    %131 = tpu.matmul %130, %22, %cst_32 {dimension_numbers = #tpu.dot_dimension_numbers<[2], [1], [1], [2], [0, 0, 0, 1, 1, 2], [0], [0]>} : vector<4x8x8xbf16>, vector<4x8x32xbf16>, vector<4x8x32xf32> -> vector<4x8x32xf32>
    "tpu.trace_stop"() : () -> ()
    %132 = vector.extract_strided_slice %131 {offsets = [0, 0, 0], sizes = [1, 8, 32], strides = [1, 1, 1]} : vector<4x8x32xf32> to vector<1x8x32xf32>
    %133 = vector.shape_cast %132 : vector<1x8x32xf32> to vector<8x32xf32>
    %134 = vector.extract_strided_slice %131 {offsets = [1, 0, 0], sizes = [1, 8, 32], strides = [1, 1, 1]} : vector<4x8x32xf32> to vector<1x8x32xf32>
    %135 = vector.shape_cast %134 : vector<1x8x32xf32> to vector<8x32xf32>
    %136 = arith.addf %133, %135 : vector<8x32xf32>
    %137 = vector.extract_strided_slice %131 {offsets = [2, 0, 0], sizes = [1, 8, 32], strides = [1, 1, 1]} : vector<4x8x32xf32> to vector<1x8x32xf32>
    %138 = vector.shape_cast %137 : vector<1x8x32xf32> to vector<8x32xf32>
    %139 = arith.addf %136, %138 : vector<8x32xf32>
    %140 = vector.extract_strided_slice %131 {offsets = [3, 0, 0], sizes = [1, 8, 32], strides = [1, 1, 1]} : vector<4x8x32xf32> to vector<1x8x32xf32>
    %141 = vector.shape_cast %140 : vector<1x8x32xf32> to vector<8x32xf32>
    %142 = arith.addf %139, %141 : vector<8x32xf32>
    %143 = tpu.concatenate %83, %142 in 0 : vector<8x32xf32>, vector<8x32xf32> -> vector<16x32xf32>
    %144 = vector.broadcast %24 : vector<1x32xf32> to vector<16x32xf32>
    %145 = arith.addf %143, %144 : vector<16x32xf32>
    %146 = arith.addf %4, %145 : vector<16x32xf32>
    %c0_33 = arith.constant 0 : index
    %c7 = arith.constant 7 : index
    %c0_34 = arith.constant 0 : index
    %147 = vector.load %arg10[%c0_33, %c7, %c0_34] : memref<2x16x128xf32, #tpu.memory_space<vmem>>, vector<1x1x32xf32>
    %148 = vector.shape_cast %147 : vector<1x1x32xf32> to vector<1x32xf32>
    %c0_35 = arith.constant 0 : index
    %c8 = arith.constant 8 : index
    %c0_36 = arith.constant 0 : index
    %149 = vector.load %arg10[%c0_35, %c8, %c0_36] : memref<2x16x128xf32, #tpu.memory_space<vmem>>, vector<1x1x32xf32>
    %150 = vector.shape_cast %149 : vector<1x1x32xf32> to vector<1x32xf32>
    %cst_37 = arith.constant dense<0.000000e+00> : vector<16xf32>
    %151 = vector.multi_reduction <add>, %146, %cst_37 [1] : vector<16x32xf32> to vector<16xf32>
    %152 = vector.shape_cast %151 : vector<16xf32> to vector<16x1xf32>
    %cst_38 = arith.constant 3.200000e+01 : f32
    %153 = vector.broadcast %cst_38 : f32 to vector<16x1xf32>
    %154 = arith.divf %152, %153 : vector<16x1xf32>
    %155 = arith.mulf %146, %146 : vector<16x32xf32>
    %cst_39 = arith.constant dense<0.000000e+00> : vector<16xf32>
    %156 = vector.multi_reduction <add>, %155, %cst_39 [1] : vector<16x32xf32> to vector<16xf32>
    %157 = vector.shape_cast %156 : vector<16xf32> to vector<16x1xf32>
    %cst_40 = arith.constant 3.200000e+01 : f32
    %158 = vector.broadcast %cst_40 : f32 to vector<16x1xf32>
    %159 = arith.divf %157, %158 : vector<16x1xf32>
    %160 = arith.mulf %154, %154 : vector<16x1xf32>
    %161 = arith.subf %159, %160 : vector<16x1xf32>
    %162 = vector.broadcast %154 : vector<16x1xf32> to vector<16x32xf32>
    %163 = arith.subf %146, %162 : vector<16x32xf32>
    %cst_41 = arith.constant 9.99999974E-6 : f32
    %164 = vector.broadcast %cst_41 : f32 to vector<16x1xf32>
    %165 = arith.addf %161, %164 : vector<16x1xf32>
    %166 = math.rsqrt %165 : vector<16x1xf32>
    %167 = vector.broadcast %166 : vector<16x1xf32> to vector<16x32xf32>
    %168 = arith.mulf %163, %167 : vector<16x32xf32>
    %169 = vector.broadcast %148 : vector<1x32xf32> to vector<16x32xf32>
    %170 = arith.mulf %168, %169 : vector<16x32xf32>
    %171 = vector.broadcast %150 : vector<1x32xf32> to vector<16x32xf32>
    %172 = arith.addf %170, %171 : vector<16x32xf32>
    %c0_42 = arith.constant 0 : index
    %c0_43 = arith.constant 0 : index
    %c0_44 = arith.constant 0 : index
    %173 = vector.load %arg5[%c0_42, %c0_43, %c0_44] : memref<2x32x32xbf16, #tpu.memory_space<vmem>>, vector<1x32x32xbf16>
    %174 = vector.shape_cast %173 : vector<1x32x32xbf16> to vector<32x32xbf16>
    %175 = arith.truncf %172 : vector<16x32xf32> to vector<16x32xbf16>
    %cst_45 = arith.constant dense<0.000000e+00> : vector<16x32xf32>
    %176 = tpu.matmul %175, %174, %cst_45 {dimension_numbers = #tpu.dot_dimension_numbers<[1], [0], [0], [1], [0, 0, 1, 1], [], []>} : vector<16x32xbf16>, vector<32x32xbf16>, vector<16x32xf32> -> vector<16x32xf32>
    %c0_46 = arith.constant 0 : index
    %c2 = arith.constant 2 : index
    %c0_47 = arith.constant 0 : index
    %177 = vector.load %arg10[%c0_46, %c2, %c0_47] : memref<2x16x128xf32, #tpu.memory_space<vmem>>, vector<1x1x32xf32>
    %178 = vector.shape_cast %177 : vector<1x1x32xf32> to vector<1x32xf32>
    %179 = vector.broadcast %178 : vector<1x32xf32> to vector<16x32xf32>
    %180 = arith.addf %176, %179 : vector<16x32xf32>
    %c0_48 = arith.constant 0 : index
    %c0_49 = arith.constant 0 : index
    %c0_50 = arith.constant 0 : index
    %181 = vector.load %arg6[%c0_48, %c0_49, %c0_50] : memref<2x32x64xbf16, #tpu.memory_space<vmem>>, vector<1x32x64xbf16>
    %182 = vector.shape_cast %181 : vector<1x32x64xbf16> to vector<32x64xbf16>
    %183 = arith.truncf %9 : vector<16x32xf32> to vector<16x32xbf16>
    %cst_51 = arith.constant dense<0.000000e+00> : vector<16x64xf32>
    %184 = tpu.matmul %183, %182, %cst_51 {dimension_numbers = #tpu.dot_dimension_numbers<[1], [0], [0], [1], [0, 0, 1, 1], [], []>} : vector<16x32xbf16>, vector<32x64xbf16>, vector<16x64xf32> -> vector<16x64xf32>
    %c0_52 = arith.constant 0 : index
    %c3 = arith.constant 3 : index
    %c0_53 = arith.constant 0 : index
    %185 = vector.load %arg10[%c0_52, %c3, %c0_53] : memref<2x16x128xf32, #tpu.memory_space<vmem>>, vector<1x1x64xf32>
    %186 = vector.shape_cast %185 : vector<1x1x64xf32> to vector<1x64xf32>
    %187 = vector.broadcast %186 : vector<1x64xf32> to vector<16x64xf32>
    %188 = arith.addf %184, %187 : vector<16x64xf32>
    %189 = vector.extract_strided_slice %188 {offsets = [0, 0], sizes = [16, 32], strides = [1, 1]} : vector<16x64xf32> to vector<16x32xf32>
    %190 = vector.extract_strided_slice %188 {offsets = [0, 32], sizes = [16, 32], strides = [1, 1]} : vector<16x64xf32> to vector<16x32xf32>
    %c0_54 = arith.constant 0 : index
    %c0_55 = arith.constant 0 : index
    %c0_56 = arith.constant 0 : index
    %c0_57 = arith.constant 0 : index
    %191 = vector.load %arg7[%c0_54, %c0_55, %c0_56, %c0_57] : memref<2x4x8x32xbf16, #tpu.memory_space<vmem>>, vector<1x4x8x32xbf16>
    %192 = vector.shape_cast %191 : vector<1x4x8x32xbf16> to vector<4x8x32xbf16>
    %c0_58 = arith.constant 0 : index
    %c4 = arith.constant 4 : index
    %c0_59 = arith.constant 0 : index
    %193 = vector.load %arg10[%c0_58, %c4, %c0_59] : memref<2x16x128xf32, #tpu.memory_space<vmem>>, vector<1x1x32xf32>
    %194 = vector.shape_cast %193 : vector<1x1x32xf32> to vector<1x32xf32>
    %195 = vector.extract_strided_slice %180 {offsets = [0, 0], sizes = [8, 32], strides = [1, 1]} : vector<16x32xf32> to vector<8x32xf32>
    %196 = vector.extract_strided_slice %195 {offsets = [0, 0], sizes = [8, 8], strides = [1, 1]} : vector<8x32xf32> to vector<8x8xf32>
    %197 = vector.extract_strided_slice %195 {offsets = [0, 8], sizes = [8, 8], strides = [1, 1]} : vector<8x32xf32> to vector<8x8xf32>
    %198 = vector.extract_strided_slice %195 {offsets = [0, 16], sizes = [8, 8], strides = [1, 1]} : vector<8x32xf32> to vector<8x8xf32>
    %199 = vector.extract_strided_slice %195 {offsets = [0, 24], sizes = [8, 8], strides = [1, 1]} : vector<8x32xf32> to vector<8x8xf32>
    %200 = vector.shape_cast %196 : vector<8x8xf32> to vector<1x8x8xf32>
    %201 = vector.shape_cast %197 : vector<8x8xf32> to vector<1x8x8xf32>
    %202 = vector.shape_cast %198 : vector<8x8xf32> to vector<1x8x8xf32>
    %203 = vector.shape_cast %199 : vector<8x8xf32> to vector<1x8x8xf32>
    %204 = tpu.concatenate %200, %201, %202, %203 in 0 : vector<1x8x8xf32>, vector<1x8x8xf32>, vector<1x8x8xf32>, vector<1x8x8xf32> -> vector<4x8x8xf32>
    %205 = arith.truncf %204 : vector<4x8x8xf32> to vector<4x8x8xbf16>
    %206 = vector.extract_strided_slice %189 {offsets = [0, 0], sizes = [8, 32], strides = [1, 1]} : vector<16x32xf32> to vector<8x32xf32>
    %207 = vector.extract_strided_slice %206 {offsets = [0, 0], sizes = [8, 8], strides = [1, 1]} : vector<8x32xf32> to vector<8x8xf32>
    %208 = vector.extract_strided_slice %206 {offsets = [0, 8], sizes = [8, 8], strides = [1, 1]} : vector<8x32xf32> to vector<8x8xf32>
    %209 = vector.extract_strided_slice %206 {offsets = [0, 16], sizes = [8, 8], strides = [1, 1]} : vector<8x32xf32> to vector<8x8xf32>
    %210 = vector.extract_strided_slice %206 {offsets = [0, 24], sizes = [8, 8], strides = [1, 1]} : vector<8x32xf32> to vector<8x8xf32>
    %211 = vector.shape_cast %207 : vector<8x8xf32> to vector<1x8x8xf32>
    %212 = vector.shape_cast %208 : vector<8x8xf32> to vector<1x8x8xf32>
    %213 = vector.shape_cast %209 : vector<8x8xf32> to vector<1x8x8xf32>
    %214 = vector.shape_cast %210 : vector<8x8xf32> to vector<1x8x8xf32>
    %215 = tpu.concatenate %211, %212, %213, %214 in 0 : vector<1x8x8xf32>, vector<1x8x8xf32>, vector<1x8x8xf32>, vector<1x8x8xf32> -> vector<4x8x8xf32>
    %216 = arith.truncf %215 : vector<4x8x8xf32> to vector<4x8x8xbf16>
    %217 = vector.extract_strided_slice %190 {offsets = [0, 0], sizes = [8, 32], strides = [1, 1]} : vector<16x32xf32> to vector<8x32xf32>
    %218 = vector.extract_strided_slice %217 {offsets = [0, 0], sizes = [8, 8], strides = [1, 1]} : vector<8x32xf32> to vector<8x8xf32>
    %219 = vector.extract_strided_slice %217 {offsets = [0, 8], sizes = [8, 8], strides = [1, 1]} : vector<8x32xf32> to vector<8x8xf32>
    %220 = vector.extract_strided_slice %217 {offsets = [0, 16], sizes = [8, 8], strides = [1, 1]} : vector<8x32xf32> to vector<8x8xf32>
    %221 = vector.extract_strided_slice %217 {offsets = [0, 24], sizes = [8, 8], strides = [1, 1]} : vector<8x32xf32> to vector<8x8xf32>
    %222 = vector.shape_cast %218 : vector<8x8xf32> to vector<1x8x8xf32>
    %223 = vector.shape_cast %219 : vector<8x8xf32> to vector<1x8x8xf32>
    %224 = vector.shape_cast %220 : vector<8x8xf32> to vector<1x8x8xf32>
    %225 = vector.shape_cast %221 : vector<8x8xf32> to vector<1x8x8xf32>
    %226 = tpu.concatenate %222, %223, %224, %225 in 0 : vector<1x8x8xf32>, vector<1x8x8xf32>, vector<1x8x8xf32>, vector<1x8x8xf32> -> vector<4x8x8xf32>
    %227 = arith.truncf %226 : vector<4x8x8xf32> to vector<4x8x8xbf16>
    "tpu.trace_start"() <{level = 10 : i32, message = "hqd,hkd->hqk"}> : () -> ()
    %cst_60 = arith.constant dense<0.000000e+00> : vector<4x8x8xf32>
    %228 = tpu.matmul %205, %216, %cst_60 {dimension_numbers = #tpu.dot_dimension_numbers<[2], [2], [1], [1], [0, 0, 0, 1, 1, 1], [0], [0]>} : vector<4x8x8xbf16>, vector<4x8x8xbf16>, vector<4x8x8xf32> -> vector<4x8x8xf32>
    "tpu.trace_stop"() : () -> ()
    %cst_61 = arith.constant dense<0xFF800000> : vector<4x8xf32>
    %229 = vector.multi_reduction <maximumf>, %228, %cst_61 [2] : vector<4x8x8xf32> to vector<4x8xf32>
    %230 = vector.shape_cast %229 : vector<4x8xf32> to vector<4x8x1xf32>
    %231 = vector.broadcast %230 : vector<4x8x1xf32> to vector<4x8x8xf32>
    %232 = arith.subf %228, %231 : vector<4x8x8xf32>
    %233 = math.exp %232 : vector<4x8x8xf32>
    %cst_62 = arith.constant dense<0.000000e+00> : vector<4x8xf32>
    %234 = vector.multi_reduction <add>, %233, %cst_62 [2] : vector<4x8x8xf32> to vector<4x8xf32>
    %235 = vector.shape_cast %234 : vector<4x8xf32> to vector<4x8x1xf32>
    %236 = tpu.reciprocal %235 {approx = true} : vector<4x8x1xf32> -> vector<4x8x1xf32>
    %237 = vector.broadcast %236 : vector<4x8x1xf32> to vector<4x8x8xf32>
    %238 = arith.mulf %233, %237 : vector<4x8x8xf32>
    %239 = arith.truncf %238 : vector<4x8x8xf32> to vector<4x8x8xbf16>
    "tpu.trace_start"() <{level = 10 : i32, message = "hqk,hkd->hqd"}> : () -> ()
    %cst_63 = arith.constant dense<0.000000e+00> : vector<4x8x8xf32>
    %240 = tpu.matmul %239, %227, %cst_63 {dimension_numbers = #tpu.dot_dimension_numbers<[2], [1], [1], [2], [0, 0, 0, 1, 1, 2], [0], [0]>} : vector<4x8x8xbf16>, vector<4x8x8xbf16>, vector<4x8x8xf32> -> vector<4x8x8xf32>
    "tpu.trace_stop"() : () -> ()
    %241 = arith.truncf %240 : vector<4x8x8xf32> to vector<4x8x8xbf16>
    "tpu.trace_start"() <{level = 10 : i32, message = "hqd,hde->hqe"}> : () -> ()
    %cst_64 = arith.constant dense<0.000000e+00> : vector<4x8x32xf32>
    %242 = tpu.matmul %241, %192, %cst_64 {dimension_numbers = #tpu.dot_dimension_numbers<[2], [1], [1], [2], [0, 0, 0, 1, 1, 2], [0], [0]>} : vector<4x8x8xbf16>, vector<4x8x32xbf16>, vector<4x8x32xf32> -> vector<4x8x32xf32>
    "tpu.trace_stop"() : () -> ()
    %243 = vector.extract_strided_slice %242 {offsets = [0, 0, 0], sizes = [1, 8, 32], strides = [1, 1, 1]} : vector<4x8x32xf32> to vector<1x8x32xf32>
    %244 = vector.shape_cast %243 : vector<1x8x32xf32> to vector<8x32xf32>
    %245 = vector.extract_strided_slice %242 {offsets = [1, 0, 0], sizes = [1, 8, 32], strides = [1, 1, 1]} : vector<4x8x32xf32> to vector<1x8x32xf32>
    %246 = vector.shape_cast %245 : vector<1x8x32xf32> to vector<8x32xf32>
    %247 = arith.addf %244, %246 : vector<8x32xf32>
    %248 = vector.extract_strided_slice %242 {offsets = [2, 0, 0], sizes = [1, 8, 32], strides = [1, 1, 1]} : vector<4x8x32xf32> to vector<1x8x32xf32>
    %249 = vector.shape_cast %248 : vector<1x8x32xf32> to vector<8x32xf32>
    %250 = arith.addf %247, %249 : vector<8x32xf32>
    %251 = vector.extract_strided_slice %242 {offsets = [3, 0, 0], sizes = [1, 8, 32], strides = [1, 1, 1]} : vector<4x8x32xf32> to vector<1x8x32xf32>
    %252 = vector.shape_cast %251 : vector<1x8x32xf32> to vector<8x32xf32>
    %253 = arith.addf %250, %252 : vector<8x32xf32>
    %254 = vector.extract_strided_slice %180 {offsets = [8, 0], sizes = [8, 32], strides = [1, 1]} : vector<16x32xf32> to vector<8x32xf32>
    %255 = vector.extract_strided_slice %254 {offsets = [0, 0], sizes = [8, 8], strides = [1, 1]} : vector<8x32xf32> to vector<8x8xf32>
    %256 = vector.extract_strided_slice %254 {offsets = [0, 8], sizes = [8, 8], strides = [1, 1]} : vector<8x32xf32> to vector<8x8xf32>
    %257 = vector.extract_strided_slice %254 {offsets = [0, 16], sizes = [8, 8], strides = [1, 1]} : vector<8x32xf32> to vector<8x8xf32>
    %258 = vector.extract_strided_slice %254 {offsets = [0, 24], sizes = [8, 8], strides = [1, 1]} : vector<8x32xf32> to vector<8x8xf32>
    %259 = vector.shape_cast %255 : vector<8x8xf32> to vector<1x8x8xf32>
    %260 = vector.shape_cast %256 : vector<8x8xf32> to vector<1x8x8xf32>
    %261 = vector.shape_cast %257 : vector<8x8xf32> to vector<1x8x8xf32>
    %262 = vector.shape_cast %258 : vector<8x8xf32> to vector<1x8x8xf32>
    %263 = tpu.concatenate %259, %260, %261, %262 in 0 : vector<1x8x8xf32>, vector<1x8x8xf32>, vector<1x8x8xf32>, vector<1x8x8xf32> -> vector<4x8x8xf32>
    %264 = arith.truncf %263 : vector<4x8x8xf32> to vector<4x8x8xbf16>
    %265 = vector.extract_strided_slice %189 {offsets = [8, 0], sizes = [8, 32], strides = [1, 1]} : vector<16x32xf32> to vector<8x32xf32>
    %266 = vector.extract_strided_slice %265 {offsets = [0, 0], sizes = [8, 8], strides = [1, 1]} : vector<8x32xf32> to vector<8x8xf32>
    %267 = vector.extract_strided_slice %265 {offsets = [0, 8], sizes = [8, 8], strides = [1, 1]} : vector<8x32xf32> to vector<8x8xf32>
    %268 = vector.extract_strided_slice %265 {offsets = [0, 16], sizes = [8, 8], strides = [1, 1]} : vector<8x32xf32> to vector<8x8xf32>
    %269 = vector.extract_strided_slice %265 {offsets = [0, 24], sizes = [8, 8], strides = [1, 1]} : vector<8x32xf32> to vector<8x8xf32>
    %270 = vector.shape_cast %266 : vector<8x8xf32> to vector<1x8x8xf32>
    %271 = vector.shape_cast %267 : vector<8x8xf32> to vector<1x8x8xf32>
    %272 = vector.shape_cast %268 : vector<8x8xf32> to vector<1x8x8xf32>
    %273 = vector.shape_cast %269 : vector<8x8xf32> to vector<1x8x8xf32>
    %274 = tpu.concatenate %270, %271, %272, %273 in 0 : vector<1x8x8xf32>, vector<1x8x8xf32>, vector<1x8x8xf32>, vector<1x8x8xf32> -> vector<4x8x8xf32>
    %275 = arith.truncf %274 : vector<4x8x8xf32> to vector<4x8x8xbf16>
    %276 = vector.extract_strided_slice %190 {offsets = [8, 0], sizes = [8, 32], strides = [1, 1]} : vector<16x32xf32> to vector<8x32xf32>
    %277 = vector.extract_strided_slice %276 {offsets = [0, 0], sizes = [8, 8], strides = [1, 1]} : vector<8x32xf32> to vector<8x8xf32>
    %278 = vector.extract_strided_slice %276 {offsets = [0, 8], sizes = [8, 8], strides = [1, 1]} : vector<8x32xf32> to vector<8x8xf32>
    %279 = vector.extract_strided_slice %276 {offsets = [0, 16], sizes = [8, 8], strides = [1, 1]} : vector<8x32xf32> to vector<8x8xf32>
    %280 = vector.extract_strided_slice %276 {offsets = [0, 24], sizes = [8, 8], strides = [1, 1]} : vector<8x32xf32> to vector<8x8xf32>
    %281 = vector.shape_cast %277 : vector<8x8xf32> to vector<1x8x8xf32>
    %282 = vector.shape_cast %278 : vector<8x8xf32> to vector<1x8x8xf32>
    %283 = vector.shape_cast %279 : vector<8x8xf32> to vector<1x8x8xf32>
    %284 = vector.shape_cast %280 : vector<8x8xf32> to vector<1x8x8xf32>
    %285 = tpu.concatenate %281, %282, %283, %284 in 0 : vector<1x8x8xf32>, vector<1x8x8xf32>, vector<1x8x8xf32>, vector<1x8x8xf32> -> vector<4x8x8xf32>
    %286 = arith.truncf %285 : vector<4x8x8xf32> to vector<4x8x8xbf16>
    "tpu.trace_start"() <{level = 10 : i32, message = "hqd,hkd->hqk"}> : () -> ()
    %cst_65 = arith.constant dense<0.000000e+00> : vector<4x8x8xf32>
    %287 = tpu.matmul %264, %275, %cst_65 {dimension_numbers = #tpu.dot_dimension_numbers<[2], [2], [1], [1], [0, 0, 0, 1, 1, 1], [0], [0]>} : vector<4x8x8xbf16>, vector<4x8x8xbf16>, vector<4x8x8xf32> -> vector<4x8x8xf32>
    "tpu.trace_stop"() : () -> ()
    %cst_66 = arith.constant dense<0xFF800000> : vector<4x8xf32>
    %288 = vector.multi_reduction <maximumf>, %287, %cst_66 [2] : vector<4x8x8xf32> to vector<4x8xf32>
    %289 = vector.shape_cast %288 : vector<4x8xf32> to vector<4x8x1xf32>
    %290 = vector.broadcast %289 : vector<4x8x1xf32> to vector<4x8x8xf32>
    %291 = arith.subf %287, %290 : vector<4x8x8xf32>
    %292 = math.exp %291 : vector<4x8x8xf32>
    %cst_67 = arith.constant dense<0.000000e+00> : vector<4x8xf32>
    %293 = vector.multi_reduction <add>, %292, %cst_67 [2] : vector<4x8x8xf32> to vector<4x8xf32>
    %294 = vector.shape_cast %293 : vector<4x8xf32> to vector<4x8x1xf32>
    %295 = tpu.reciprocal %294 {approx = true} : vector<4x8x1xf32> -> vector<4x8x1xf32>
    %296 = vector.broadcast %295 : vector<4x8x1xf32> to vector<4x8x8xf32>
    %297 = arith.mulf %292, %296 : vector<4x8x8xf32>
    %298 = arith.truncf %297 : vector<4x8x8xf32> to vector<4x8x8xbf16>
    "tpu.trace_start"() <{level = 10 : i32, message = "hqk,hkd->hqd"}> : () -> ()
    %cst_68 = arith.constant dense<0.000000e+00> : vector<4x8x8xf32>
    %299 = tpu.matmul %298, %286, %cst_68 {dimension_numbers = #tpu.dot_dimension_numbers<[2], [1], [1], [2], [0, 0, 0, 1, 1, 2], [0], [0]>} : vector<4x8x8xbf16>, vector<4x8x8xbf16>, vector<4x8x8xf32> -> vector<4x8x8xf32>
    "tpu.trace_stop"() : () -> ()
    %300 = arith.truncf %299 : vector<4x8x8xf32> to vector<4x8x8xbf16>
    "tpu.trace_start"() <{level = 10 : i32, message = "hqd,hde->hqe"}> : () -> ()
    %cst_69 = arith.constant dense<0.000000e+00> : vector<4x8x32xf32>
    %301 = tpu.matmul %300, %192, %cst_69 {dimension_numbers = #tpu.dot_dimension_numbers<[2], [1], [1], [2], [0, 0, 0, 1, 1, 2], [0], [0]>} : vector<4x8x8xbf16>, vector<4x8x32xbf16>, vector<4x8x32xf32> -> vector<4x8x32xf32>
    "tpu.trace_stop"() : () -> ()
    %302 = vector.extract_strided_slice %301 {offsets = [0, 0, 0], sizes = [1, 8, 32], strides = [1, 1, 1]} : vector<4x8x32xf32> to vector<1x8x32xf32>
    %303 = vector.shape_cast %302 : vector<1x8x32xf32> to vector<8x32xf32>
    %304 = vector.extract_strided_slice %301 {offsets = [1, 0, 0], sizes = [1, 8, 32], strides = [1, 1, 1]} : vector<4x8x32xf32> to vector<1x8x32xf32>
    %305 = vector.shape_cast %304 : vector<1x8x32xf32> to vector<8x32xf32>
    %306 = arith.addf %303, %305 : vector<8x32xf32>
    %307 = vector.extract_strided_slice %301 {offsets = [2, 0, 0], sizes = [1, 8, 32], strides = [1, 1, 1]} : vector<4x8x32xf32> to vector<1x8x32xf32>
    %308 = vector.shape_cast %307 : vector<1x8x32xf32> to vector<8x32xf32>
    %309 = arith.addf %306, %308 : vector<8x32xf32>
    %310 = vector.extract_strided_slice %301 {offsets = [3, 0, 0], sizes = [1, 8, 32], strides = [1, 1, 1]} : vector<4x8x32xf32> to vector<1x8x32xf32>
    %311 = vector.shape_cast %310 : vector<1x8x32xf32> to vector<8x32xf32>
    %312 = arith.addf %309, %311 : vector<8x32xf32>
    %313 = tpu.concatenate %253, %312 in 0 : vector<8x32xf32>, vector<8x32xf32> -> vector<16x32xf32>
    %314 = vector.broadcast %194 : vector<1x32xf32> to vector<16x32xf32>
    %315 = arith.addf %313, %314 : vector<16x32xf32>
    %316 = arith.addf %172, %315 : vector<16x32xf32>
    %c0_70 = arith.constant 0 : index
    %c9 = arith.constant 9 : index
    %c0_71 = arith.constant 0 : index
    %317 = vector.load %arg10[%c0_70, %c9, %c0_71] : memref<2x16x128xf32, #tpu.memory_space<vmem>>, vector<1x1x32xf32>
    %318 = vector.shape_cast %317 : vector<1x1x32xf32> to vector<1x32xf32>
    %c0_72 = arith.constant 0 : index
    %c10 = arith.constant 10 : index
    %c0_73 = arith.constant 0 : index
    %319 = vector.load %arg10[%c0_72, %c10, %c0_73] : memref<2x16x128xf32, #tpu.memory_space<vmem>>, vector<1x1x32xf32>
    %320 = vector.shape_cast %319 : vector<1x1x32xf32> to vector<1x32xf32>
    %cst_74 = arith.constant dense<0.000000e+00> : vector<16xf32>
    %321 = vector.multi_reduction <add>, %316, %cst_74 [1] : vector<16x32xf32> to vector<16xf32>
    %322 = vector.shape_cast %321 : vector<16xf32> to vector<16x1xf32>
    %cst_75 = arith.constant 3.200000e+01 : f32
    %323 = vector.broadcast %cst_75 : f32 to vector<16x1xf32>
    %324 = arith.divf %322, %323 : vector<16x1xf32>
    %325 = arith.mulf %316, %316 : vector<16x32xf32>
    %cst_76 = arith.constant dense<0.000000e+00> : vector<16xf32>
    %326 = vector.multi_reduction <add>, %325, %cst_76 [1] : vector<16x32xf32> to vector<16xf32>
    %327 = vector.shape_cast %326 : vector<16xf32> to vector<16x1xf32>
    %cst_77 = arith.constant 3.200000e+01 : f32
    %328 = vector.broadcast %cst_77 : f32 to vector<16x1xf32>
    %329 = arith.divf %327, %328 : vector<16x1xf32>
    %330 = arith.mulf %324, %324 : vector<16x1xf32>
    %331 = arith.subf %329, %330 : vector<16x1xf32>
    %332 = vector.broadcast %324 : vector<16x1xf32> to vector<16x32xf32>
    %333 = arith.subf %316, %332 : vector<16x32xf32>
    %cst_78 = arith.constant 9.99999974E-6 : f32
    %334 = vector.broadcast %cst_78 : f32 to vector<16x1xf32>
    %335 = arith.addf %331, %334 : vector<16x1xf32>
    %336 = math.rsqrt %335 : vector<16x1xf32>
    %337 = vector.broadcast %336 : vector<16x1xf32> to vector<16x32xf32>
    %338 = arith.mulf %333, %337 : vector<16x32xf32>
    %339 = vector.broadcast %318 : vector<1x32xf32> to vector<16x32xf32>
    %340 = arith.mulf %338, %339 : vector<16x32xf32>
    %341 = vector.broadcast %320 : vector<1x32xf32> to vector<16x32xf32>
    %342 = arith.addf %340, %341 : vector<16x32xf32>
    %c0_79 = arith.constant 0 : index
    %c0_80 = arith.constant 0 : index
    %c0_81 = arith.constant 0 : index
    %343 = vector.load %arg8[%c0_79, %c0_80, %c0_81] : memref<2x32x64xbf16, #tpu.memory_space<vmem>>, vector<1x32x64xbf16>
    %344 = vector.shape_cast %343 : vector<1x32x64xbf16> to vector<32x64xbf16>
    %345 = arith.truncf %342 : vector<16x32xf32> to vector<16x32xbf16>
    %cst_82 = arith.constant dense<0.000000e+00> : vector<16x64xf32>
    %346 = tpu.matmul %345, %344, %cst_82 {dimension_numbers = #tpu.dot_dimension_numbers<[1], [0], [0], [1], [0, 0, 1, 1], [], []>} : vector<16x32xbf16>, vector<32x64xbf16>, vector<16x64xf32> -> vector<16x64xf32>
    %c0_83 = arith.constant 0 : index
    %c5 = arith.constant 5 : index
    %c0_84 = arith.constant 0 : index
    %347 = vector.load %arg10[%c0_83, %c5, %c0_84] : memref<2x16x128xf32, #tpu.memory_space<vmem>>, vector<1x1x64xf32>
    %348 = vector.shape_cast %347 : vector<1x1x64xf32> to vector<1x64xf32>
    %349 = vector.broadcast %348 : vector<1x64xf32> to vector<16x64xf32>
    %350 = arith.addf %346, %349 : vector<16x64xf32>
    %cst_85 = arith.constant 0.000000e+00 : f32
    %351 = vector.broadcast %cst_85 : f32 to vector<16x64xf32>
    %352 = arith.maximumf %350, %351 : vector<16x64xf32>
    %c0_86 = arith.constant 0 : index
    %c0_87 = arith.constant 0 : index
    %c0_88 = arith.constant 0 : index
    %353 = vector.load %arg9[%c0_86, %c0_87, %c0_88] : memref<2x64x32xbf16, #tpu.memory_space<vmem>>, vector<1x64x32xbf16>
    %354 = vector.shape_cast %353 : vector<1x64x32xbf16> to vector<64x32xbf16>
    %355 = arith.truncf %352 : vector<16x64xf32> to vector<16x64xbf16>
    %cst_89 = arith.constant dense<0.000000e+00> : vector<16x32xf32>
    %356 = tpu.matmul %355, %354, %cst_89 {dimension_numbers = #tpu.dot_dimension_numbers<[1], [0], [0], [1], [0, 0, 1, 1], [], []>} : vector<16x64xbf16>, vector<64x32xbf16>, vector<16x32xf32> -> vector<16x32xf32>
    %c0_90 = arith.constant 0 : index
    %c6 = arith.constant 6 : index
    %c0_91 = arith.constant 0 : index
    %357 = vector.load %arg10[%c0_90, %c6, %c0_91] : memref<2x16x128xf32, #tpu.memory_space<vmem>>, vector<1x1x32xf32>
    %358 = vector.shape_cast %357 : vector<1x1x32xf32> to vector<1x32xf32>
    %359 = vector.broadcast %358 : vector<1x32xf32> to vector<16x32xf32>
    %360 = arith.addf %356, %359 : vector<16x32xf32>
    %361 = arith.addf %342, %360 : vector<16x32xf32>
    %c0_92 = arith.constant 0 : index
    %c11 = arith.constant 11 : index
    %c0_93 = arith.constant 0 : index
    %362 = vector.load %arg10[%c0_92, %c11, %c0_93] : memref<2x16x128xf32, #tpu.memory_space<vmem>>, vector<1x1x32xf32>
    %363 = vector.shape_cast %362 : vector<1x1x32xf32> to vector<1x32xf32>
    %c0_94 = arith.constant 0 : index
    %c12 = arith.constant 12 : index
    %c0_95 = arith.constant 0 : index
    %364 = vector.load %arg10[%c0_94, %c12, %c0_95] : memref<2x16x128xf32, #tpu.memory_space<vmem>>, vector<1x1x32xf32>
    %365 = vector.shape_cast %364 : vector<1x1x32xf32> to vector<1x32xf32>
    %cst_96 = arith.constant dense<0.000000e+00> : vector<16xf32>
    %366 = vector.multi_reduction <add>, %361, %cst_96 [1] : vector<16x32xf32> to vector<16xf32>
    %367 = vector.shape_cast %366 : vector<16xf32> to vector<16x1xf32>
    %cst_97 = arith.constant 3.200000e+01 : f32
    %368 = vector.broadcast %cst_97 : f32 to vector<16x1xf32>
    %369 = arith.divf %367, %368 : vector<16x1xf32>
    %370 = arith.mulf %361, %361 : vector<16x32xf32>
    %cst_98 = arith.constant dense<0.000000e+00> : vector<16xf32>
    %371 = vector.multi_reduction <add>, %370, %cst_98 [1] : vector<16x32xf32> to vector<16xf32>
    %372 = vector.shape_cast %371 : vector<16xf32> to vector<16x1xf32>
    %cst_99 = arith.constant 3.200000e+01 : f32
    %373 = vector.broadcast %cst_99 : f32 to vector<16x1xf32>
    %374 = arith.divf %372, %373 : vector<16x1xf32>
    %375 = arith.mulf %369, %369 : vector<16x1xf32>
    %376 = arith.subf %374, %375 : vector<16x1xf32>
    %377 = vector.broadcast %369 : vector<16x1xf32> to vector<16x32xf32>
    %378 = arith.subf %361, %377 : vector<16x32xf32>
    %cst_100 = arith.constant 9.99999974E-6 : f32
    %379 = vector.broadcast %cst_100 : f32 to vector<16x1xf32>
    %380 = arith.addf %376, %379 : vector<16x1xf32>
    %381 = math.rsqrt %380 : vector<16x1xf32>
    %382 = vector.broadcast %381 : vector<16x1xf32> to vector<16x32xf32>
    %383 = arith.mulf %378, %382 : vector<16x32xf32>
    %384 = vector.broadcast %363 : vector<1x32xf32> to vector<16x32xf32>
    %385 = arith.mulf %383, %384 : vector<16x32xf32>
    %386 = vector.broadcast %365 : vector<1x32xf32> to vector<16x32xf32>
    %387 = arith.addf %385, %386 : vector<16x32xf32>
    %c1_101 = arith.constant 1 : index
    %c0_102 = arith.constant 0 : index
    %c0_103 = arith.constant 0 : index
    %388 = vector.load %arg3[%c1_101, %c0_102, %c0_103] : memref<2x32x96xbf16, #tpu.memory_space<vmem>>, vector<1x32x96xbf16>
    %389 = vector.shape_cast %388 : vector<1x32x96xbf16> to vector<32x96xbf16>
    %390 = arith.truncf %387 : vector<16x32xf32> to vector<16x32xbf16>
    %cst_104 = arith.constant dense<0.000000e+00> : vector<16x96xf32>
    %391 = tpu.matmul %390, %389, %cst_104 {dimension_numbers = #tpu.dot_dimension_numbers<[1], [0], [0], [1], [0, 0, 1, 1], [], []>} : vector<16x32xbf16>, vector<32x96xbf16>, vector<16x96xf32> -> vector<16x96xf32>
    %c1_105 = arith.constant 1 : index
    %c0_106 = arith.constant 0 : index
    %c0_107 = arith.constant 0 : index
    %392 = vector.load %arg10[%c1_105, %c0_106, %c0_107] : memref<2x16x128xf32, #tpu.memory_space<vmem>>, vector<1x1x96xf32>
    %393 = vector.shape_cast %392 : vector<1x1x96xf32> to vector<1x96xf32>
    %394 = vector.broadcast %393 : vector<1x96xf32> to vector<16x96xf32>
    %395 = arith.addf %391, %394 : vector<16x96xf32>
    %396 = vector.extract_strided_slice %395 {offsets = [0, 0], sizes = [16, 32], strides = [1, 1]} : vector<16x96xf32> to vector<16x32xf32>
    %397 = vector.extract_strided_slice %395 {offsets = [0, 32], sizes = [16, 32], strides = [1, 1]} : vector<16x96xf32> to vector<16x32xf32>
    %398 = vector.extract_strided_slice %395 {offsets = [0, 64], sizes = [16, 32], strides = [1, 1]} : vector<16x96xf32> to vector<16x32xf32>
    %c1_108 = arith.constant 1 : index
    %c0_109 = arith.constant 0 : index
    %c0_110 = arith.constant 0 : index
    %c0_111 = arith.constant 0 : index
    %399 = vector.load %arg4[%c1_108, %c0_109, %c0_110, %c0_111] : memref<2x4x8x32xbf16, #tpu.memory_space<vmem>>, vector<1x4x8x32xbf16>
    %400 = vector.shape_cast %399 : vector<1x4x8x32xbf16> to vector<4x8x32xbf16>
    %c1_112 = arith.constant 1 : index
    %c1_113 = arith.constant 1 : index
    %c0_114 = arith.constant 0 : index
    %401 = vector.load %arg10[%c1_112, %c1_113, %c0_114] : memref<2x16x128xf32, #tpu.memory_space<vmem>>, vector<1x1x32xf32>
    %402 = vector.shape_cast %401 : vector<1x1x32xf32> to vector<1x32xf32>
    %403 = vector.extract_strided_slice %396 {offsets = [0, 0], sizes = [8, 32], strides = [1, 1]} : vector<16x32xf32> to vector<8x32xf32>
    %404 = vector.extract_strided_slice %403 {offsets = [0, 0], sizes = [8, 8], strides = [1, 1]} : vector<8x32xf32> to vector<8x8xf32>
    %405 = vector.extract_strided_slice %403 {offsets = [0, 8], sizes = [8, 8], strides = [1, 1]} : vector<8x32xf32> to vector<8x8xf32>
    %406 = vector.extract_strided_slice %403 {offsets = [0, 16], sizes = [8, 8], strides = [1, 1]} : vector<8x32xf32> to vector<8x8xf32>
    %407 = vector.extract_strided_slice %403 {offsets = [0, 24], sizes = [8, 8], strides = [1, 1]} : vector<8x32xf32> to vector<8x8xf32>
    %408 = vector.shape_cast %404 : vector<8x8xf32> to vector<1x8x8xf32>
    %409 = vector.shape_cast %405 : vector<8x8xf32> to vector<1x8x8xf32>
    %410 = vector.shape_cast %406 : vector<8x8xf32> to vector<1x8x8xf32>
    %411 = vector.shape_cast %407 : vector<8x8xf32> to vector<1x8x8xf32>
    %412 = tpu.concatenate %408, %409, %410, %411 in 0 : vector<1x8x8xf32>, vector<1x8x8xf32>, vector<1x8x8xf32>, vector<1x8x8xf32> -> vector<4x8x8xf32>
    %413 = arith.truncf %412 : vector<4x8x8xf32> to vector<4x8x8xbf16>
    %414 = vector.extract_strided_slice %397 {offsets = [0, 0], sizes = [8, 32], strides = [1, 1]} : vector<16x32xf32> to vector<8x32xf32>
    %415 = vector.extract_strided_slice %414 {offsets = [0, 0], sizes = [8, 8], strides = [1, 1]} : vector<8x32xf32> to vector<8x8xf32>
    %416 = vector.extract_strided_slice %414 {offsets = [0, 8], sizes = [8, 8], strides = [1, 1]} : vector<8x32xf32> to vector<8x8xf32>
    %417 = vector.extract_strided_slice %414 {offsets = [0, 16], sizes = [8, 8], strides = [1, 1]} : vector<8x32xf32> to vector<8x8xf32>
    %418 = vector.extract_strided_slice %414 {offsets = [0, 24], sizes = [8, 8], strides = [1, 1]} : vector<8x32xf32> to vector<8x8xf32>
    %419 = vector.shape_cast %415 : vector<8x8xf32> to vector<1x8x8xf32>
    %420 = vector.shape_cast %416 : vector<8x8xf32> to vector<1x8x8xf32>
    %421 = vector.shape_cast %417 : vector<8x8xf32> to vector<1x8x8xf32>
    %422 = vector.shape_cast %418 : vector<8x8xf32> to vector<1x8x8xf32>
    %423 = tpu.concatenate %419, %420, %421, %422 in 0 : vector<1x8x8xf32>, vector<1x8x8xf32>, vector<1x8x8xf32>, vector<1x8x8xf32> -> vector<4x8x8xf32>
    %424 = arith.truncf %423 : vector<4x8x8xf32> to vector<4x8x8xbf16>
    %425 = vector.extract_strided_slice %398 {offsets = [0, 0], sizes = [8, 32], strides = [1, 1]} : vector<16x32xf32> to vector<8x32xf32>
    %426 = vector.extract_strided_slice %425 {offsets = [0, 0], sizes = [8, 8], strides = [1, 1]} : vector<8x32xf32> to vector<8x8xf32>
    %427 = vector.extract_strided_slice %425 {offsets = [0, 8], sizes = [8, 8], strides = [1, 1]} : vector<8x32xf32> to vector<8x8xf32>
    %428 = vector.extract_strided_slice %425 {offsets = [0, 16], sizes = [8, 8], strides = [1, 1]} : vector<8x32xf32> to vector<8x8xf32>
    %429 = vector.extract_strided_slice %425 {offsets = [0, 24], sizes = [8, 8], strides = [1, 1]} : vector<8x32xf32> to vector<8x8xf32>
    %430 = vector.shape_cast %426 : vector<8x8xf32> to vector<1x8x8xf32>
    %431 = vector.shape_cast %427 : vector<8x8xf32> to vector<1x8x8xf32>
    %432 = vector.shape_cast %428 : vector<8x8xf32> to vector<1x8x8xf32>
    %433 = vector.shape_cast %429 : vector<8x8xf32> to vector<1x8x8xf32>
    %434 = tpu.concatenate %430, %431, %432, %433 in 0 : vector<1x8x8xf32>, vector<1x8x8xf32>, vector<1x8x8xf32>, vector<1x8x8xf32> -> vector<4x8x8xf32>
    %435 = arith.truncf %434 : vector<4x8x8xf32> to vector<4x8x8xbf16>
    "tpu.trace_start"() <{level = 10 : i32, message = "hqd,hkd->hqk"}> : () -> ()
    %cst_115 = arith.constant dense<0.000000e+00> : vector<4x8x8xf32>
    %436 = tpu.matmul %413, %424, %cst_115 {dimension_numbers = #tpu.dot_dimension_numbers<[2], [2], [1], [1], [0, 0, 0, 1, 1, 1], [0], [0]>} : vector<4x8x8xbf16>, vector<4x8x8xbf16>, vector<4x8x8xf32> -> vector<4x8x8xf32>
    "tpu.trace_stop"() : () -> ()
    %cst_116 = arith.constant dense<0xFF800000> : vector<4x8xf32>
    %437 = vector.multi_reduction <maximumf>, %436, %cst_116 [2] : vector<4x8x8xf32> to vector<4x8xf32>
    %438 = vector.shape_cast %437 : vector<4x8xf32> to vector<4x8x1xf32>
    %439 = vector.broadcast %438 : vector<4x8x1xf32> to vector<4x8x8xf32>
    %440 = arith.subf %436, %439 : vector<4x8x8xf32>
    %441 = math.exp %440 : vector<4x8x8xf32>
    %cst_117 = arith.constant dense<0.000000e+00> : vector<4x8xf32>
    %442 = vector.multi_reduction <add>, %441, %cst_117 [2] : vector<4x8x8xf32> to vector<4x8xf32>
    %443 = vector.shape_cast %442 : vector<4x8xf32> to vector<4x8x1xf32>
    %444 = tpu.reciprocal %443 {approx = true} : vector<4x8x1xf32> -> vector<4x8x1xf32>
    %445 = vector.broadcast %444 : vector<4x8x1xf32> to vector<4x8x8xf32>
    %446 = arith.mulf %441, %445 : vector<4x8x8xf32>
    %447 = arith.truncf %446 : vector<4x8x8xf32> to vector<4x8x8xbf16>
    "tpu.trace_start"() <{level = 10 : i32, message = "hqk,hkd->hqd"}> : () -> ()
    %cst_118 = arith.constant dense<0.000000e+00> : vector<4x8x8xf32>
    %448 = tpu.matmul %447, %435, %cst_118 {dimension_numbers = #tpu.dot_dimension_numbers<[2], [1], [1], [2], [0, 0, 0, 1, 1, 2], [0], [0]>} : vector<4x8x8xbf16>, vector<4x8x8xbf16>, vector<4x8x8xf32> -> vector<4x8x8xf32>
    "tpu.trace_stop"() : () -> ()
    %449 = arith.truncf %448 : vector<4x8x8xf32> to vector<4x8x8xbf16>
    "tpu.trace_start"() <{level = 10 : i32, message = "hqd,hde->hqe"}> : () -> ()
    %cst_119 = arith.constant dense<0.000000e+00> : vector<4x8x32xf32>
    %450 = tpu.matmul %449, %400, %cst_119 {dimension_numbers = #tpu.dot_dimension_numbers<[2], [1], [1], [2], [0, 0, 0, 1, 1, 2], [0], [0]>} : vector<4x8x8xbf16>, vector<4x8x32xbf16>, vector<4x8x32xf32> -> vector<4x8x32xf32>
    "tpu.trace_stop"() : () -> ()
    %451 = vector.extract_strided_slice %450 {offsets = [0, 0, 0], sizes = [1, 8, 32], strides = [1, 1, 1]} : vector<4x8x32xf32> to vector<1x8x32xf32>
    %452 = vector.shape_cast %451 : vector<1x8x32xf32> to vector<8x32xf32>
    %453 = vector.extract_strided_slice %450 {offsets = [1, 0, 0], sizes = [1, 8, 32], strides = [1, 1, 1]} : vector<4x8x32xf32> to vector<1x8x32xf32>
    %454 = vector.shape_cast %453 : vector<1x8x32xf32> to vector<8x32xf32>
    %455 = arith.addf %452, %454 : vector<8x32xf32>
    %456 = vector.extract_strided_slice %450 {offsets = [2, 0, 0], sizes = [1, 8, 32], strides = [1, 1, 1]} : vector<4x8x32xf32> to vector<1x8x32xf32>
    %457 = vector.shape_cast %456 : vector<1x8x32xf32> to vector<8x32xf32>
    %458 = arith.addf %455, %457 : vector<8x32xf32>
    %459 = vector.extract_strided_slice %450 {offsets = [3, 0, 0], sizes = [1, 8, 32], strides = [1, 1, 1]} : vector<4x8x32xf32> to vector<1x8x32xf32>
    %460 = vector.shape_cast %459 : vector<1x8x32xf32> to vector<8x32xf32>
    %461 = arith.addf %458, %460 : vector<8x32xf32>
    %462 = vector.extract_strided_slice %396 {offsets = [8, 0], sizes = [8, 32], strides = [1, 1]} : vector<16x32xf32> to vector<8x32xf32>
    %463 = vector.extract_strided_slice %462 {offsets = [0, 0], sizes = [8, 8], strides = [1, 1]} : vector<8x32xf32> to vector<8x8xf32>
    %464 = vector.extract_strided_slice %462 {offsets = [0, 8], sizes = [8, 8], strides = [1, 1]} : vector<8x32xf32> to vector<8x8xf32>
    %465 = vector.extract_strided_slice %462 {offsets = [0, 16], sizes = [8, 8], strides = [1, 1]} : vector<8x32xf32> to vector<8x8xf32>
    %466 = vector.extract_strided_slice %462 {offsets = [0, 24], sizes = [8, 8], strides = [1, 1]} : vector<8x32xf32> to vector<8x8xf32>
    %467 = vector.shape_cast %463 : vector<8x8xf32> to vector<1x8x8xf32>
    %468 = vector.shape_cast %464 : vector<8x8xf32> to vector<1x8x8xf32>
    %469 = vector.shape_cast %465 : vector<8x8xf32> to vector<1x8x8xf32>
    %470 = vector.shape_cast %466 : vector<8x8xf32> to vector<1x8x8xf32>
    %471 = tpu.concatenate %467, %468, %469, %470 in 0 : vector<1x8x8xf32>, vector<1x8x8xf32>, vector<1x8x8xf32>, vector<1x8x8xf32> -> vector<4x8x8xf32>
    %472 = arith.truncf %471 : vector<4x8x8xf32> to vector<4x8x8xbf16>
    %473 = vector.extract_strided_slice %397 {offsets = [8, 0], sizes = [8, 32], strides = [1, 1]} : vector<16x32xf32> to vector<8x32xf32>
    %474 = vector.extract_strided_slice %473 {offsets = [0, 0], sizes = [8, 8], strides = [1, 1]} : vector<8x32xf32> to vector<8x8xf32>
    %475 = vector.extract_strided_slice %473 {offsets = [0, 8], sizes = [8, 8], strides = [1, 1]} : vector<8x32xf32> to vector<8x8xf32>
    %476 = vector.extract_strided_slice %473 {offsets = [0, 16], sizes = [8, 8], strides = [1, 1]} : vector<8x32xf32> to vector<8x8xf32>
    %477 = vector.extract_strided_slice %473 {offsets = [0, 24], sizes = [8, 8], strides = [1, 1]} : vector<8x32xf32> to vector<8x8xf32>
    %478 = vector.shape_cast %474 : vector<8x8xf32> to vector<1x8x8xf32>
    %479 = vector.shape_cast %475 : vector<8x8xf32> to vector<1x8x8xf32>
    %480 = vector.shape_cast %476 : vector<8x8xf32> to vector<1x8x8xf32>
    %481 = vector.shape_cast %477 : vector<8x8xf32> to vector<1x8x8xf32>
    %482 = tpu.concatenate %478, %479, %480, %481 in 0 : vector<1x8x8xf32>, vector<1x8x8xf32>, vector<1x8x8xf32>, vector<1x8x8xf32> -> vector<4x8x8xf32>
    %483 = arith.truncf %482 : vector<4x8x8xf32> to vector<4x8x8xbf16>
    %484 = vector.extract_strided_slice %398 {offsets = [8, 0], sizes = [8, 32], strides = [1, 1]} : vector<16x32xf32> to vector<8x32xf32>
    %485 = vector.extract_strided_slice %484 {offsets = [0, 0], sizes = [8, 8], strides = [1, 1]} : vector<8x32xf32> to vector<8x8xf32>
    %486 = vector.extract_strided_slice %484 {offsets = [0, 8], sizes = [8, 8], strides = [1, 1]} : vector<8x32xf32> to vector<8x8xf32>
    %487 = vector.extract_strided_slice %484 {offsets = [0, 16], sizes = [8, 8], strides = [1, 1]} : vector<8x32xf32> to vector<8x8xf32>
    %488 = vector.extract_strided_slice %484 {offsets = [0, 24], sizes = [8, 8], strides = [1, 1]} : vector<8x32xf32> to vector<8x8xf32>
    %489 = vector.shape_cast %485 : vector<8x8xf32> to vector<1x8x8xf32>
    %490 = vector.shape_cast %486 : vector<8x8xf32> to vector<1x8x8xf32>
    %491 = vector.shape_cast %487 : vector<8x8xf32> to vector<1x8x8xf32>
    %492 = vector.shape_cast %488 : vector<8x8xf32> to vector<1x8x8xf32>
    %493 = tpu.concatenate %489, %490, %491, %492 in 0 : vector<1x8x8xf32>, vector<1x8x8xf32>, vector<1x8x8xf32>, vector<1x8x8xf32> -> vector<4x8x8xf32>
    %494 = arith.truncf %493 : vector<4x8x8xf32> to vector<4x8x8xbf16>
    "tpu.trace_start"() <{level = 10 : i32, message = "hqd,hkd->hqk"}> : () -> ()
    %cst_120 = arith.constant dense<0.000000e+00> : vector<4x8x8xf32>
    %495 = tpu.matmul %472, %483, %cst_120 {dimension_numbers = #tpu.dot_dimension_numbers<[2], [2], [1], [1], [0, 0, 0, 1, 1, 1], [0], [0]>} : vector<4x8x8xbf16>, vector<4x8x8xbf16>, vector<4x8x8xf32> -> vector<4x8x8xf32>
    "tpu.trace_stop"() : () -> ()
    %cst_121 = arith.constant dense<0xFF800000> : vector<4x8xf32>
    %496 = vector.multi_reduction <maximumf>, %495, %cst_121 [2] : vector<4x8x8xf32> to vector<4x8xf32>
    %497 = vector.shape_cast %496 : vector<4x8xf32> to vector<4x8x1xf32>
    %498 = vector.broadcast %497 : vector<4x8x1xf32> to vector<4x8x8xf32>
    %499 = arith.subf %495, %498 : vector<4x8x8xf32>
    %500 = math.exp %499 : vector<4x8x8xf32>
    %cst_122 = arith.constant dense<0.000000e+00> : vector<4x8xf32>
    %501 = vector.multi_reduction <add>, %500, %cst_122 [2] : vector<4x8x8xf32> to vector<4x8xf32>
    %502 = vector.shape_cast %501 : vector<4x8xf32> to vector<4x8x1xf32>
    %503 = tpu.reciprocal %502 {approx = true} : vector<4x8x1xf32> -> vector<4x8x1xf32>
    %504 = vector.broadcast %503 : vector<4x8x1xf32> to vector<4x8x8xf32>
    %505 = arith.mulf %500, %504 : vector<4x8x8xf32>
    %506 = arith.truncf %505 : vector<4x8x8xf32> to vector<4x8x8xbf16>
    "tpu.trace_start"() <{level = 10 : i32, message = "hqk,hkd->hqd"}> : () -> ()
    %cst_123 = arith.constant dense<0.000000e+00> : vector<4x8x8xf32>
    %507 = tpu.matmul %506, %494, %cst_123 {dimension_numbers = #tpu.dot_dimension_numbers<[2], [1], [1], [2], [0, 0, 0, 1, 1, 2], [0], [0]>} : vector<4x8x8xbf16>, vector<4x8x8xbf16>, vector<4x8x8xf32> -> vector<4x8x8xf32>
    "tpu.trace_stop"() : () -> ()
    %508 = arith.truncf %507 : vector<4x8x8xf32> to vector<4x8x8xbf16>
    "tpu.trace_start"() <{level = 10 : i32, message = "hqd,hde->hqe"}> : () -> ()
    %cst_124 = arith.constant dense<0.000000e+00> : vector<4x8x32xf32>
    %509 = tpu.matmul %508, %400, %cst_124 {dimension_numbers = #tpu.dot_dimension_numbers<[2], [1], [1], [2], [0, 0, 0, 1, 1, 2], [0], [0]>} : vector<4x8x8xbf16>, vector<4x8x32xbf16>, vector<4x8x32xf32> -> vector<4x8x32xf32>
    "tpu.trace_stop"() : () -> ()
    %510 = vector.extract_strided_slice %509 {offsets = [0, 0, 0], sizes = [1, 8, 32], strides = [1, 1, 1]} : vector<4x8x32xf32> to vector<1x8x32xf32>
    %511 = vector.shape_cast %510 : vector<1x8x32xf32> to vector<8x32xf32>
    %512 = vector.extract_strided_slice %509 {offsets = [1, 0, 0], sizes = [1, 8, 32], strides = [1, 1, 1]} : vector<4x8x32xf32> to vector<1x8x32xf32>
    %513 = vector.shape_cast %512 : vector<1x8x32xf32> to vector<8x32xf32>
    %514 = arith.addf %511, %513 : vector<8x32xf32>
    %515 = vector.extract_strided_slice %509 {offsets = [2, 0, 0], sizes = [1, 8, 32], strides = [1, 1, 1]} : vector<4x8x32xf32> to vector<1x8x32xf32>
    %516 = vector.shape_cast %515 : vector<1x8x32xf32> to vector<8x32xf32>
    %517 = arith.addf %514, %516 : vector<8x32xf32>
    %518 = vector.extract_strided_slice %509 {offsets = [3, 0, 0], sizes = [1, 8, 32], strides = [1, 1, 1]} : vector<4x8x32xf32> to vector<1x8x32xf32>
    %519 = vector.shape_cast %518 : vector<1x8x32xf32> to vector<8x32xf32>
    %520 = arith.addf %517, %519 : vector<8x32xf32>
    %521 = tpu.concatenate %461, %520 in 0 : vector<8x32xf32>, vector<8x32xf32> -> vector<16x32xf32>
    %522 = vector.broadcast %402 : vector<1x32xf32> to vector<16x32xf32>
    %523 = arith.addf %521, %522 : vector<16x32xf32>
    %524 = arith.addf %387, %523 : vector<16x32xf32>
    %c1_125 = arith.constant 1 : index
    %c7_126 = arith.constant 7 : index
    %c0_127 = arith.constant 0 : index
    %525 = vector.load %arg10[%c1_125, %c7_126, %c0_127] : memref<2x16x128xf32, #tpu.memory_space<vmem>>, vector<1x1x32xf32>
    %526 = vector.shape_cast %525 : vector<1x1x32xf32> to vector<1x32xf32>
    %c1_128 = arith.constant 1 : index
    %c8_129 = arith.constant 8 : index
    %c0_130 = arith.constant 0 : index
    %527 = vector.load %arg10[%c1_128, %c8_129, %c0_130] : memref<2x16x128xf32, #tpu.memory_space<vmem>>, vector<1x1x32xf32>
    %528 = vector.shape_cast %527 : vector<1x1x32xf32> to vector<1x32xf32>
    %cst_131 = arith.constant dense<0.000000e+00> : vector<16xf32>
    %529 = vector.multi_reduction <add>, %524, %cst_131 [1] : vector<16x32xf32> to vector<16xf32>
    %530 = vector.shape_cast %529 : vector<16xf32> to vector<16x1xf32>
    %cst_132 = arith.constant 3.200000e+01 : f32
    %531 = vector.broadcast %cst_132 : f32 to vector<16x1xf32>
    %532 = arith.divf %530, %531 : vector<16x1xf32>
    %533 = arith.mulf %524, %524 : vector<16x32xf32>
    %cst_133 = arith.constant dense<0.000000e+00> : vector<16xf32>
    %534 = vector.multi_reduction <add>, %533, %cst_133 [1] : vector<16x32xf32> to vector<16xf32>
    %535 = vector.shape_cast %534 : vector<16xf32> to vector<16x1xf32>
    %cst_134 = arith.constant 3.200000e+01 : f32
    %536 = vector.broadcast %cst_134 : f32 to vector<16x1xf32>
    %537 = arith.divf %535, %536 : vector<16x1xf32>
    %538 = arith.mulf %532, %532 : vector<16x1xf32>
    %539 = arith.subf %537, %538 : vector<16x1xf32>
    %540 = vector.broadcast %532 : vector<16x1xf32> to vector<16x32xf32>
    %541 = arith.subf %524, %540 : vector<16x32xf32>
    %cst_135 = arith.constant 9.99999974E-6 : f32
    %542 = vector.broadcast %cst_135 : f32 to vector<16x1xf32>
    %543 = arith.addf %539, %542 : vector<16x1xf32>
    %544 = math.rsqrt %543 : vector<16x1xf32>
    %545 = vector.broadcast %544 : vector<16x1xf32> to vector<16x32xf32>
    %546 = arith.mulf %541, %545 : vector<16x32xf32>
    %547 = vector.broadcast %526 : vector<1x32xf32> to vector<16x32xf32>
    %548 = arith.mulf %546, %547 : vector<16x32xf32>
    %549 = vector.broadcast %528 : vector<1x32xf32> to vector<16x32xf32>
    %550 = arith.addf %548, %549 : vector<16x32xf32>
    %c1_136 = arith.constant 1 : index
    %c0_137 = arith.constant 0 : index
    %c0_138 = arith.constant 0 : index
    %551 = vector.load %arg5[%c1_136, %c0_137, %c0_138] : memref<2x32x32xbf16, #tpu.memory_space<vmem>>, vector<1x32x32xbf16>
    %552 = vector.shape_cast %551 : vector<1x32x32xbf16> to vector<32x32xbf16>
    %553 = arith.truncf %550 : vector<16x32xf32> to vector<16x32xbf16>
    %cst_139 = arith.constant dense<0.000000e+00> : vector<16x32xf32>
    %554 = tpu.matmul %553, %552, %cst_139 {dimension_numbers = #tpu.dot_dimension_numbers<[1], [0], [0], [1], [0, 0, 1, 1], [], []>} : vector<16x32xbf16>, vector<32x32xbf16>, vector<16x32xf32> -> vector<16x32xf32>
    %c1_140 = arith.constant 1 : index
    %c2_141 = arith.constant 2 : index
    %c0_142 = arith.constant 0 : index
    %555 = vector.load %arg10[%c1_140, %c2_141, %c0_142] : memref<2x16x128xf32, #tpu.memory_space<vmem>>, vector<1x1x32xf32>
    %556 = vector.shape_cast %555 : vector<1x1x32xf32> to vector<1x32xf32>
    %557 = vector.broadcast %556 : vector<1x32xf32> to vector<16x32xf32>
    %558 = arith.addf %554, %557 : vector<16x32xf32>
    %c1_143 = arith.constant 1 : index
    %c0_144 = arith.constant 0 : index
    %c0_145 = arith.constant 0 : index
    %559 = vector.load %arg6[%c1_143, %c0_144, %c0_145] : memref<2x32x64xbf16, #tpu.memory_space<vmem>>, vector<1x32x64xbf16>
    %560 = vector.shape_cast %559 : vector<1x32x64xbf16> to vector<32x64xbf16>
    %561 = arith.truncf %9 : vector<16x32xf32> to vector<16x32xbf16>
    %cst_146 = arith.constant dense<0.000000e+00> : vector<16x64xf32>
    %562 = tpu.matmul %561, %560, %cst_146 {dimension_numbers = #tpu.dot_dimension_numbers<[1], [0], [0], [1], [0, 0, 1, 1], [], []>} : vector<16x32xbf16>, vector<32x64xbf16>, vector<16x64xf32> -> vector<16x64xf32>
    %c1_147 = arith.constant 1 : index
    %c3_148 = arith.constant 3 : index
    %c0_149 = arith.constant 0 : index
    %563 = vector.load %arg10[%c1_147, %c3_148, %c0_149] : memref<2x16x128xf32, #tpu.memory_space<vmem>>, vector<1x1x64xf32>
    %564 = vector.shape_cast %563 : vector<1x1x64xf32> to vector<1x64xf32>
    %565 = vector.broadcast %564 : vector<1x64xf32> to vector<16x64xf32>
    %566 = arith.addf %562, %565 : vector<16x64xf32>
    %567 = vector.extract_strided_slice %566 {offsets = [0, 0], sizes = [16, 32], strides = [1, 1]} : vector<16x64xf32> to vector<16x32xf32>
    %568 = vector.extract_strided_slice %566 {offsets = [0, 32], sizes = [16, 32], strides = [1, 1]} : vector<16x64xf32> to vector<16x32xf32>
    %c1_150 = arith.constant 1 : index
    %c0_151 = arith.constant 0 : index
    %c0_152 = arith.constant 0 : index
    %c0_153 = arith.constant 0 : index
    %569 = vector.load %arg7[%c1_150, %c0_151, %c0_152, %c0_153] : memref<2x4x8x32xbf16, #tpu.memory_space<vmem>>, vector<1x4x8x32xbf16>
    %570 = vector.shape_cast %569 : vector<1x4x8x32xbf16> to vector<4x8x32xbf16>
    %c1_154 = arith.constant 1 : index
    %c4_155 = arith.constant 4 : index
    %c0_156 = arith.constant 0 : index
    %571 = vector.load %arg10[%c1_154, %c4_155, %c0_156] : memref<2x16x128xf32, #tpu.memory_space<vmem>>, vector<1x1x32xf32>
    %572 = vector.shape_cast %571 : vector<1x1x32xf32> to vector<1x32xf32>
    %573 = vector.extract_strided_slice %558 {offsets = [0, 0], sizes = [8, 32], strides = [1, 1]} : vector<16x32xf32> to vector<8x32xf32>
    %574 = vector.extract_strided_slice %573 {offsets = [0, 0], sizes = [8, 8], strides = [1, 1]} : vector<8x32xf32> to vector<8x8xf32>
    %575 = vector.extract_strided_slice %573 {offsets = [0, 8], sizes = [8, 8], strides = [1, 1]} : vector<8x32xf32> to vector<8x8xf32>
    %576 = vector.extract_strided_slice %573 {offsets = [0, 16], sizes = [8, 8], strides = [1, 1]} : vector<8x32xf32> to vector<8x8xf32>
    %577 = vector.extract_strided_slice %573 {offsets = [0, 24], sizes = [8, 8], strides = [1, 1]} : vector<8x32xf32> to vector<8x8xf32>
    %578 = vector.shape_cast %574 : vector<8x8xf32> to vector<1x8x8xf32>
    %579 = vector.shape_cast %575 : vector<8x8xf32> to vector<1x8x8xf32>
    %580 = vector.shape_cast %576 : vector<8x8xf32> to vector<1x8x8xf32>
    %581 = vector.shape_cast %577 : vector<8x8xf32> to vector<1x8x8xf32>
    %582 = tpu.concatenate %578, %579, %580, %581 in 0 : vector<1x8x8xf32>, vector<1x8x8xf32>, vector<1x8x8xf32>, vector<1x8x8xf32> -> vector<4x8x8xf32>
    %583 = arith.truncf %582 : vector<4x8x8xf32> to vector<4x8x8xbf16>
    %584 = vector.extract_strided_slice %567 {offsets = [0, 0], sizes = [8, 32], strides = [1, 1]} : vector<16x32xf32> to vector<8x32xf32>
    %585 = vector.extract_strided_slice %584 {offsets = [0, 0], sizes = [8, 8], strides = [1, 1]} : vector<8x32xf32> to vector<8x8xf32>
    %586 = vector.extract_strided_slice %584 {offsets = [0, 8], sizes = [8, 8], strides = [1, 1]} : vector<8x32xf32> to vector<8x8xf32>
    %587 = vector.extract_strided_slice %584 {offsets = [0, 16], sizes = [8, 8], strides = [1, 1]} : vector<8x32xf32> to vector<8x8xf32>
    %588 = vector.extract_strided_slice %584 {offsets = [0, 24], sizes = [8, 8], strides = [1, 1]} : vector<8x32xf32> to vector<8x8xf32>
    %589 = vector.shape_cast %585 : vector<8x8xf32> to vector<1x8x8xf32>
    %590 = vector.shape_cast %586 : vector<8x8xf32> to vector<1x8x8xf32>
    %591 = vector.shape_cast %587 : vector<8x8xf32> to vector<1x8x8xf32>
    %592 = vector.shape_cast %588 : vector<8x8xf32> to vector<1x8x8xf32>
    %593 = tpu.concatenate %589, %590, %591, %592 in 0 : vector<1x8x8xf32>, vector<1x8x8xf32>, vector<1x8x8xf32>, vector<1x8x8xf32> -> vector<4x8x8xf32>
    %594 = arith.truncf %593 : vector<4x8x8xf32> to vector<4x8x8xbf16>
    %595 = vector.extract_strided_slice %568 {offsets = [0, 0], sizes = [8, 32], strides = [1, 1]} : vector<16x32xf32> to vector<8x32xf32>
    %596 = vector.extract_strided_slice %595 {offsets = [0, 0], sizes = [8, 8], strides = [1, 1]} : vector<8x32xf32> to vector<8x8xf32>
    %597 = vector.extract_strided_slice %595 {offsets = [0, 8], sizes = [8, 8], strides = [1, 1]} : vector<8x32xf32> to vector<8x8xf32>
    %598 = vector.extract_strided_slice %595 {offsets = [0, 16], sizes = [8, 8], strides = [1, 1]} : vector<8x32xf32> to vector<8x8xf32>
    %599 = vector.extract_strided_slice %595 {offsets = [0, 24], sizes = [8, 8], strides = [1, 1]} : vector<8x32xf32> to vector<8x8xf32>
    %600 = vector.shape_cast %596 : vector<8x8xf32> to vector<1x8x8xf32>
    %601 = vector.shape_cast %597 : vector<8x8xf32> to vector<1x8x8xf32>
    %602 = vector.shape_cast %598 : vector<8x8xf32> to vector<1x8x8xf32>
    %603 = vector.shape_cast %599 : vector<8x8xf32> to vector<1x8x8xf32>
    %604 = tpu.concatenate %600, %601, %602, %603 in 0 : vector<1x8x8xf32>, vector<1x8x8xf32>, vector<1x8x8xf32>, vector<1x8x8xf32> -> vector<4x8x8xf32>
    %605 = arith.truncf %604 : vector<4x8x8xf32> to vector<4x8x8xbf16>
    "tpu.trace_start"() <{level = 10 : i32, message = "hqd,hkd->hqk"}> : () -> ()
    %cst_157 = arith.constant dense<0.000000e+00> : vector<4x8x8xf32>
    %606 = tpu.matmul %583, %594, %cst_157 {dimension_numbers = #tpu.dot_dimension_numbers<[2], [2], [1], [1], [0, 0, 0, 1, 1, 1], [0], [0]>} : vector<4x8x8xbf16>, vector<4x8x8xbf16>, vector<4x8x8xf32> -> vector<4x8x8xf32>
    "tpu.trace_stop"() : () -> ()
    %cst_158 = arith.constant dense<0xFF800000> : vector<4x8xf32>
    %607 = vector.multi_reduction <maximumf>, %606, %cst_158 [2] : vector<4x8x8xf32> to vector<4x8xf32>
    %608 = vector.shape_cast %607 : vector<4x8xf32> to vector<4x8x1xf32>
    %609 = vector.broadcast %608 : vector<4x8x1xf32> to vector<4x8x8xf32>
    %610 = arith.subf %606, %609 : vector<4x8x8xf32>
    %611 = math.exp %610 : vector<4x8x8xf32>
    %cst_159 = arith.constant dense<0.000000e+00> : vector<4x8xf32>
    %612 = vector.multi_reduction <add>, %611, %cst_159 [2] : vector<4x8x8xf32> to vector<4x8xf32>
    %613 = vector.shape_cast %612 : vector<4x8xf32> to vector<4x8x1xf32>
    %614 = tpu.reciprocal %613 {approx = true} : vector<4x8x1xf32> -> vector<4x8x1xf32>
    %615 = vector.broadcast %614 : vector<4x8x1xf32> to vector<4x8x8xf32>
    %616 = arith.mulf %611, %615 : vector<4x8x8xf32>
    %617 = arith.truncf %616 : vector<4x8x8xf32> to vector<4x8x8xbf16>
    "tpu.trace_start"() <{level = 10 : i32, message = "hqk,hkd->hqd"}> : () -> ()
    %cst_160 = arith.constant dense<0.000000e+00> : vector<4x8x8xf32>
    %618 = tpu.matmul %617, %605, %cst_160 {dimension_numbers = #tpu.dot_dimension_numbers<[2], [1], [1], [2], [0, 0, 0, 1, 1, 2], [0], [0]>} : vector<4x8x8xbf16>, vector<4x8x8xbf16>, vector<4x8x8xf32> -> vector<4x8x8xf32>
    "tpu.trace_stop"() : () -> ()
    %619 = arith.truncf %618 : vector<4x8x8xf32> to vector<4x8x8xbf16>
    "tpu.trace_start"() <{level = 10 : i32, message = "hqd,hde->hqe"}> : () -> ()
    %cst_161 = arith.constant dense<0.000000e+00> : vector<4x8x32xf32>
    %620 = tpu.matmul %619, %570, %cst_161 {dimension_numbers = #tpu.dot_dimension_numbers<[2], [1], [1], [2], [0, 0, 0, 1, 1, 2], [0], [0]>} : vector<4x8x8xbf16>, vector<4x8x32xbf16>, vector<4x8x32xf32> -> vector<4x8x32xf32>
    "tpu.trace_stop"() : () -> ()
    %621 = vector.extract_strided_slice %620 {offsets = [0, 0, 0], sizes = [1, 8, 32], strides = [1, 1, 1]} : vector<4x8x32xf32> to vector<1x8x32xf32>
    %622 = vector.shape_cast %621 : vector<1x8x32xf32> to vector<8x32xf32>
    %623 = vector.extract_strided_slice %620 {offsets = [1, 0, 0], sizes = [1, 8, 32], strides = [1, 1, 1]} : vector<4x8x32xf32> to vector<1x8x32xf32>
    %624 = vector.shape_cast %623 : vector<1x8x32xf32> to vector<8x32xf32>
    %625 = arith.addf %622, %624 : vector<8x32xf32>
    %626 = vector.extract_strided_slice %620 {offsets = [2, 0, 0], sizes = [1, 8, 32], strides = [1, 1, 1]} : vector<4x8x32xf32> to vector<1x8x32xf32>
    %627 = vector.shape_cast %626 : vector<1x8x32xf32> to vector<8x32xf32>
    %628 = arith.addf %625, %627 : vector<8x32xf32>
    %629 = vector.extract_strided_slice %620 {offsets = [3, 0, 0], sizes = [1, 8, 32], strides = [1, 1, 1]} : vector<4x8x32xf32> to vector<1x8x32xf32>
    %630 = vector.shape_cast %629 : vector<1x8x32xf32> to vector<8x32xf32>
    %631 = arith.addf %628, %630 : vector<8x32xf32>
    %632 = vector.extract_strided_slice %558 {offsets = [8, 0], sizes = [8, 32], strides = [1, 1]} : vector<16x32xf32> to vector<8x32xf32>
    %633 = vector.extract_strided_slice %632 {offsets = [0, 0], sizes = [8, 8], strides = [1, 1]} : vector<8x32xf32> to vector<8x8xf32>
    %634 = vector.extract_strided_slice %632 {offsets = [0, 8], sizes = [8, 8], strides = [1, 1]} : vector<8x32xf32> to vector<8x8xf32>
    %635 = vector.extract_strided_slice %632 {offsets = [0, 16], sizes = [8, 8], strides = [1, 1]} : vector<8x32xf32> to vector<8x8xf32>
    %636 = vector.extract_strided_slice %632 {offsets = [0, 24], sizes = [8, 8], strides = [1, 1]} : vector<8x32xf32> to vector<8x8xf32>
    %637 = vector.shape_cast %633 : vector<8x8xf32> to vector<1x8x8xf32>
    %638 = vector.shape_cast %634 : vector<8x8xf32> to vector<1x8x8xf32>
    %639 = vector.shape_cast %635 : vector<8x8xf32> to vector<1x8x8xf32>
    %640 = vector.shape_cast %636 : vector<8x8xf32> to vector<1x8x8xf32>
    %641 = tpu.concatenate %637, %638, %639, %640 in 0 : vector<1x8x8xf32>, vector<1x8x8xf32>, vector<1x8x8xf32>, vector<1x8x8xf32> -> vector<4x8x8xf32>
    %642 = arith.truncf %641 : vector<4x8x8xf32> to vector<4x8x8xbf16>
    %643 = vector.extract_strided_slice %567 {offsets = [8, 0], sizes = [8, 32], strides = [1, 1]} : vector<16x32xf32> to vector<8x32xf32>
    %644 = vector.extract_strided_slice %643 {offsets = [0, 0], sizes = [8, 8], strides = [1, 1]} : vector<8x32xf32> to vector<8x8xf32>
    %645 = vector.extract_strided_slice %643 {offsets = [0, 8], sizes = [8, 8], strides = [1, 1]} : vector<8x32xf32> to vector<8x8xf32>
    %646 = vector.extract_strided_slice %643 {offsets = [0, 16], sizes = [8, 8], strides = [1, 1]} : vector<8x32xf32> to vector<8x8xf32>
    %647 = vector.extract_strided_slice %643 {offsets = [0, 24], sizes = [8, 8], strides = [1, 1]} : vector<8x32xf32> to vector<8x8xf32>
    %648 = vector.shape_cast %644 : vector<8x8xf32> to vector<1x8x8xf32>
    %649 = vector.shape_cast %645 : vector<8x8xf32> to vector<1x8x8xf32>
    %650 = vector.shape_cast %646 : vector<8x8xf32> to vector<1x8x8xf32>
    %651 = vector.shape_cast %647 : vector<8x8xf32> to vector<1x8x8xf32>
    %652 = tpu.concatenate %648, %649, %650, %651 in 0 : vector<1x8x8xf32>, vector<1x8x8xf32>, vector<1x8x8xf32>, vector<1x8x8xf32> -> vector<4x8x8xf32>
    %653 = arith.truncf %652 : vector<4x8x8xf32> to vector<4x8x8xbf16>
    %654 = vector.extract_strided_slice %568 {offsets = [8, 0], sizes = [8, 32], strides = [1, 1]} : vector<16x32xf32> to vector<8x32xf32>
    %655 = vector.extract_strided_slice %654 {offsets = [0, 0], sizes = [8, 8], strides = [1, 1]} : vector<8x32xf32> to vector<8x8xf32>
    %656 = vector.extract_strided_slice %654 {offsets = [0, 8], sizes = [8, 8], strides = [1, 1]} : vector<8x32xf32> to vector<8x8xf32>
    %657 = vector.extract_strided_slice %654 {offsets = [0, 16], sizes = [8, 8], strides = [1, 1]} : vector<8x32xf32> to vector<8x8xf32>
    %658 = vector.extract_strided_slice %654 {offsets = [0, 24], sizes = [8, 8], strides = [1, 1]} : vector<8x32xf32> to vector<8x8xf32>
    %659 = vector.shape_cast %655 : vector<8x8xf32> to vector<1x8x8xf32>
    %660 = vector.shape_cast %656 : vector<8x8xf32> to vector<1x8x8xf32>
    %661 = vector.shape_cast %657 : vector<8x8xf32> to vector<1x8x8xf32>
    %662 = vector.shape_cast %658 : vector<8x8xf32> to vector<1x8x8xf32>
    %663 = tpu.concatenate %659, %660, %661, %662 in 0 : vector<1x8x8xf32>, vector<1x8x8xf32>, vector<1x8x8xf32>, vector<1x8x8xf32> -> vector<4x8x8xf32>
    %664 = arith.truncf %663 : vector<4x8x8xf32> to vector<4x8x8xbf16>
    "tpu.trace_start"() <{level = 10 : i32, message = "hqd,hkd->hqk"}> : () -> ()
    %cst_162 = arith.constant dense<0.000000e+00> : vector<4x8x8xf32>
    %665 = tpu.matmul %642, %653, %cst_162 {dimension_numbers = #tpu.dot_dimension_numbers<[2], [2], [1], [1], [0, 0, 0, 1, 1, 1], [0], [0]>} : vector<4x8x8xbf16>, vector<4x8x8xbf16>, vector<4x8x8xf32> -> vector<4x8x8xf32>
    "tpu.trace_stop"() : () -> ()
    %cst_163 = arith.constant dense<0xFF800000> : vector<4x8xf32>
    %666 = vector.multi_reduction <maximumf>, %665, %cst_163 [2] : vector<4x8x8xf32> to vector<4x8xf32>
    %667 = vector.shape_cast %666 : vector<4x8xf32> to vector<4x8x1xf32>
    %668 = vector.broadcast %667 : vector<4x8x1xf32> to vector<4x8x8xf32>
    %669 = arith.subf %665, %668 : vector<4x8x8xf32>
    %670 = math.exp %669 : vector<4x8x8xf32>
    %cst_164 = arith.constant dense<0.000000e+00> : vector<4x8xf32>
    %671 = vector.multi_reduction <add>, %670, %cst_164 [2] : vector<4x8x8xf32> to vector<4x8xf32>
    %672 = vector.shape_cast %671 : vector<4x8xf32> to vector<4x8x1xf32>
    %673 = tpu.reciprocal %672 {approx = true} : vector<4x8x1xf32> -> vector<4x8x1xf32>
    %674 = vector.broadcast %673 : vector<4x8x1xf32> to vector<4x8x8xf32>
    %675 = arith.mulf %670, %674 : vector<4x8x8xf32>
    %676 = arith.truncf %675 : vector<4x8x8xf32> to vector<4x8x8xbf16>
    "tpu.trace_start"() <{level = 10 : i32, message = "hqk,hkd->hqd"}> : () -> ()
    %cst_165 = arith.constant dense<0.000000e+00> : vector<4x8x8xf32>
    %677 = tpu.matmul %676, %664, %cst_165 {dimension_numbers = #tpu.dot_dimension_numbers<[2], [1], [1], [2], [0, 0, 0, 1, 1, 2], [0], [0]>} : vector<4x8x8xbf16>, vector<4x8x8xbf16>, vector<4x8x8xf32> -> vector<4x8x8xf32>
    "tpu.trace_stop"() : () -> ()
    %678 = arith.truncf %677 : vector<4x8x8xf32> to vector<4x8x8xbf16>
    "tpu.trace_start"() <{level = 10 : i32, message = "hqd,hde->hqe"}> : () -> ()
    %cst_166 = arith.constant dense<0.000000e+00> : vector<4x8x32xf32>
    %679 = tpu.matmul %678, %570, %cst_166 {dimension_numbers = #tpu.dot_dimension_numbers<[2], [1], [1], [2], [0, 0, 0, 1, 1, 2], [0], [0]>} : vector<4x8x8xbf16>, vector<4x8x32xbf16>, vector<4x8x32xf32> -> vector<4x8x32xf32>
    "tpu.trace_stop"() : () -> ()
    %680 = vector.extract_strided_slice %679 {offsets = [0, 0, 0], sizes = [1, 8, 32], strides = [1, 1, 1]} : vector<4x8x32xf32> to vector<1x8x32xf32>
    %681 = vector.shape_cast %680 : vector<1x8x32xf32> to vector<8x32xf32>
    %682 = vector.extract_strided_slice %679 {offsets = [1, 0, 0], sizes = [1, 8, 32], strides = [1, 1, 1]} : vector<4x8x32xf32> to vector<1x8x32xf32>
    %683 = vector.shape_cast %682 : vector<1x8x32xf32> to vector<8x32xf32>
    %684 = arith.addf %681, %683 : vector<8x32xf32>
    %685 = vector.extract_strided_slice %679 {offsets = [2, 0, 0], sizes = [1, 8, 32], strides = [1, 1, 1]} : vector<4x8x32xf32> to vector<1x8x32xf32>
    %686 = vector.shape_cast %685 : vector<1x8x32xf32> to vector<8x32xf32>
    %687 = arith.addf %684, %686 : vector<8x32xf32>
    %688 = vector.extract_strided_slice %679 {offsets = [3, 0, 0], sizes = [1, 8, 32], strides = [1, 1, 1]} : vector<4x8x32xf32> to vector<1x8x32xf32>
    %689 = vector.shape_cast %688 : vector<1x8x32xf32> to vector<8x32xf32>
    %690 = arith.addf %687, %689 : vector<8x32xf32>
    %691 = tpu.concatenate %631, %690 in 0 : vector<8x32xf32>, vector<8x32xf32> -> vector<16x32xf32>
    %692 = vector.broadcast %572 : vector<1x32xf32> to vector<16x32xf32>
    %693 = arith.addf %691, %692 : vector<16x32xf32>
    %694 = arith.addf %550, %693 : vector<16x32xf32>
    %c1_167 = arith.constant 1 : index
    %c9_168 = arith.constant 9 : index
    %c0_169 = arith.constant 0 : index
    %695 = vector.load %arg10[%c1_167, %c9_168, %c0_169] : memref<2x16x128xf32, #tpu.memory_space<vmem>>, vector<1x1x32xf32>
    %696 = vector.shape_cast %695 : vector<1x1x32xf32> to vector<1x32xf32>
    %c1_170 = arith.constant 1 : index
    %c10_171 = arith.constant 10 : index
    %c0_172 = arith.constant 0 : index
    %697 = vector.load %arg10[%c1_170, %c10_171, %c0_172] : memref<2x16x128xf32, #tpu.memory_space<vmem>>, vector<1x1x32xf32>
    %698 = vector.shape_cast %697 : vector<1x1x32xf32> to vector<1x32xf32>
    %cst_173 = arith.constant dense<0.000000e+00> : vector<16xf32>
    %699 = vector.multi_reduction <add>, %694, %cst_173 [1] : vector<16x32xf32> to vector<16xf32>
    %700 = vector.shape_cast %699 : vector<16xf32> to vector<16x1xf32>
    %cst_174 = arith.constant 3.200000e+01 : f32
    %701 = vector.broadcast %cst_174 : f32 to vector<16x1xf32>
    %702 = arith.divf %700, %701 : vector<16x1xf32>
    %703 = arith.mulf %694, %694 : vector<16x32xf32>
    %cst_175 = arith.constant dense<0.000000e+00> : vector<16xf32>
    %704 = vector.multi_reduction <add>, %703, %cst_175 [1] : vector<16x32xf32> to vector<16xf32>
    %705 = vector.shape_cast %704 : vector<16xf32> to vector<16x1xf32>
    %cst_176 = arith.constant 3.200000e+01 : f32
    %706 = vector.broadcast %cst_176 : f32 to vector<16x1xf32>
    %707 = arith.divf %705, %706 : vector<16x1xf32>
    %708 = arith.mulf %702, %702 : vector<16x1xf32>
    %709 = arith.subf %707, %708 : vector<16x1xf32>
    %710 = vector.broadcast %702 : vector<16x1xf32> to vector<16x32xf32>
    %711 = arith.subf %694, %710 : vector<16x32xf32>
    %cst_177 = arith.constant 9.99999974E-6 : f32
    %712 = vector.broadcast %cst_177 : f32 to vector<16x1xf32>
    %713 = arith.addf %709, %712 : vector<16x1xf32>
    %714 = math.rsqrt %713 : vector<16x1xf32>
    %715 = vector.broadcast %714 : vector<16x1xf32> to vector<16x32xf32>
    %716 = arith.mulf %711, %715 : vector<16x32xf32>
    %717 = vector.broadcast %696 : vector<1x32xf32> to vector<16x32xf32>
    %718 = arith.mulf %716, %717 : vector<16x32xf32>
    %719 = vector.broadcast %698 : vector<1x32xf32> to vector<16x32xf32>
    %720 = arith.addf %718, %719 : vector<16x32xf32>
    %c1_178 = arith.constant 1 : index
    %c0_179 = arith.constant 0 : index
    %c0_180 = arith.constant 0 : index
    %721 = vector.load %arg8[%c1_178, %c0_179, %c0_180] : memref<2x32x64xbf16, #tpu.memory_space<vmem>>, vector<1x32x64xbf16>
    %722 = vector.shape_cast %721 : vector<1x32x64xbf16> to vector<32x64xbf16>
    %723 = arith.truncf %720 : vector<16x32xf32> to vector<16x32xbf16>
    %cst_181 = arith.constant dense<0.000000e+00> : vector<16x64xf32>
    %724 = tpu.matmul %723, %722, %cst_181 {dimension_numbers = #tpu.dot_dimension_numbers<[1], [0], [0], [1], [0, 0, 1, 1], [], []>} : vector<16x32xbf16>, vector<32x64xbf16>, vector<16x64xf32> -> vector<16x64xf32>
    %c1_182 = arith.constant 1 : index
    %c5_183 = arith.constant 5 : index
    %c0_184 = arith.constant 0 : index
    %725 = vector.load %arg10[%c1_182, %c5_183, %c0_184] : memref<2x16x128xf32, #tpu.memory_space<vmem>>, vector<1x1x64xf32>
    %726 = vector.shape_cast %725 : vector<1x1x64xf32> to vector<1x64xf32>
    %727 = vector.broadcast %726 : vector<1x64xf32> to vector<16x64xf32>
    %728 = arith.addf %724, %727 : vector<16x64xf32>
    %cst_185 = arith.constant 0.000000e+00 : f32
    %729 = vector.broadcast %cst_185 : f32 to vector<16x64xf32>
    %730 = arith.maximumf %728, %729 : vector<16x64xf32>
    %c1_186 = arith.constant 1 : index
    %c0_187 = arith.constant 0 : index
    %c0_188 = arith.constant 0 : index
    %731 = vector.load %arg9[%c1_186, %c0_187, %c0_188] : memref<2x64x32xbf16, #tpu.memory_space<vmem>>, vector<1x64x32xbf16>
    %732 = vector.shape_cast %731 : vector<1x64x32xbf16> to vector<64x32xbf16>
    %733 = arith.truncf %730 : vector<16x64xf32> to vector<16x64xbf16>
    %cst_189 = arith.constant dense<0.000000e+00> : vector<16x32xf32>
    %734 = tpu.matmul %733, %732, %cst_189 {dimension_numbers = #tpu.dot_dimension_numbers<[1], [0], [0], [1], [0, 0, 1, 1], [], []>} : vector<16x64xbf16>, vector<64x32xbf16>, vector<16x32xf32> -> vector<16x32xf32>
    %c1_190 = arith.constant 1 : index
    %c6_191 = arith.constant 6 : index
    %c0_192 = arith.constant 0 : index
    %735 = vector.load %arg10[%c1_190, %c6_191, %c0_192] : memref<2x16x128xf32, #tpu.memory_space<vmem>>, vector<1x1x32xf32>
    %736 = vector.shape_cast %735 : vector<1x1x32xf32> to vector<1x32xf32>
    %737 = vector.broadcast %736 : vector<1x32xf32> to vector<16x32xf32>
    %738 = arith.addf %734, %737 : vector<16x32xf32>
    %739 = arith.addf %720, %738 : vector<16x32xf32>
    %c1_193 = arith.constant 1 : index
    %c11_194 = arith.constant 11 : index
    %c0_195 = arith.constant 0 : index
    %740 = vector.load %arg10[%c1_193, %c11_194, %c0_195] : memref<2x16x128xf32, #tpu.memory_space<vmem>>, vector<1x1x32xf32>
    %741 = vector.shape_cast %740 : vector<1x1x32xf32> to vector<1x32xf32>
    %c1_196 = arith.constant 1 : index
    %c12_197 = arith.constant 12 : index
    %c0_198 = arith.constant 0 : index
    %742 = vector.load %arg10[%c1_196, %c12_197, %c0_198] : memref<2x16x128xf32, #tpu.memory_space<vmem>>, vector<1x1x32xf32>
    %743 = vector.shape_cast %742 : vector<1x1x32xf32> to vector<1x32xf32>
    %cst_199 = arith.constant dense<0.000000e+00> : vector<16xf32>
    %744 = vector.multi_reduction <add>, %739, %cst_199 [1] : vector<16x32xf32> to vector<16xf32>
    %745 = vector.shape_cast %744 : vector<16xf32> to vector<16x1xf32>
    %cst_200 = arith.constant 3.200000e+01 : f32
    %746 = vector.broadcast %cst_200 : f32 to vector<16x1xf32>
    %747 = arith.divf %745, %746 : vector<16x1xf32>
    %748 = arith.mulf %739, %739 : vector<16x32xf32>
    %cst_201 = arith.constant dense<0.000000e+00> : vector<16xf32>
    %749 = vector.multi_reduction <add>, %748, %cst_201 [1] : vector<16x32xf32> to vector<16xf32>
    %750 = vector.shape_cast %749 : vector<16xf32> to vector<16x1xf32>
    %cst_202 = arith.constant 3.200000e+01 : f32
    %751 = vector.broadcast %cst_202 : f32 to vector<16x1xf32>
    %752 = arith.divf %750, %751 : vector<16x1xf32>
    %753 = arith.mulf %747, %747 : vector<16x1xf32>
    %754 = arith.subf %752, %753 : vector<16x1xf32>
    %755 = vector.broadcast %747 : vector<16x1xf32> to vector<16x32xf32>
    %756 = arith.subf %739, %755 : vector<16x32xf32>
    %cst_203 = arith.constant 9.99999974E-6 : f32
    %757 = vector.broadcast %cst_203 : f32 to vector<16x1xf32>
    %758 = arith.addf %754, %757 : vector<16x1xf32>
    %759 = math.rsqrt %758 : vector<16x1xf32>
    %760 = vector.broadcast %759 : vector<16x1xf32> to vector<16x32xf32>
    %761 = arith.mulf %756, %760 : vector<16x32xf32>
    %762 = vector.broadcast %741 : vector<1x32xf32> to vector<16x32xf32>
    %763 = arith.mulf %761, %762 : vector<16x32xf32>
    %764 = vector.broadcast %743 : vector<1x32xf32> to vector<16x32xf32>
    %765 = arith.addf %763, %764 : vector<16x32xf32>
    %766 = vector.extract_strided_slice %765 {offsets = [7, 0], sizes = [1, 32], strides = [1, 1]} : vector<16x32xf32> to vector<1x32xf32>
    %767 = vector.extract_strided_slice %765 {offsets = [15, 0], sizes = [1, 32], strides = [1, 1]} : vector<16x32xf32> to vector<1x32xf32>
    %768 = tpu.concatenate %766, %767 in 0 : vector<1x32xf32>, vector<1x32xf32> -> vector<2x32xf32>
    %c0_204 = arith.constant 0 : index
    %c0_205 = arith.constant 0 : index
    %769 = vector.load %arg11[%c0_204, %c0_205] : memref<32x32xbf16, #tpu.memory_space<vmem>>, vector<32x32xbf16>
    %770 = arith.truncf %768 : vector<2x32xf32> to vector<2x32xbf16>
    %cst_206 = arith.constant dense<0.000000e+00> : vector<2x32xf32>
    %771 = tpu.matmul %770, %769, %cst_206 {dimension_numbers = #tpu.dot_dimension_numbers<[1], [0], [0], [1], [0, 0, 1, 1], [], []>} : vector<2x32xbf16>, vector<32x32xbf16>, vector<2x32xf32> -> vector<2x32xf32>
    %c0_207 = arith.constant 0 : index
    %c0_208 = arith.constant 0 : index
    %772 = vector.load %arg12[%c0_207, %c0_208] : memref<1x32xf32, #tpu.memory_space<vmem>>, vector<1x32xf32>
    %773 = vector.broadcast %772 : vector<1x32xf32> to vector<2x32xf32>
    %774 = arith.addf %771, %773 : vector<2x32xf32>
    %775 = vector.shape_cast %774 : vector<2x32xf32> to vector<2x1x32xf32>
    %c0_209 = arith.constant 0 : index
    %c0_210 = arith.constant 0 : index
    %c0_211 = arith.constant 0 : index
    %776 = vector.load %arg13[%c0_209, %c0_210, %c0_211] : memref<2x1x32xf32, #tpu.memory_space<vmem>>, vector<2x1x32xf32>
    tpu.vector_store %arg13[%c0_209, %c0_210, %c0_211], %775 {strides = array<i32>} : memref<2x1x32xf32, #tpu.memory_space<vmem>>, vector<2x1x32xf32>,
    return
  }
  func.func @transform_0(%arg0: i32) -> (i32, i32, i32) {
    %c0_i32 = arith.constant 0 : i32
    %c0_i32_0 = arith.constant 0 : i32
    %c0_i32_1 = arith.constant 0 : i32
    %c0_i32_2 = arith.constant 0 : i32
    return %c0_i32, %c0_i32_0, %c0_i32_1 : i32, i32, i32
  }
  func.func @transform_1(%arg0: i32) -> (i32, i32, i32) {
    %c0_i32 = arith.constant 0 : i32
    %c0_i32_0 = arith.constant 0 : i32
    %c0_i32_1 = arith.constant 0 : i32
    %c0_i32_2 = arith.constant 0 : i32
    return %c0_i32, %c0_i32_0, %c0_i32_1 : i32, i32, i32
  }
  func.func @transform_2(%arg0: i32) -> (i32, i32, i32) {
    %c0_i32 = arith.constant 0 : i32
    %c0_i32_0 = arith.constant 0 : i32
    %c0_i32_1 = arith.constant 0 : i32
    %c0_i32_2 = arith.constant 0 : i32
    return %c0_i32, %c0_i32_0, %c0_i32_1 : i32, i32, i32
  }
  func.func @transform_3(%arg0: i32) -> (i32, i32, i32, i32) {
    %c0_i32 = arith.constant 0 : i32
    %c0_i32_0 = arith.constant 0 : i32
    %c0_i32_1 = arith.constant 0 : i32
    %c0_i32_2 = arith.constant 0 : i32
    %c0_i32_3 = arith.constant 0 : i32
    return %c0_i32, %c0_i32_0, %c0_i32_1, %c0_i32_2 : i32, i32, i32, i32
  }
  func.func @transform_4(%arg0: i32) -> (i32, i32, i32) {
    %c0_i32 = arith.constant 0 : i32
    %c0_i32_0 = arith.constant 0 : i32
    %c0_i32_1 = arith.constant 0 : i32
    %c0_i32_2 = arith.constant 0 : i32
    return %c0_i32, %c0_i32_0, %c0_i32_1 : i32, i32, i32
  }
  func.func @transform_5(%arg0: i32) -> (i32, i32, i32) {
    %c0_i32 = arith.constant 0 : i32
    %c0_i32_0 = arith.constant 0 : i32
    %c0_i32_1 = arith.constant 0 : i32
    %c0_i32_2 = arith.constant 0 : i32
    return %c0_i32, %c0_i32_0, %c0_i32_1 : i32, i32, i32
  }
  func.func @transform_6(%arg0: i32) -> (i32, i32, i32, i32) {
    %c0_i32 = arith.constant 0 : i32
    %c0_i32_0 = arith.constant 0 : i32
    %c0_i32_1 = arith.constant 0 : i32
    %c0_i32_2 = arith.constant 0 : i32
    %c0_i32_3 = arith.constant 0 : i32
    return %c0_i32, %c0_i32_0, %c0_i32_1, %c0_i32_2 : i32, i32, i32, i32
  }
  func.func @transform_7(%arg0: i32) -> (i32, i32, i32) {
    %c0_i32 = arith.constant 0 : i32
    %c0_i32_0 = arith.constant 0 : i32
    %c0_i32_1 = arith.constant 0 : i32
    %c0_i32_2 = arith.constant 0 : i32
    return %c0_i32, %c0_i32_0, %c0_i32_1 : i32, i32, i32
  }
  func.func @transform_8(%arg0: i32) -> (i32, i32, i32) {
    %c0_i32 = arith.constant 0 : i32
    %c0_i32_0 = arith.constant 0 : i32
    %c0_i32_1 = arith.constant 0 : i32
    %c0_i32_2 = arith.constant 0 : i32
    return %c0_i32, %c0_i32_0, %c0_i32_1 : i32, i32, i32
  }
  func.func @transform_9(%arg0: i32) -> (i32, i32, i32) {
    %c0_i32 = arith.constant 0 : i32
    %c0_i32_0 = arith.constant 0 : i32
    %c0_i32_1 = arith.constant 0 : i32
    %c0_i32_2 = arith.constant 0 : i32
    return %c0_i32, %c0_i32_0, %c0_i32_1 : i32, i32, i32
  }
  func.func @transform_10(%arg0: i32) -> (i32, i32) {
    %c0_i32 = arith.constant 0 : i32
    %c0_i32_0 = arith.constant 0 : i32
    %c0_i32_1 = arith.constant 0 : i32
    return %c0_i32, %c0_i32_0 : i32, i32
  }
  func.func @transform_11(%arg0: i32) -> (i32, i32) {
    %c0_i32 = arith.constant 0 : i32
    %c0_i32_0 = arith.constant 0 : i32
    %c0_i32_1 = arith.constant 0 : i32
    return %c0_i32, %c0_i32_0 : i32, i32
  }
  func.func @transform_12(%arg0: i32) -> (i32, i32, i32) {
    %c0_i32 = arith.constant 0 : i32
    %c0_i32_0 = arith.constant 0 : i32
    %c0_i32_1 = arith.constant 0 : i32
    %c0_i32_2 = arith.constant 0 : i32
    return %c0_i32, %c0_i32_0, %c0_i32_1 : i32, i32, i32
  }
}

</mosaic_0001>

<bundles_post_ra>
// kernel: _forward_impl.1
= control target key start
LH: loop header
LB: loop body
LE: loop exit
PB: predicated region body
PF: predicated region fallthrough
CT: control target
= control target key end

     0   :  { %17 = vsyncpa [#allocation3], 0  ;;  %s5291_s0 = inlined_call_operand.hbm [shape: f32[8,2,32], index: 0, kind: input, shape index: {}]   ;;  %s5292_s1 = inlined_call_operand.hbm [shape: f32[8,2,32], index: 1, kind: input, shape index: {}]   ;;  %s5293_s2 = inlined_call_operand.vmem [shape: bf16[2,32,96], index: 2, kind: input, shape index: {}]   ;;  %s5294_s3 = inlined_call_operand.vmem [shape: bf16[2,4,8,32], index: 3, kind: input, shape index: {}]   ;;  %s5295_s4 = inlined_call_operand.vmem [shape: bf16[2,32,32], index: 4, kind: input, shape index: {}]   ;;  %s5296_s5 = inlined_call_operand.hbm [shape: bf16[2,32,64], index: 5, kind: input, shape index: {}]   ;;  %s5297_s6 = inlined_call_operand.hbm [shape: bf16[2,4,8,32], index: 6, kind: input, shape index: {}]   ;;  %s5298_s7 = inlined_call_operand.hbm [shape: bf16[2,32,64], index: 7, kind: input, shape index: {}]   ;;  %s5299_s8 = inlined_call_operand.vmem [shape: bf16[2,64,32], index: 8, kind: input, shape index: {}]   ;;  %s5300_s9 = inlined_call_operand.hbm [shape: f32[2,16,128], index: 9, kind: input, shape index: {}]   ;;  %s5301_s10 = inlined_call_operand.hbm [shape: bf16[32,32], index: 10, kind: input, shape index: {}]   ;;  %s5302_s11 = inlined_call_operand.vmem [shape: f32[1,32], index: 11, kind: input, shape index: {}]   ;;  %s5303_s12 = inlined_call_operand.hbm [shape: f32[2,1,32], index: 12, kind: output, shape index: {}]  }
   0x1   :  { %18 = vsyncpa [#allocation6], 0 }
   0x2   :  { %19 = vsyncpa [#allocation9], 0 }
   0x3   :  { %20 = vsyncpa [#allocation12], 0 }
   0x4   :  { %21 = vsyncpa [#allocation4], 0  ;;  %s39_s23 = sshll.u32 %s5292_s1, 4  ;;  %s4384_s24 = smov [#allocation5]   ;;  %s40_s23 = int_to_ptr.hbm [resolvable:$true] %s39_s23 }
   0x5   :  { %s41_s25 = sshll.u32 %s4384_s24, 4  ;;  %s4385_s26 = smov 32   ;;  %s42_s25 = int_to_ptr.vmem [resolvable:$true] %s41_s25 }
   0x6   :  { %s4386_s27 = smov 2   ;;  %s71_s30 = sshll.u32 %s5297_s6, 4  ;;  %s72_s30 = int_to_ptr.hbm [resolvable:$true] %s71_s30 }
   0x7   :  { %47 = dma.hbm_to_vmem [thread:$0]  %s40_s23, 256, %s42_s25, [#allocation6], %s4385_s26, %s4385_s26, %s4386_s27  }
   0x8   :  { %s4387_s13 = smov [#allocation8]   ;;  %s99_s17 = sshll.u32 %s5300_s9, 4  ;;  %s100_s17 = int_to_ptr.hbm [resolvable:$true] %s99_s17 }
   0x9   :  { %s73_s14 = sshll.u32 %s4387_s13, 4  ;;  %s4388_s1 = smov 64   ;;  %s74_s14 = int_to_ptr.vmem [resolvable:$true] %s73_s14 }
   0xa   :  { %s4389_s18 = smov 4   ;;  %s4390_s19 = smov [#allocation11]  }
   0xb   :  { %79 = dma.hbm_to_vmem [thread:$0]  %s72_s30, 512, %s74_s14, [#allocation9], %s4388_s1, %s4388_s1, %s4389_s18  }
   0xc   :  { %s101_s20 = sshll.u32 %s4390_s19, 4  ;;  %s26_s22 = sshll.u32 %s5291_s0, 4  ;;  %s102_s20 = int_to_ptr.vmem [resolvable:$true] %s101_s20  ;;  %s27_s22 = int_to_ptr.hbm [resolvable:$true] %s26_s22 }
   0xd   :  { %s4391_s23 = smov 128   ;;  %s4392_s24 = smov 8  }
   0xe   :  { %107 = dma.hbm_to_vmem [thread:$0]  %s100_s17, 512, %s102_s20, [#allocation12], %s4391_s23, %s4391_s23, %s4392_s24  }
   0xf   :  { %s4393_s9 = smov [#allocation2]   ;;  %s58_s13 = sshll.u32 %s5296_s5, 4  ;;  %s59_s13 = int_to_ptr.hbm [resolvable:$true] %s58_s13 }
  0x10   :  { %s28_s25 = sshll.u32 %s4393_s9, 4  ;;  %s84_s15 = sshll.u32 %s5298_s7, 4  ;;  %s29_s25 = int_to_ptr.vmem [resolvable:$true] %s28_s25  ;;  %s85_s15 = int_to_ptr.hbm [resolvable:$true] %s84_s15 }
  0x11   :  { %34 = dma.hbm_to_vmem [thread:$0]  %s27_s22, 256, %s29_s25, [#allocation3], %s4385_s26, %s4385_s26, %s4386_s27  }
  0x12   :  { %s4394_s16 = smov [#allocation7]   ;;  %s4395_s0 = smov [#allocation10]  }
  0x13   :  { %s60_s19 = sshll.u32 %s4394_s16, 4  ;;  %s86_s17 = sshll.u32 %s4395_s0, 4  ;;  %s61_s19 = int_to_ptr.vmem [resolvable:$true] %s60_s19  ;;  %s87_s17 = int_to_ptr.vmem [resolvable:$true] %s86_s17 }
  0x14   :  { %66 = dma.hbm_to_vmem [thread:$0]  %s59_s13, 512, %s61_s19, [#allocation6], %s4388_s1, %s4388_s1, %s4389_s18  }
  0x15   :  { %s112_s5 = sshll.u32 %s5301_s10, 4  ;;  %s4396_s7 = smov [#allocation13]   ;;  %s113_s5 = int_to_ptr.hbm [resolvable:$true] %s112_s5 }
  0x16   :  { %92 = dma.hbm_to_vmem [thread:$0]  %s85_s15, 512, %s87_s17, [#allocation9], %s4388_s1, %s4388_s1, %s4389_s18  }
  0x17   :  { %s114_s26 = sshll.u32 %s4396_s7, 4  ;;  %s115_s26 = int_to_ptr.vmem [resolvable:$true] %s114_s26 }
  0x18   :  { %120 = dma.hbm_to_vmem [thread:$0]  %s113_s5, 256, %s115_s26, [#allocation12], %s4388_s1, %s4388_s1, %s4389_s18  }
  0x19   :  { %4374 = dma.done.wait [#allocation3], 256  }
  0x1a   :  { %4375 = vsyncadd [#allocation3], 4294967040 }
  0x1b   :  { %4376 = dma.done.wait [#allocation6], 768  }
  0x1c   :  { %4377 = vsyncadd [#allocation6], 4294966528 }
  0x1d   :  { %4378 = dma.done.wait [#allocation9], 1024  }
  0x1e   :  { %4379 = vsyncadd [#allocation9], 4294966272 }
  0x1f   :  { %4380 = dma.done.wait [#allocation12], 768  }
  0x20   :  { %4381 = vsyncadd [#allocation12], 4294966528  ;;  %v3955_v0 = vld [vmem:[%s5293_s2 + $0x8] sm:$0xff]  ;;  %vm177_vm0 = vcmask 1041409   ;;  %v3954_v1 = vld [vmem:[%s5293_s2] sm:$0xff]  ;;  %vm180_vm1 = vcmask 1042434  }
  0x21   :  { %vm183_vm2 = vcmask 1043459   ;;  %vm186_vm3 = vcmask 1044484   ;;  %vm189_vm4 = vcmask 1045509   ;;  %312 = vmatpush.bf16.msra.mxu0 %v3955_v0  ;;  %v153_v2 = vld [vmem:[#allocation2 + $0x2] sm:$0x1]  ;;  %vm192_vm5 = vcmask 1046534  }
  0x22   :  { %v154_v3 = vld [vmem:[#allocation2 + $0x4] sm:$0x1]  ;;  %v155_v4 = vld [vmem:[#allocation2 + $0x6] sm:$0x1]  ;;  %v152_v5 = vld [vmem:[#allocation2] sm:$0x1] }
  0x23   :  { %v156_v6 = vld [vmem:[#allocation2 + $0x8] sm:$0x1]  ;;  %v157_v7 = vld [vmem:[#allocation2 + $0xa] sm:$0x1]  ;;  %v158_v8 = vld [vmem:[#allocation2 + $0xc] sm:$0x1] }
  0x24   :  { %v159_v9 = vld [vmem:[#allocation2 + $0xe] sm:$0x1]  ;;  %v160_v10 = vld [vmem:[#allocation2 + $0x1] sm:$0x1]  ;;  %v161_v11 = vld [vmem:[#allocation2 + $0x3] sm:$0x1] }
  0x25   :  { %v162_v12 = vld [vmem:[#allocation2 + $0x5] sm:$0x1]  ;;  %v163_v13 = vld [vmem:[#allocation2 + $0x7] sm:$0x1]  ;;  %v164_v14 = vld [vmem:[#allocation2 + $0x9] sm:$0x1]  ;;  %313 = vmatpush.bf16.msra.mxu0 %v3954_v1 }
  0x26   :  { %v165_v15 = vld [vmem:[#allocation2 + $0xb] sm:$0x1]  ;;  %v166_v16 = vld [vmem:[#allocation2 + $0xd] sm:$0x1]  ;;  %v176_v17 = vrot.slane %v153_v2, 7  ;;  %v179_v18 = vrot.slane %v154_v3, 6 }
  0x27   :  { %v182_v19 = vrot.slane %v155_v4, 5  ;;  %vm195_vm6 = vcmask 1047559   ;;  %v167_v20 = vld [vmem:[#allocation2 + $0xf] sm:$0x1]  ;;  %v185_v21 = vrot.slane %v156_v6, 4  ;;  %v188_v22 = vrot.slane %v157_v7, 3 }
  0x28   :  { %v191_v23 = vrot.slane %v158_v8, 2  ;;  %v206_v24 = vrot.slane %v161_v11, 7  ;;  %vm302_vm7 = vcmask 261120   ;;  %v178_v25 = vsel %vm177_vm0, %v176_v17, %v152_v5  ;;  %v4530_v47 = vld [vmem:[#allocation11] ss:$0 sm:$0xff]  ;;  %s4397_s18 = smov 104  }
  0x29   :  { %v208_v26 = vrot.slane %v162_v12, 6  ;;  %v210_v27 = vrot.slane %v163_v13, 5  ;;  %v212_v28 = vrot.slane %v164_v14, 4  ;;  %v181_v29 = vsel %vm180_vm1, %v179_v18, %v178_v25  ;;  %s4398_s23 = smov 120   ;;  %s4399_s24 = smov 112  }
  0x2a   :  { %v194_v30 = vrot.slane %v159_v9, 1  ;;  %v207_v31 = vsel %vm177_vm0, %v206_v24, %v160_v10  ;;  %v214_v32 = vrot.slane %v165_v15, 3  ;;  %v184_v33 = vsel %vm183_vm2, %v182_v19, %v181_v29  ;;  %s4400_s9 = smov 96   ;;  %s4402_s27 = smov [#allocation14]  }
  0x2b   :  { %v209_v34 = vsel %vm180_vm1, %v208_v26, %v207_v31  ;;  %v216_v35 = vrot.slane %v166_v16, 2  ;;  %v218_v36 = vrot.slane %v167_v20, 1  ;;  %v187_v37 = vsel %vm186_vm3, %v185_v21, %v184_v33  ;;  %s3705_s6 = sshll.u32 %s4402_s27, 4  ;;  %s3707_s28 = sshll.u32 %s5303_s12, 4  ;;  %s3706_s6 = int_to_ptr.vmem [resolvable:$true] %s3705_s6  ;;  %s3708_s28 = int_to_ptr.hbm [resolvable:$true] %s3707_s28 }
  0x2c   :  { %v211_v38 = vsel %vm183_vm2, %v210_v27, %v209_v34  ;;  %v190_v39 = vsel %vm189_vm4, %v188_v22, %v187_v37  ;;  %vm344_vm8 = vcmask 64512   ;;  %vm489_vm9 = vcmask 1043456   ;;  %s4403_s29 = smov 16   ;;  %s4404_s13 = smov 1  }
  0x2d   :  { %v213_v40 = vsel %vm186_vm3, %v212_v28, %v211_v38  ;;  %v193_v41 = vsel %vm192_vm5, %v191_v23, %v190_v39 }
  0x2e   :  { %v215_v42 = vsel %vm189_vm4, %v214_v32, %v213_v40  ;;  %v4521_v43 = vsel %vm195_vm6, %v194_v30, %v193_v41 }
  0x2f   :  { %v217_v44 = vsel %vm192_vm5, %v216_v35, %v215_v42 }
  0x30   :  { %v4525_v45 = vsel %vm195_vm6, %v218_v36, %v217_v44 }
  0x31   :  { %v287_v46 = vpack.c.bf16 %v4525_v45, %v4521_v43 }
  0x33   :  { %3731 = vmatmul.msk.bf16.vlgmr.msra.gmra.mxu0 %vm302_vm7, %v287_v46 }
  0xb0   :  { %v315_v48 = vpop.f32.mrf.mxu0 }
  0xb1   :  { %v316_v49 = vadd.f32 %v4530_v47, %v315_v48 }
  0xb3   :  { %332 = vrot.lane.b32.xlu1 %v316_v49, %s4397_s18  ;;  %326 = vrot.lane.b32.xlu0 %v316_v49, %s4398_s23  ;;  %v335_v62 = vpack.c.bf16 %v316_v49, %v316_v49 }
  0xb5   :  { %v340_v63 = vunpack.c.l.b16 %v335_v62 }
  0xb7   :  { %v341_v0 = vpack.c.b16 %v340_v63, %v340_v63 }
  0xb8   :  { %v317_v11 = vpop.f32.mrf.mxu0 }
  0xb9   :  { %v4561_v22 = vadd.f32 %v4530_v47, %v317_v11 }
  0xbb   :  { %329 = vrot.lane.b32.xlu0 %v316_v49, %s4399_s24 }
 0x125   :  { %v333_v50 = vpop.permute.xlu1 %332  ;;  %v327_v51 = vpop.permute.xlu0 %326 }
 0x126   :  { %v338_v52 = vpack.c.bf16 %v333_v50, %v333_v50  ;;  %v336_v53 = vpack.c.bf16 %v327_v51, %v327_v51 }
 0x128   :  { %v413_v54 = vunpack.c.l.b16 %v338_v52  ;;  %v365_v55 = vunpack.c.l.b16 %v336_v53 }
 0x12a   :  { %v4536_v56 = vpack.c.b16 %v413_v54, %v413_v54  ;;  %v366_v57 = vpack.c.b16 %v365_v55, %v365_v55 }
 0x12c   :  { %415 = vrot.lane.b32.xlu0 %v4536_v56, %s4400_s9  ;;  %367 = vrot.lane.b32.xlu1 %v366_v57, %s4400_s9 }
 0x12d   :  { %v330_v58 = vpop.permute.xlu0 %329 }
 0x12e   :  { %v337_v59 = vpack.c.bf16 %v330_v58, %v330_v58 }
 0x130   :  { %v389_v60 = vunpack.c.l.b16 %v337_v59 }
 0x132   :  { %v4541_v61 = vpack.c.b16 %v389_v60, %v389_v60 }
 0x134   :  { %391 = vrot.lane.b32.xlu2 %v4541_v61, %s4400_s9 }
 0x13c   :  { %342 = vrot.lane.b32.xlu2 %v341_v0, %s4400_s9 }
 0x18e   :  { %v392_v1 = vpop.permute.xlu2 %391 }
 0x18f   :  { %v397_v2 = vsel %vm344_vm8, %v392_v1, 0 }
 0x190   :  { %406 = vmatpush.bf16.xpose.msra.mxu3 %v397_v2 }
 0x196   :  { %v343_v3 = vpop.permute.xlu2 %342 }
 0x197   :  { %3734 = vmatmul.msk.bf16.vlgmr.msra.gmra.mxu3 %vm344_vm8, %v337_v59  ;;  %v349_v4 = vsel %vm344_vm8, %v343_v3, 0 }
 0x198   :  { %358 = vmatpush.bf16.xpose.msra.mxu1 %v349_v4 }
 0x19e   :  { %v368_v5 = vpop.permute.xlu1 %367  ;;  %v416_v6 = vpop.permute.xlu0 %415 }
 0x19f   :  { %3732 = vmatmul.msk.bf16.vlgmr.msra.gmra.mxu1 %vm344_vm8, %v335_v62  ;;  %v373_v7 = vsel %vm344_vm8, %v368_v5, 0  ;;  %v421_v8 = vsel %vm344_vm8, %v416_v6, 0  ;;  %v322_v5 = vld [vmem:[%s5294_s3 + $0x8] sm:$0xf] }
 0x1a0   :  { %382 = vmatpush.bf16.xpose.msra.mxu2 %v373_v7  ;;  %430 = vmatpush.bf16.xpose.msrb.mxu0 %v421_v8  ;;  %v4594_v8 = vsel %vm489_vm9, %v322_v5, 0 }
 0x1a7   :  { %3733 = vmatmul.msk.bf16.vlgmr.msra.gmra.mxu2 %vm344_vm8, %v336_v53  ;;  %3735 = vmatmul.msk.bf16.vlgmr.msrb.gmra.mxu0 %vm344_vm8, %v338_v52 }
 0x21a   :  { %v408_v9 = vpop.f32.mrf.mxu3 }
 0x21b   :  { %v442_v10 = vsel %vm344_vm8, %v408_v9, -inf }
 0x21c   :  { %443 = vmax.xlane.f32.xlu2 %v442_v10  ;;  %v360_v12 = vpop.f32.mrf.mxu1 }
 0x21d   :  { %v436_v13 = vsel %vm344_vm8, %v360_v12, -inf }
 0x21e   :  { %437 = vmax.xlane.f32.xlu0 %v436_v13 }
 0x222   :  { %v410_v14 = vpop.f32.mrf.mxu3 }
 0x224   :  { %v362_v15 = vpop.f32.mrf.mxu1  ;;  %v432_v16 = vpop.f32.mrf.mxu0 }
 0x225   :  { %v445_v17 = vsel %vm344_vm8, %v432_v16, -inf  ;;  %v662_v15 = vpack.c.bf16 %v4561_v22, %v4561_v22 }
 0x226   :  { %446 = vmax.xlane.f32.xlu2 %v445_v17 }
 0x22a   :  { %v384_v18 = vpop.f32.mrf.mxu2 }
 0x22b   :  { %v439_v19 = vsel %vm344_vm8, %v384_v18, -inf }
 0x22c   :  { %440 = vmax.xlane.f32.xlu1 %v439_v19  ;;  %v434_v20 = vpop.f32.mrf.mxu0 }
 0x232   :  { %v386_v21 = vpop.f32.mrf.mxu2  ;;  %506 = vrot.lane.b32.xlu0 %v366_v57, %s4388_s1 }
 0x23a   :  { %484 = vrot.lane.b32.xlu0 %v341_v0, %s4388_s1 }
 0x242   :  { %656 = vrot.lane.b32.xlu0 %v4561_v22, %s4399_s24 }
 0x28f   :  { %v444_v23 = vpop.xlane.xlu2 %443 }
 0x290   :  { %v450_v29 = vsub.f32 %v408_v9, %v444_v23 }
 0x291   :  { %v438_v24 = vpop.xlane.xlu0 %437 }
 0x292   :  { %v448_v25 = vsub.f32 %v360_v12, %v438_v24  ;;  %v456_v33 = vmul.f32 1.442695, %v450_v29  ;;  %v320_v24 = vld [vmem:[%s5294_s3] sm:$0xf] }
 0x294   :  { %v452_v26 = vmul.f32 1.442695, %v448_v25  ;;  %v4618_v25 = vsel %vm489_vm9, %v320_v24, 0 }
 0x296   :  { %4028 = vpow2.f32 %v452_v26  ;;  %v323_v26 = vld [vmem:[%s5294_s3 + $0xc] sm:$0xf] }
 0x299   :  { %v447_v27 = vpop.xlane.xlu2 %446 }
 0x29a   :  { %v451_v28 = vsub.f32 %v432_v16, %v447_v27  ;;  %v4625_v27 = vsel %vm489_vm9, %v323_v26, 0 }
 0x29c   :  { %v4029_v30 = vpop.eup %4028  ;;  %v458_v31 = vmul.f32 1.442695, %v451_v28  ;;  %v321_v28 = vld [vmem:[%s5294_s3 + $0x4] sm:$0xf] }
 0x29d   :  { %v460_v32 = vsel %vm344_vm8, %v4029_v30, 0.0  ;;  %v4632_v29 = vsel %vm489_vm9, %v321_v28, 0 }
 0x29e   :  { %4030 = vpow2.f32 %v458_v31  ;;  %461 = vadd.xlane.f32.xlu2 %v460_v32 }
 0x29f   :  { %v441_v34 = vpop.xlane.xlu1 %440  ;;  %4032 = vpow2.f32 %v456_v33 }
 0x2a0   :  { %v449_v35 = vsub.f32 %v384_v18, %v441_v34  ;;  %v667_v18 = vunpack.c.l.b16 %v662_v15 }
 0x2a2   :  { %v454_v36 = vmul.f32 1.442695, %v449_v35  ;;  %v4607_v21 = vpack.c.b16 %v667_v18, %v667_v18 }
 0x2a4   :  { %v4031_v37 = vpop.eup %4030  ;;  %4034 = vpow2.f32 %v454_v36  ;;  %v507_v38 = vpop.permute.xlu0 %506 }
 0x2a5   :  { %v512_v39 = vsel %vm489_vm9, %v507_v38, 0  ;;  %v469_v40 = vsel %vm344_vm8, %v4031_v37, 0.0  ;;  %v4033_v41 = vpop.eup %4032 }
 0x2a6   :  { %521 = vmatpush.bf16.msrb.mxu2 %v512_v39  ;;  %470 = vadd.xlane.f32.xlu2 %v469_v40  ;;  %v466_v48 = vsel %vm344_vm8, %v4033_v41, 0.0 }
 0x2aa   :  { %v4035_v42 = vpop.eup %4034  ;;  %605 = vmatpush.bf16.msra.mxu2 %v4632_v29 }
 0x2ab   :  { %v463_v44 = vsel %vm344_vm8, %v4035_v42, 0.0 }
 0x2ac   :  { %464 = vadd.xlane.f32.xlu1 %v463_v44  ;;  %v485_v46 = vpop.permute.xlu0 %484 }
 0x2ad   :  { %v491_v47 = vsel %vm489_vm9, %v485_v46, 0 }
 0x2ae   :  { %500 = vmatpush.bf16.msrb.mxu1 %v491_v47  ;;  %467 = vadd.xlane.f32.xlu2 %v466_v48 }
 0x2b2   :  { %586 = vmatpush.bf16.msra.mxu1 %v4618_v25 }
 0x2b4   :  { %v657_v49 = vpop.permute.xlu0 %656 }
 0x2b5   :  { %v4577_v50 = vpack.c.bf16 %v657_v49, %v657_v49 }
 0x2b7   :  { %v715_v51 = vunpack.c.l.b16 %v4577_v50 }
 0x2b9   :  { %v4582_v52 = vpack.c.b16 %v715_v51, %v715_v51 }
 0x2c5   :  { %527 = vrot.lane.b32.xlu1 %v4541_v61, %s4388_s1 }
 0x2c6   :  { %548 = vrot.lane.b32.xlu2 %v4536_v56, %s4388_s1 }
 0x2cd   :  { %653 = vrot.lane.b32.xlu1 %v4561_v22, %s4398_s23 }
 0x2d5   :  { %659 = vrot.lane.b32.xlu1 %v4561_v22, %s4397_s18 }
 0x2dd   :  { %717 = vrot.lane.b32.xlu1 %v4582_v52, %s4400_s9 }
 0x311   :  { %v462_v53 = vpop.xlane.xlu2 %461 }
 0x312   :  { %4036 = vrcp.f32 %v462_v53 }
 0x318   :  { %v4037_v54 = vpop.eup %4036 }
 0x319   :  { %v471_v55 = vpop.xlane.xlu2 %470  ;;  %v476_v56 = vmul.f32 %v4037_v54, %v4029_v30 }
 0x31a   :  { %4038 = vrcp.f32 %v471_v55 }
 0x31b   :  { %v480_v57 = vpack.c.bf16 %v476_v56, %v476_v56 }
 0x31d   :  { %3736 = vmatmul.msk.bf16.vlgmr.msrb.gmra.mxu1 %vm344_vm8, %v480_v57 }
 0x31f   :  { %v465_v58 = vpop.xlane.xlu1 %464 }
 0x320   :  { %4040 = vrcp.f32 %v465_v58  ;;  %v4039_v60 = vpop.eup %4038 }
 0x321   :  { %v468_v59 = vpop.xlane.xlu2 %467  ;;  %v479_v63 = vmul.f32 %v4039_v60, %v4031_v37 }
 0x322   :  { %4042 = vrcp.f32 %v468_v59 }
 0x323   :  { %v483_v3 = vpack.c.bf16 %v479_v63, %v479_v63 }
 0x326   :  { %v4041_v61 = vpop.eup %4040 }
 0x327   :  { %v477_v62 = vmul.f32 %v4041_v61, %v4035_v42 }
 0x328   :  { %v4043_v4 = vpop.eup %4042 }
 0x329   :  { %v549_v0 = vpop.permute.xlu2 %548  ;;  %v481_v1 = vpack.c.bf16 %v477_v62, %v477_v62  ;;  %v478_v6 = vmul.f32 %v4043_v4, %v4033_v41 }
 0x32a   :  { %v554_v2 = vsel %vm489_vm9, %v549_v0, 0 }
 0x32b   :  { %3737 = vmatmul.msk.bf16.vlgmr.msrb.gmra.mxu2 %vm344_vm8, %v481_v1  ;;  %563 = vmatpush.bf16.msra.mxu0 %v554_v2  ;;  %v482_v10 = vpack.c.bf16 %v478_v6, %v478_v6 }
 0x32e   :  { %3739 = vmatmul.msk.bf16.vlgmr.msra.gmra.mxu0 %vm344_vm8, %v483_v3 }
 0x32f   :  { %643 = vmatpush.bf16.msrb.mxu0 %v4625_v27 }
 0x337   :  { %v528_v7 = vpop.permute.xlu1 %527 }
 0x338   :  { %v533_v9 = vsel %vm489_vm9, %v528_v7, 0 }
 0x339   :  { %542 = vmatpush.bf16.msrb.mxu3 %v533_v9 }
 0x33c   :  { %3738 = vmatmul.msk.bf16.vlgmr.msrb.gmra.mxu3 %vm344_vm8, %v482_v10 }
 0x33d   :  { %624 = vmatpush.bf16.msra.mxu3 %v4594_v8 }
 0x33f   :  { %v654_v11 = vpop.permute.xlu1 %653 }
 0x340   :  { %v663_v12 = vpack.c.bf16 %v654_v11, %v654_v11  ;;  %v4655_v11 = vld [vmem:[#allocation11 + $0x1] ss:$0 sm:$0xff] }
 0x342   :  { %v691_v13 = vunpack.c.l.b16 %v663_v12 }
 0x344   :  { %v4599_v14 = vpack.c.b16 %v691_v13, %v691_v13 }
 0x346   :  { %693 = vrot.lane.b32.xlu0 %v4599_v14, %s4400_s9 }
 0x347   :  { %v660_v16 = vpop.permute.xlu1 %659 }
 0x348   :  { %v665_v17 = vpack.c.bf16 %v660_v16, %v660_v16 }
 0x34a   :  { %v739_v19 = vunpack.c.l.b16 %v665_v17 }
 0x34c   :  { %v4605_v20 = vpack.c.b16 %v739_v19, %v739_v19 }
 0x34e   :  { %669 = vrot.lane.b32.xlu0 %v4607_v21, %s4400_s9  ;;  %741 = vrot.lane.b32.xlu2 %v4605_v20, %s4400_s9 }
 0x34f   :  { %v718_v23 = vpop.permute.xlu1 %717 }
 0x350   :  { %v723_v22 = vsel %vm344_vm8, %v718_v23, 0 }
 0x351   :  { %732 = vmatpush.bf16.xpose.msrb.mxu3 %v723_v22 }
 0x39a   :  { %v502_v30 = vpop.f32.mrf.mxu1 }
 0x39b   :  { %v569_v31 = vpack.c.bf16 %v502_v30, %v502_v30 }
 0x39d   :  { %3740 = vmatmul.msk.bf16.vlgmr.msra.gmra.mxu1 %vm344_vm8, %v569_v31 }
 0x3a2   :  { %v504_v32 = vpop.f32.mrf.mxu1 }
 0x3a8   :  { %v742_v33 = vpop.permute.xlu2 %741 }
 0x3a9   :  { %v747_v34 = vsel %vm344_vm8, %v742_v33, 0 }
 0x3aa   :  { %756 = vmatpush.bf16.xpose.msra.mxu0 %v747_v34 }
 0x3ab   :  { %v565_v35 = vpop.f32.mrf.mxu0 }
 0x3ac   :  { %v572_v36 = vpack.c.bf16 %v565_v35, %v565_v35 }
 0x3ae   :  { %v523_v37 = vpop.f32.mrf.mxu2  ;;  %3743 = vmatmul.msk.bf16.vlgmr.msrb.gmra.mxu0 %vm344_vm8, %v572_v36 }
 0x3af   :  { %v570_v38 = vpack.c.bf16 %v523_v37, %v523_v37 }
 0x3b1   :  { %3741 = vmatmul.msk.bf16.vlgmr.msra.gmra.mxu2 %vm344_vm8, %v570_v38 }
 0x3b3   :  { %v567_v39 = vpop.f32.mrf.mxu0 }
 0x3b6   :  { %v525_v40 = vpop.f32.mrf.mxu2 }
 0x3b8   :  { %v694_v41 = vpop.permute.xlu0 %693 }
 0x3b9   :  { %v699_v42 = vsel %vm344_vm8, %v694_v41, 0 }
 0x3ba   :  { %708 = vmatpush.bf16.xpose.msrb.mxu2 %v699_v42 }
 0x3be   :  { %3747 = vmatmul.msk.bf16.vlgmr.msra.gmra.mxu0 %vm344_vm8, %v665_v17 }
 0x3bf   :  { %v544_v44 = vpop.f32.mrf.mxu3 }
 0x3c0   :  { %v571_v46 = vpack.c.bf16 %v544_v44, %v544_v44  ;;  %v670_v47 = vpop.permute.xlu0 %669 }
 0x3c1   :  { %v675_v48 = vsel %vm344_vm8, %v670_v47, 0  ;;  %3745 = vmatmul.msk.bf16.vlgmr.msrb.gmra.mxu2 %vm344_vm8, %v663_v12 }
 0x3c2   :  { %3742 = vmatmul.msk.bf16.vlgmr.msra.gmra.mxu3 %vm344_vm8, %v571_v46  ;;  %684 = vmatpush.bf16.xpose.msrb.mxu1 %v675_v48 }
 0x3c7   :  { %v546_v49 = vpop.f32.mrf.mxu3 }
 0x3c9   :  { %3744 = vmatmul.msk.bf16.vlgmr.msrb.gmra.mxu1 %vm344_vm8, %v662_v15 }
 0x3d2   :  { %3746 = vmatmul.msk.bf16.vlgmr.msrb.gmra.mxu3 %vm344_vm8, %v4577_v50 }
 0x41a   :  { %v588_v51 = vpop.f32.mrf.mxu1 }
 0x422   :  { %v590_v53 = vpop.f32.mrf.mxu1 }
 0x42b   :  { %v645_v54 = vpop.f32.mrf.mxu0 }
 0x433   :  { %v647_v55 = vpop.f32.mrf.mxu0 }
 0x434   :  { %v607_v56 = vpop.f32.mrf.mxu2 }
 0x435   :  { %v649_v57 = vadd.f32 %v607_v56, %v588_v51 }
 0x43b   :  { %v758_v58 = vpop.f32.mrf.mxu0 }
 0x43c   :  { %v609_v59 = vpop.f32.mrf.mxu2  ;;  %v771_v5 = vsel %vm344_vm8, %v758_v58, -inf }
 0x443   :  { %v760_v60 = vpop.f32.mrf.mxu0 }
 0x444   :  { %v710_v61 = vpop.f32.mrf.mxu2 }
 0x445   :  { %v626_v62 = vpop.f32.mrf.mxu3  ;;  %v765_v63 = vsel %vm344_vm8, %v710_v61, -inf }
 0x446   :  { %v650_v0 = vadd.f32 %v649_v57, %v626_v62  ;;  %766 = vmax.xlane.f32.xlu1 %v765_v63  ;;  %v686_v1 = vpop.f32.mrf.mxu1 }
 0x447   :  { %v762_v2 = vsel %vm344_vm8, %v686_v1, -inf }
 0x448   :  { %v651_v3 = vadd.f32 %v650_v0, %v645_v54  ;;  %763 = vmax.xlane.f32.xlu2 %v762_v2 }
 0x44a   :  { %v966_v12 = vadd.f32 %v4655_v11, %v651_v3 }
 0x44c   :  { %v712_v50 = vpop.f32.mrf.mxu2  ;;  %v4659_v13 = vadd.f32 %v966_v12, %v4521_v43 }
 0x44d   :  { %v628_v4 = vpop.f32.mrf.mxu3 }
 0x44e   :  { %v688_v6 = vpop.f32.mrf.mxu1  ;;  %772 = vmax.xlane.f32.xlu1 %v771_v5  ;;  %v972_v15 = vsel %vm302_vm7, %v4659_v13, 0.0  ;;  %v987_v42 = vmul.f32 %v4659_v13, %v4659_v13 }
 0x450   :  { %v989_v44 = vsel %vm302_vm7, %v987_v42, 0.0 }
 0x455   :  { %v734_v7 = vpop.f32.mrf.mxu3 }
 0x456   :  { %v768_v9 = vsel %vm344_vm8, %v734_v7, -inf }
 0x457   :  { %769 = vmax.xlane.f32.xlu0 %v768_v9 }
 0x45d   :  { %v736_v10 = vpop.f32.mrf.mxu3 }
 0x467   :  { %831 = vrot.lane.b32.xlu1 %v4599_v14, %s4388_s1 }
 0x46b   :  { %852 = vrot.lane.b32.xlu0 %v4582_v52, %s4388_s1 }
 0x491   :  { %973 = vadd.xlane.f32.xlu1 %v972_v15 }
 0x4b9   :  { %v767_v16 = vpop.xlane.xlu1 %766 }
 0x4ba   :  { %v775_v17 = vsub.f32 %v710_v61, %v767_v16 }
 0x4bb   :  { %v764_v18 = vpop.xlane.xlu2 %763 }
 0x4bc   :  { %v780_v19 = vmul.f32 1.442695, %v775_v17  ;;  %v774_v23 = vsub.f32 %v686_v1, %v764_v18 }
 0x4be   :  { %4044 = vpow2.f32 %v780_v19  ;;  %v778_v14 = vmul.f32 1.442695, %v774_v23 }
 0x4c0   :  { %4046 = vpow2.f32 %v778_v14 }
 0x4c1   :  { %v773_v52 = vpop.xlane.xlu1 %772 }
 0x4c2   :  { %v777_v22 = vsub.f32 %v758_v58, %v773_v52 }
 0x4c4   :  { %v4045_v24 = vpop.eup %4044  ;;  %v784_v26 = vmul.f32 1.442695, %v777_v22 }
 0x4c5   :  { %v789_v28 = vsel %vm344_vm8, %v4045_v24, 0.0 }
 0x4c6   :  { %v4047_v43 = vpop.eup %4046  ;;  %4048 = vpow2.f32 %v784_v26  ;;  %790 = vadd.xlane.f32.xlu0 %v789_v28 }
 0x4c7   :  { %v786_v30 = vsel %vm344_vm8, %v4047_v43, 0.0 }
 0x4c8   :  { %787 = vadd.xlane.f32.xlu2 %v786_v30 }
 0x4ca   :  { %v770_v31 = vpop.xlane.xlu0 %769 }
 0x4cb   :  { %v776_v32 = vsub.f32 %v734_v7, %v770_v31  ;;  %v4401_v31 = vmov 32.0  }
 0x4cc   :  { %v4049_v33 = vpop.eup %4048 }
 0x4cd   :  { %v782_v34 = vmul.f32 1.442695, %v776_v32  ;;  %v795_v35 = vsel %vm344_vm8, %v4049_v33, 0.0 }
 0x4cf   :  { %4050 = vpow2.f32 %v782_v34 }
 0x4d0   :  { %796 = vadd.xlane.f32.xlu2 %v795_v35 }
 0x4d5   :  { %v4051_v36 = vpop.eup %4050 }
 0x4d6   :  { %v792_v37 = vsel %vm344_vm8, %v4051_v36, 0.0 }
 0x4d8   :  { %793 = vadd.xlane.f32.xlu2 %v792_v37  ;;  %v223_v37 = vld [vmem:[#allocation5 + $0x4] sm:$0x1] }
 0x4d9   :  { %v832_v38 = vpop.permute.xlu1 %831 }
 0x4da   :  { %v837_v39 = vsel %vm489_vm9, %v832_v38, 0  ;;  %873 = vrot.lane.b32.xlu0 %v4605_v20, %s4388_s1 }
 0x4db   :  { %846 = vmatpush.bf16.msra.mxu2 %v837_v39  ;;  %v221_v39 = vld [vmem:[#allocation5] sm:$0x1] }
 0x4dd   :  { %v853_v40 = vpop.permute.xlu0 %852 }
 0x4de   :  { %v858_v41 = vsel %vm489_vm9, %v853_v40, 0  ;;  %v224_v40 = vld [vmem:[#allocation5 + $0x6] sm:$0x1] }
 0x4df   :  { %924 = vmatpush.bf16.msrb.mxu2 %v4632_v29  ;;  %867 = vmatpush.bf16.msra.mxu3 %v858_v41  ;;  %v231_v41 = vld [vmem:[#allocation5 + $0x5] sm:$0x1] }
 0x4e3   :  { %940 = vmatpush.bf16.msrb.mxu3 %v4594_v8 }
 0x4f0   :  { %810 = vrot.lane.b32.xlu2 %v4607_v21, %s4388_s1 }
 0x519   :  { %990 = vadd.xlane.f32.xlu2 %v989_v44  ;;  %v3959_v44 = vld [vmem:[#allocation7 + $0x8] sm:$0xff] }
 0x539   :  { %v791_v46 = vpop.xlane.xlu0 %790 }
 0x53a   :  { %4052 = vrcp.f32 %v791_v46  ;;  %v225_v46 = vld [vmem:[#allocation5 + $0x8] sm:$0x1] }
 0x53b   :  { %v788_v20 = vpop.xlane.xlu2 %787 }
 0x540   :  { %v4053_v47 = vpop.eup %4052 }
 0x541   :  { %v803_v29 = vmul.f32 %v4053_v47, %v4045_v24 }
 0x543   :  { %v807_v48 = vpack.c.bf16 %v803_v29, %v803_v29  ;;  %v797_v49 = vpop.xlane.xlu2 %796  ;;  %v247_v29 = vrot.slane %v223_v37, 6 }
 0x544   :  { %4054 = vrcp.f32 %v797_v49  ;;  %v974_v49 = vpop.xlane.xlu1 %973 }
 0x545   :  { %3749 = vmatmul.msk.bf16.vlgmr.msra.gmra.mxu2 %vm344_vm8, %v807_v48  ;;  %4056 = vrcp.f32 %v788_v20  ;;  %v229_v20 = vld [vmem:[#allocation5 + $0x1] sm:$0x1] }
 0x546   :  { %1097 = vmatpush.bf16.msra.mxu2 %v3959_v44 }
 0x54a   :  { %v4055_v8 = vpop.eup %4054 }
 0x54b   :  { %v805_v51 = vmul.f32 %v4055_v8, %v4049_v33  ;;  %v794_v21 = vpop.xlane.xlu2 %793  ;;  %v4057_v55 = vpop.eup %4056  ;;  %v226_v8 = vld [vmem:[#allocation5 + $0xa] sm:$0x1] }
 0x54c   :  { %4058 = vrcp.f32 %v794_v21  ;;  %v874_v53 = vpop.permute.xlu0 %873  ;;  %v802_v58 = vmul.f32 %v4057_v55, %v4047_v43  ;;  %v233_v21 = vld [vmem:[#allocation5 + $0x9] sm:$0x1] }
 0x54d   :  { %v879_v54 = vsel %vm489_vm9, %v874_v53, 0  ;;  %v809_v56 = vpack.c.bf16 %v805_v51, %v805_v51  ;;  %4060 = vrcp.f32 %v4401_v31  ;;  %v232_v51 = vld [vmem:[#allocation5 + $0x7] sm:$0x1]  ;;  %v227_v53 = vld [vmem:[#allocation5 + $0xc] sm:$0x1] }
 0x54e   :  { %888 = vmatpush.bf16.msrb.mxu0 %v879_v54  ;;  %v806_v63 = vpack.c.bf16 %v802_v58, %v802_v58  ;;  %v234_v54 = vld [vmem:[#allocation5 + $0xb] sm:$0x1]  ;;  %v228_v58 = vld [vmem:[#allocation5 + $0xe] sm:$0x1] }
 0x551   :  { %3751 = vmatmul.msk.bf16.vlgmr.msrb.gmra.mxu0 %vm344_vm8, %v809_v56  ;;  %v249_v56 = vrot.slane %v224_v40, 5 }
 0x552   :  { %956 = vmatpush.bf16.msra.mxu0 %v4625_v27  ;;  %v4059_v57 = vpop.eup %4058 }
 0x553   :  { %v804_v59 = vmul.f32 %v4059_v57, %v4051_v36  ;;  %v811_v60 = vpop.permute.xlu2 %810  ;;  %v4061_v32 = vpop.eup %4060  ;;  %v230_v36 = vld [vmem:[#allocation5 + $0x3] sm:$0x1]  ;;  %v251_v57 = vrot.slane %v225_v46, 4 }
 0x554   :  { %v816_v61 = vsel %vm489_vm9, %v811_v60, 0  ;;  %v979_v33 = vmul.f32 32.0, %v4061_v32  ;;  %vm983_vm10 = vweird.f32 %v4061_v32  ;;  %v268_v42 = vrot.slane %v230_v36, 7 }
 0x555   :  { %v808_v62 = vpack.c.bf16 %v804_v59, %v804_v59  ;;  %825 = vmatpush.bf16.msra.mxu1 %v816_v61  ;;  %v235_v59 = vld [vmem:[#allocation5 + $0xd] sm:$0x1]  ;;  %v253_v60 = vrot.slane %v226_v8, 3  ;;  %v255_v61 = vrot.slane %v227_v53, 2 }
 0x556   :  { %v980_v34 = vsub.f32 1.0, %v979_v33 }
 0x557   :  { %3750 = vmatmul.msk.bf16.vlgmr.msra.gmra.mxu3 %vm344_vm8, %v808_v62  ;;  %v269_v62 = vsel %vm177_vm0, %v268_v42, %v229_v20 }
 0x558   :  { %3748 = vmatmul.msk.bf16.vlgmr.msra.gmra.mxu1 %vm344_vm8, %v806_v63 }
 0x559   :  { %908 = vmatpush.bf16.msrb.mxu1 %v4618_v25 }
 0x5c8   :  { %v848_v0 = vpop.f32.mrf.mxu2 }
 0x5c9   :  { %v895_v1 = vpack.c.bf16 %v848_v0, %v848_v0  ;;  %v991_v0 = vpop.xlane.xlu2 %990 }
 0x5cb   :  { %3753 = vmatmul.msk.bf16.vlgmr.msrb.gmra.mxu2 %vm344_vm8, %v895_v1  ;;  %v3958_v1 = vld [vmem:[#allocation7] sm:$0xff] }
 0x5cc   :  { %1098 = vmatpush.bf16.msra.mxu2 %v3958_v1 }
 0x5ce   :  { %v890_v27 = vpop.f32.mrf.mxu0 }
 0x5cf   :  { %v897_v2 = vpack.c.bf16 %v890_v27, %v890_v27  ;;  %v236_v27 = vld [vmem:[#allocation5 + $0xf] sm:$0x1] }
 0x5d0   :  { %v850_v3 = vpop.f32.mrf.mxu2 }
 0x5d1   :  { %3755 = vmatmul.msk.bf16.vlgmr.msra.gmra.mxu0 %vm344_vm8, %v897_v2  ;;  %v270_v3 = vrot.slane %v231_v41, 6 }
 0x5d5   :  { %v827_v50 = vpop.f32.mrf.mxu1 }
 0x5d6   :  { %v894_v4 = vpack.c.bf16 %v827_v50, %v827_v50  ;;  %v892_v5 = vpop.f32.mrf.mxu0  ;;  %v272_v50 = vrot.slane %v232_v51, 5  ;;  %v4003_v51 = vld [vmem:[#allocation11 + $0x7] ss:$0 sm:$0xff] }
 0x5d7   :  { %v257_v5 = vrot.slane %v228_v58, 1  ;;  %v4004_v58 = vld [vmem:[#allocation11 + $0x8] ss:$0 sm:$0xff] }
 0x5d8   :  { %3752 = vmatmul.msk.bf16.vlgmr.msrb.gmra.mxu1 %vm344_vm8, %v894_v4 }
 0x5da   :  { %v869_v6 = vpop.f32.mrf.mxu3 }
 0x5db   :  { %v896_v25 = vpack.c.bf16 %v869_v6, %v869_v6  ;;  %v274_v6 = vrot.slane %v233_v21, 4 }
 0x5dd   :  { %v829_v7 = vpop.f32.mrf.mxu1  ;;  %3754 = vmatmul.msk.bf16.vlgmr.msrb.gmra.mxu3 %vm344_vm8, %v896_v25  ;;  %v276_v25 = vrot.slane %v234_v54, 3 }
 0x5e2   :  { %v871_v9 = vpop.f32.mrf.mxu3 }
 0x5e3   :  { %v271_v9 = vsel %vm180_vm1, %v270_v3, %v269_v62  ;;  %v4005_v62 = vld [vmem:[#allocation11 + $0x3] ss:$0 sm:$0xff] }
 0x64e   :  { %v926_v10 = vpop.f32.mrf.mxu2  ;;  %v958_v12 = vpop.f32.mrf.mxu0 }
 0x655   :  { %v910_v15 = vpop.f32.mrf.mxu1 }
 0x656   :  { %v928_v16 = vpop.f32.mrf.mxu2  ;;  %v960_v17 = vpop.f32.mrf.mxu0  ;;  %v962_v19 = vadd.f32 %v926_v10, %v910_v15  ;;  %v278_v10 = vrot.slane %v235_v59, 2 }
 0x657   :  { %v273_v16 = vsel %vm183_vm2, %v272_v50, %v271_v9  ;;  %v280_v17 = vrot.slane %v236_v27, 1  ;;  %v4006_v27 = vld [vmem:[#allocation11 + $0x2] ss:$0 sm:$0xff] }
 0x65d   :  { %v912_v18 = vpop.f32.mrf.mxu1 }
 0x65e   :  { %v275_v18 = vsel %vm186_vm3, %v274_v6, %v273_v16 }
 0x660   :  { %v942_v23 = vpop.f32.mrf.mxu3 }
 0x661   :  { %v963_v14 = vadd.f32 %v962_v19, %v942_v23 }
 0x663   :  { %v964_v52 = vadd.f32 %v963_v14, %v958_v12  ;;  %v277_v14 = vsel %vm189_vm4, %v276_v25, %v275_v18 }
 0x665   :  { %v967_v22 = vadd.f32 %v4655_v11, %v964_v52  ;;  %v981_v11 = vmul.f32 %v4061_v32, %v980_v34  ;;  %v279_v52 = vsel %vm192_vm5, %v278_v10, %v277_v14 }
 0x667   :  { %v4692_v24 = vadd.f32 %v967_v22, %v4525_v45  ;;  %v982_v35 = vadd.f32 %v4061_v32, %v981_v11  ;;  %v222_v45 = vld [vmem:[#allocation5 + $0x2] sm:$0x1] }
 0x668   :  { %v944_v26 = vpop.f32.mrf.mxu3  ;;  %v245_v38 = vrot.slane %v222_v45, 7 }
 0x669   :  { %v975_v28 = vsel %vm302_vm7, %v4692_v24, 0.0  ;;  %v988_v43 = vmul.f32 %v4692_v24, %v4692_v24  ;;  %v4700_v48 = vsel %vm983_vm10, %v4061_v32, %v982_v35  ;;  %v281_v26 = vsel %vm195_vm6, %v280_v17, %v279_v52  ;;  %v3956_v32 = vld [vmem:[%s5295_s4] sm:$0xff] }
 0x66a   :  { %976 = vadd.xlane.f32.xlu0 %v975_v28  ;;  %v246_v47 = vsel %vm177_vm0, %v245_v38, %v221_v39  ;;  %v985_v63 = vmul.f32 %v4700_v48, %v974_v49  ;;  %v995_v12 = vmul.f32 %v991_v0, %v4700_v48  ;;  %vm1894_vm10 = vcmask 523264  }
 0x66b   :  { %v992_v30 = vsel %vm302_vm7, %v988_v43, 0.0  ;;  %v248_v55 = vsel %vm180_vm1, %v247_v29, %v246_v47 }
 0x66c   :  { %993 = vadd.xlane.f32.xlu1 %v992_v30  ;;  %v250_v2 = vsel %vm183_vm2, %v249_v56, %v248_v55  ;;  %v997_v19 = vmul.f32 %v985_v63, %v985_v63  ;;  %v3957_v30 = vld [vmem:[%s5295_s4 + $0x8] sm:$0xff]  ;;  %v1001_v49 = vsub.f32 %v4659_v13, %v985_v63 }
 0x66d   :  { %v252_v4 = vsel %vm186_vm3, %v251_v57, %v250_v2  ;;  %1061 = vmatpush.bf16.msra.mxu1 %v3957_v30 }
 0x66e   :  { %v254_v7 = vsel %vm189_vm4, %v253_v60, %v252_v4  ;;  %v999_v22 = vsub.f32 %v995_v12, %v997_v19 }
 0x66f   :  { %v256_v15 = vsel %vm192_vm5, %v255_v61, %v254_v7 }
 0x670   :  { %v258_v23 = vsel %vm195_vm6, %v257_v5, %v256_v15  ;;  %v1003_v43 = vadd.f32 1e-05, %v999_v22 }
 0x671   :  { %v4717_v28 = vpack.c.bf16 %v281_v26, %v258_v23  ;;  %1062 = vmatpush.bf16.msra.mxu1 %v3956_v32 }
 0x672   :  { %4062 = vrsqrt.f32 %v1003_v43  ;;  %vm1011_vm12 = vweird.f32 %v1003_v43 }
 0x673   :  { %3773 = vmatmul.msk.bf16.vlgmr.msra.gmra.mxu2 %vm302_vm7, %v4717_v28 }
 0x678   :  { %v4063_v31 = vpop.eup %4062 }
 0x679   :  { %v1006_v33 = vmul.f32 %v4063_v31, %v1003_v43  ;;  %vm1012_vm11 = vweird.f32 %v4063_v31 }
 0x67a   :  { %vm1013_vm13 = vmor %vm1011_vm12, %vm1012_vm11 }
 0x67b   :  { %v1007_v37 = vmul.f32 %v4063_v31, %v1006_v33 }
 0x67d   :  { %v1008_v40 = vmul.f32 0.5, %v1007_v37 }
 0x67f   :  { %v1009_v41 = vsub.f32 1.5, %v1008_v40 }
 0x681   :  { %v1010_v44 = vmul.f32 %v4063_v31, %v1009_v41 }
 0x683   :  { %v1014_v47 = vsel %vm1013_vm13, %v4063_v31, %v1010_v44 }
 0x684   :  { %v1025_v21 = vmul.f32 %v1014_v47, %v1001_v49 }
 0x686   :  { %v1028_v56 = vmul.f32 %v4003_v51, %v1025_v21 }
 0x688   :  { %v4731_v60 = vadd.f32 %v4004_v58, %v1028_v56 }
 0x6dd   :  { %v977_v34 = vpop.xlane.xlu0 %976 }
 0x6de   :  { %v986_v11 = vmul.f32 %v4700_v48, %v977_v34 }
 0x6df   :  { %v994_v35 = vpop.xlane.xlu1 %993 }
 0x6e0   :  { %v998_v45 = vmul.f32 %v986_v11, %v986_v11  ;;  %v996_v36 = vmul.f32 %v994_v35, %v4700_v48  ;;  %v1002_v54 = vsub.f32 %v4692_v24, %v986_v11 }
 0x6e2   :  { %v1000_v38 = vsub.f32 %v996_v36, %v998_v45 }
 0x6e4   :  { %v1004_v39 = vadd.f32 1e-05, %v1000_v38 }
 0x6e6   :  { %4064 = vrsqrt.f32 %v1004_v39  ;;  %vm1021_vm15 = vweird.f32 %v1004_v39 }
 0x6ec   :  { %v4065_v42 = vpop.eup %4064 }
 0x6ed   :  { %v1016_v46 = vmul.f32 %v4065_v42, %v1004_v39  ;;  %vm1022_vm14 = vweird.f32 %v4065_v42 }
 0x6ee   :  { %vm1023_vm0 = vmor %vm1021_vm15, %vm1022_vm14 }
 0x6ef   :  { %v1017_v20 = vmul.f32 %v4065_v42, %v1016_v46 }
 0x6f1   :  { %v1018_v29 = vmul.f32 0.5, %v1017_v20 }
 0x6f3   :  { %v1019_v8 = vsub.f32 1.5, %v1018_v29 }
 0x6f5   :  { %v1020_v53 = vmul.f32 %v4065_v42, %v1019_v8 }
 0x6f6   :  { %v1100_v63 = vpop.f32.mrf.mxu2 }
 0x6f7   :  { %v1024_v55 = vsel %vm1023_vm0, %v4065_v42, %v1020_v53  ;;  %v1101_v0 = vadd.f32 %v4005_v62, %v1100_v63 }
 0x6f8   :  { %v1026_v57 = vmul.f32 %v1024_v55, %v1002_v54 }
 0x6f9   :  { %1131 = vrot.lane.b32.xlu0 %v1101_v0, %s4397_s18  ;;  %v1134_v24 = vpack.c.bf16 %v1101_v0, %v1101_v0  ;;  %1125 = vrot.lane.b32.xlu2 %v1101_v0, %s4398_s23 }
 0x6fa   :  { %v1029_v59 = vmul.f32 %v4003_v51, %v1026_v57 }
 0x6fb   :  { %v1142_v1 = vsel %vm344_vm8, %v1134_v24, 0  ;;  %v1263_v38 = vunpack.c.l.b16 %v1134_v24 }
 0x6fc   :  { %v4733_v61 = vadd.f32 %v4004_v58, %v1029_v59  ;;  %1151 = vmatpush.bf16.xpose.msra.mxu3 %v1142_v1 }
 0x6fd   :  { %v1264_v40 = vpack.c.b16 %v1263_v38, %v1263_v38  ;;  %v1106_v38 = vld [vmem:[#allocation8 + $0x4] sm:$0xf] }
 0x6fe   :  { %v1037_v13 = vpack.c.bf16 %v4733_v61, %v4731_v60  ;;  %v1102_v30 = vpop.f32.mrf.mxu2 }
 0x6ff   :  { %v1103_v42 = vadd.f32 %v4005_v62, %v1102_v30 }
 0x700   :  { %3764 = vmatmul.msk.bf16.vlgmr.msra.gmra.mxu1 %vm302_vm7, %v1037_v13 }
 0x701   :  { %1128 = vrot.lane.b32.xlu0 %v1101_v0, %s4399_s24 }
 0x753   :  { %v1126_v4 = vpop.permute.xlu2 %1125 }
 0x754   :  { %v4746_v5 = vpack.c.bf16 %v1126_v4, %v1126_v4 }
 0x756   :  { %v1161_v6 = vsel %vm344_vm8, %v4746_v5, 0 }
 0x757   :  { %1170 = vmatpush.bf16.xpose.msrb.mxu0 %v1161_v6  ;;  %v1105_v6 = vld [vmem:[#allocation8] sm:$0xf] }
 0x76b   :  { %v1132_v25 = vpop.permute.xlu0 %1131 }
 0x76c   :  { %v1137_v7 = vpack.c.bf16 %v1132_v25, %v1132_v25  ;;  %v4781_v25 = vsel %vm489_vm9, %v1105_v6, 0 }
 0x76e   :  { %v1199_v9 = vsel %vm344_vm8, %v1137_v7, 0  ;;  %v1335_v39 = vunpack.c.l.b16 %v1137_v7  ;;  %v1287_v7 = vunpack.c.l.b16 %v4746_v5 }
 0x76f   :  { %1208 = vmatpush.bf16.xpose.msrb.mxu2 %v1199_v9 }
 0x770   :  { %v1336_v41 = vpack.c.b16 %v1335_v39, %v1335_v39  ;;  %v1288_v9 = vpack.c.b16 %v1287_v7, %v1287_v7 }
 0x773   :  { %v1129_v10 = vpop.permute.xlu0 %1128 }
 0x774   :  { %v1136_v12 = vpack.c.bf16 %v1129_v10, %v1129_v10 }
 0x776   :  { %v1180_v15 = vsel %vm344_vm8, %v1136_v12, 0  ;;  %v1311_v8 = vunpack.c.l.b16 %v1136_v12 }
 0x777   :  { %1189 = vmatpush.bf16.xpose.msrb.mxu1 %v1180_v15 }
 0x778   :  { %v1312_v51 = vpack.c.b16 %v1311_v8, %v1311_v8 }
 0x77d   :  { %v1064_v2 = vpop.f32.mrf.mxu1 }
 0x77e   :  { %v1065_v3 = vadd.f32 %v4006_v27, %v1064_v2 }
 0x780   :  { %v1120_v50 = vpack.c.bf16 %v1065_v3, %v1065_v3  ;;  %1114 = vrot.lane.b32.xlu0 %v1065_v3, %s4399_s24  ;;  %1117 = vrot.lane.b32.xlu1 %v1065_v3, %s4397_s18 }
 0x782   :  { %3774 = vmatmul.msk.bf16.vlgmr.msra.gmra.mxu3 %vm344_vm8, %v1120_v50 }
 0x785   :  { %v1066_v43 = vpop.f32.mrf.mxu1 }
 0x786   :  { %v4763_v44 = vadd.f32 %v4006_v27, %v1066_v43 }
 0x788   :  { %1111 = vrot.lane.b32.xlu1 %v1065_v3, %s4398_s23 }
 0x7f2   :  { %v1115_v16 = vpop.permute.xlu0 %1114  ;;  %v1118_v17 = vpop.permute.xlu1 %1117 }
 0x7f3   :  { %v1122_v18 = vpack.c.bf16 %v1115_v16, %v1115_v16  ;;  %v1123_v19 = vpack.c.bf16 %v1118_v17, %v1118_v17  ;;  %v4788_v16 = vpack.c.bf16 %v1103_v42, %v1103_v42 }
 0x7f5   :  { %3776 = vmatmul.msk.bf16.vlgmr.msrb.gmra.mxu1 %vm344_vm8, %v1122_v18  ;;  %3777 = vmatmul.msk.bf16.vlgmr.msrb.gmra.mxu2 %vm344_vm8, %v1123_v19  ;;  %v1473_v18 = vsel %vm344_vm8, %v4788_v16, 0 }
 0x7fa   :  { %v1112_v23 = vpop.permute.xlu1 %1111 }
 0x7fb   :  { %v1121_v14 = vpack.c.bf16 %v1112_v23, %v1112_v23  ;;  %v1107_v23 = vld [vmem:[#allocation8 + $0x8] sm:$0xf] }
 0x7fd   :  { %3775 = vmatmul.msk.bf16.vlgmr.msrb.gmra.mxu0 %vm344_vm8, %v1121_v14  ;;  %v4795_v14 = vsel %vm489_vm9, %v1107_v23, 0 }
 0x805   :  { %v1153_v52 = vpop.f32.mrf.mxu3 }
 0x806   :  { %v1214_v22 = vsel %vm344_vm8, %v1153_v52, -inf }
 0x807   :  { %1215 = vmax.xlane.f32.xlu1 %v1214_v22 }
 0x80d   :  { %v1155_v26 = vpop.f32.mrf.mxu3 }
 0x872   :  { %v1191_v31 = vpop.f32.mrf.mxu1 }
 0x873   :  { %v1220_v32 = vsel %vm344_vm8, %v1191_v31, -inf }
 0x874   :  { %1221 = vmax.xlane.f32.xlu1 %v1220_v32 }
 0x878   :  { %v1210_v33 = vpop.f32.mrf.mxu2 }
 0x879   :  { %v1223_v34 = vsel %vm344_vm8, %v1210_v33, -inf }
 0x87a   :  { %v1193_v11 = vpop.f32.mrf.mxu1  ;;  %1224 = vmax.xlane.f32.xlu0 %v1223_v34  ;;  %v1172_v35 = vpop.f32.mrf.mxu0 }
 0x87b   :  { %v1217_v45 = vsel %vm344_vm8, %v1172_v35, -inf  ;;  %v1216_v46 = vpop.xlane.xlu1 %1215 }
 0x87c   :  { %1218 = vmax.xlane.f32.xlu2 %v1217_v45  ;;  %v1226_v20 = vsub.f32 %v1153_v52, %v1216_v46  ;;  %v1108_v52 = vld [vmem:[#allocation8 + $0xc] sm:$0xf] }
 0x87d   :  { %v4799_v22 = vsel %vm489_vm9, %v1108_v52, 0 }
 0x87e   :  { %v1230_v47 = vmul.f32 1.442695, %v1226_v20 }
 0x880   :  { %v1212_v36 = vpop.f32.mrf.mxu2  ;;  %4066 = vpow2.f32 %v1230_v47  ;;  %v4811_v47 = vsel %vm489_vm9, %v1106_v38, 0 }
 0x882   :  { %v1174_v37 = vpop.f32.mrf.mxu0 }
 0x886   :  { %v4067_v29 = vpop.eup %4066 }
 0x887   :  { %v1238_v49 = vsel %vm344_vm8, %v4067_v29, 0.0 }
 0x88d   :  { %1265 = vrot.lane.b32.xlu1 %v1264_v40, %s4400_s9 }
 0x88e   :  { %1337 = vrot.lane.b32.xlu0 %v1336_v41, %s4400_s9 }
 0x895   :  { %1462 = vrot.lane.b32.xlu1 %v1103_v42, %s4397_s18 }
 0x89d   :  { %1456 = vrot.lane.b32.xlu1 %v1103_v42, %s4398_s23 }
 0x8a5   :  { %1442 = vrot.lane.b32.xlu1 %v4763_v44, %s4398_s23 }
 0x8b8   :  { %1239 = vadd.xlane.f32.xlu0 %v1238_v49 }
 0x8cc   :  { %1313 = vrot.lane.b32.xlu0 %v1312_v51, %s4400_s9 }
 0x8d4   :  { %1448 = vrot.lane.b32.xlu0 %v4763_v44, %s4397_s18 }
 0x8dc   :  { %1459 = vrot.lane.b32.xlu0 %v1103_v42, %s4399_s24 }
 0x8e7   :  { %v1222_v21 = vpop.xlane.xlu1 %1221 }
 0x8e8   :  { %v1228_v55 = vsub.f32 %v1191_v31, %v1222_v21 }
 0x8ea   :  { %v1234_v57 = vmul.f32 1.442695, %v1228_v55 }
 0x8ed   :  { %v1225_v58 = vpop.xlane.xlu0 %1224 }
 0x8ee   :  { %v1229_v13 = vsub.f32 %v1210_v33, %v1225_v58 }
 0x8ef   :  { %v1219_v53 = vpop.xlane.xlu2 %1218 }
 0x8f0   :  { %v1227_v54 = vsub.f32 %v1172_v35, %v1219_v53  ;;  %v1236_v63 = vmul.f32 1.442695, %v1229_v13 }
 0x8f2   :  { %v1232_v56 = vmul.f32 1.442695, %v1227_v54 }
 0x8f4   :  { %4068 = vpow2.f32 %v1232_v56 }
 0x8f5   :  { %4070 = vpow2.f32 %v1234_v57  ;;  %v1451_v57 = vpack.c.bf16 %v4763_v44, %v4763_v44 }
 0x8f6   :  { %4072 = vpow2.f32 %v1236_v63 }
 0x8fa   :  { %v4772_v59 = vpop.eup %4068 }
 0x8fb   :  { %v1241_v62 = vsel %vm344_vm8, %v4772_v59, 0.0  ;;  %v4071_v27 = vpop.eup %4070 }
 0x8fc   :  { %1242 = vadd.xlane.f32.xlu2 %v1241_v62  ;;  %v1244_v3 = vsel %vm344_vm8, %v4071_v27, 0.0  ;;  %v4073_v50 = vpop.eup %4072 }
 0x8fd   :  { %v1247_v4 = vsel %vm344_vm8, %v4073_v50, 0.0 }
 0x8ff   :  { %v1266_v0 = vpop.permute.xlu1 %1265 }
 0x900   :  { %v1271_v24 = vsel %vm489_vm9, %v1266_v0, 0  ;;  %v1338_v1 = vpop.permute.xlu0 %1337 }
 0x901   :  { %v1343_v2 = vsel %vm489_vm9, %v1338_v1, 0  ;;  %1280 = vmatpush.bf16.msrb.mxu3 %v1271_v24 }
 0x902   :  { %1352 = vmatpush.bf16.msra.mxu2 %v1343_v2 }
 0x904   :  { %1245 = vadd.xlane.f32.xlu2 %v1244_v3 }
 0x905   :  { %1375 = vmatpush.bf16.msra.mxu3 %v4781_v25 }
 0x906   :  { %1432 = vmatpush.bf16.msrb.mxu2 %v4799_v22 }
 0x907   :  { %v1463_v31 = vpop.permute.xlu1 %1462 }
 0x908   :  { %v4808_v42 = vpack.c.bf16 %v1463_v31, %v1463_v31 }
 0x90a   :  { %v1530_v21 = vsel %vm344_vm8, %v4808_v42, 0 }
 0x90c   :  { %1248 = vadd.xlane.f32.xlu2 %v1247_v4 }
 0x90f   :  { %v1457_v39 = vpop.permute.xlu1 %1456 }
 0x917   :  { %v1443_v3 = vpop.permute.xlu1 %1442 }
 0x924   :  { %1289 = vrot.lane.b32.xlu2 %v1288_v9, %s4400_s9 }
 0x92b   :  { %v1240_v10 = vpop.xlane.xlu0 %1239 }
 0x92c   :  { %4074 = vrcp.f32 %v1240_v10  ;;  %1445 = vrot.lane.b32.xlu2 %v4763_v44, %s4399_s24 }
 0x932   :  { %v4075_v12 = vpop.eup %4074 }
 0x933   :  { %v1254_v15 = vmul.f32 %v4075_v12, %v4067_v29  ;;  %v4813_v29 = vpack.c.bf16 %v1457_v39, %v1457_v39 }
 0x935   :  { %v1258_v17 = vpack.c.bf16 %v1254_v15, %v1254_v15  ;;  %v1492_v53 = vsel %vm344_vm8, %v4813_v29, 0 }
 0x937   :  { %3778 = vmatmul.msk.bf16.vlgmr.msrb.gmra.mxu3 %vm344_vm8, %v1258_v17 }
 0x938   :  { %1482 = vmatpush.bf16.xpose.msrb.mxu3 %v1473_v18 }
 0x93e   :  { %v1314_v5 = vpop.permute.xlu0 %1313 }
 0x93f   :  { %v1319_v19 = vsel %vm489_vm9, %v1314_v5, 0 }
 0x940   :  { %1328 = vmatpush.bf16.msra.mxu1 %v1319_v19 }
 0x944   :  { %1413 = vmatpush.bf16.msrb.mxu1 %v4795_v14 }
 0x946   :  { %v1449_v43 = vpop.permute.xlu0 %1448 }
 0x947   :  { %v1454_v4 = vpack.c.bf16 %v1449_v43, %v1449_v43 }
 0x94e   :  { %v1460_v32 = vpop.permute.xlu0 %1459 }
 0x94f   :  { %v4802_v34 = vpack.c.bf16 %v1460_v32, %v1460_v32 }
 0x951   :  { %v1511_v37 = vsel %vm344_vm8, %v4802_v34, 0  ;;  %v1642_v38 = vunpack.c.l.b16 %v4802_v34 }
 0x953   :  { %v1643_v39 = vpack.c.b16 %v1642_v38, %v1642_v38 }
 0x96f   :  { %v1243_v26 = vpop.xlane.xlu2 %1242 }
 0x977   :  { %v1246_v30 = vpop.xlane.xlu2 %1245 }
 0x978   :  { %4076 = vrcp.f32 %v1246_v30 }
 0x979   :  { %4078 = vrcp.f32 %v1243_v26 }
 0x97e   :  { %v4077_v33 = vpop.eup %4076 }
 0x97f   :  { %v1256_v11 = vmul.f32 %v4077_v33, %v4071_v27  ;;  %v1249_v35 = vpop.xlane.xlu2 %1248  ;;  %v4079_v36 = vpop.eup %4078 }
 0x980   :  { %4080 = vrcp.f32 %v1249_v35  ;;  %v1255_v41 = vmul.f32 %v4079_v36, %v4772_v59 }
 0x981   :  { %v1260_v45 = vpack.c.bf16 %v1256_v11, %v1256_v11  ;;  %v1594_v11 = vunpack.c.l.b16 %v4788_v16  ;;  %v4841_v16 = vld [vmem:[#allocation11 + $0x4] ss:$0 sm:$0xff] }
 0x982   :  { %v1259_v51 = vpack.c.bf16 %v1255_v41, %v1255_v41 }
 0x983   :  { %3780 = vmatmul.msk.bf16.vlgmr.msra.gmra.mxu1 %vm344_vm8, %v1260_v45  ;;  %v1595_v36 = vpack.c.b16 %v1594_v11, %v1594_v11 }
 0x984   :  { %1520 = vmatpush.bf16.xpose.msra.mxu1 %v1511_v37 }
 0x986   :  { %v4081_v40 = vpop.eup %4080 }
 0x987   :  { %v1257_v46 = vmul.f32 %v4081_v40, %v4073_v50  ;;  %v1290_v20 = vpop.permute.xlu2 %1289  ;;  %v1452_v50 = vpack.c.bf16 %v1443_v3, %v1443_v3 }
 0x988   :  { %v1295_v49 = vsel %vm489_vm9, %v1290_v20, 0 }
 0x989   :  { %v1261_v8 = vpack.c.bf16 %v1257_v46, %v1257_v46  ;;  %1304 = vmatpush.bf16.msra.mxu0 %v1295_v49 }
 0x98b   :  { %3781 = vmatmul.msk.bf16.vlgmr.msra.gmra.mxu2 %vm344_vm8, %v1261_v8 }
 0x98c   :  { %1539 = vmatpush.bf16.xpose.msra.mxu2 %v1530_v21  ;;  %3779 = vmatmul.msk.bf16.vlgmr.msra.gmra.mxu0 %vm344_vm8, %v1259_v51 }
 0x98d   :  { %1394 = vmatpush.bf16.msrb.mxu0 %v4811_v47 }
 0x98f   :  { %v1446_v0 = vpop.permute.xlu2 %1445 }
 0x990   :  { %v1453_v27 = vpack.c.bf16 %v1446_v0, %v1446_v0 }
 0x991   :  { %1501 = vmatpush.bf16.xpose.msra.mxu0 %v1492_v53 }
 0x9ba   :  { %v1282_v54 = vpop.f32.mrf.mxu3 }
 0x9bb   :  { %v1358_v55 = vpack.c.bf16 %v1282_v54, %v1282_v54 }
 0x9bd   :  { %3782 = vmatmul.msk.bf16.vlgmr.msra.gmra.mxu3 %vm344_vm8, %v1358_v55 }
 0x9c2   :  { %v1284_v56 = vpop.f32.mrf.mxu3 }
 0x9cd   :  { %3786 = vmatmul.msk.bf16.vlgmr.msrb.gmra.mxu3 %vm344_vm8, %v1451_v57 }
 0xa00   :  { %v1330_v58 = vpop.f32.mrf.mxu1 }
 0xa01   :  { %v1360_v59 = vpack.c.bf16 %v1330_v58, %v1330_v58 }
 0xa03   :  { %3784 = vmatmul.msk.bf16.vlgmr.msrb.gmra.mxu1 %vm344_vm8, %v1360_v59 }
 0xa08   :  { %v1332_v13 = vpop.f32.mrf.mxu1 }
 0xa09   :  { %v1306_v62 = vpop.f32.mrf.mxu0 }
 0xa0a   :  { %v1359_v63 = vpack.c.bf16 %v1306_v62, %v1306_v62 }
 0xa0c   :  { %3783 = vmatmul.msk.bf16.vlgmr.msrb.gmra.mxu0 %vm344_vm8, %v1359_v63 }
 0xa0e   :  { %v1354_v24 = vpop.f32.mrf.mxu2 }
 0xa0f   :  { %v1361_v1 = vpack.c.bf16 %v1354_v24, %v1354_v24 }
 0xa11   :  { %v1308_v2 = vpop.f32.mrf.mxu0  ;;  %3785 = vmatmul.msk.bf16.vlgmr.msrb.gmra.mxu2 %vm344_vm8, %v1361_v1 }
 0xa13   :  { %3788 = vmatmul.msk.bf16.vlgmr.msra.gmra.mxu1 %vm344_vm8, %v1453_v27 }
 0xa16   :  { %v1356_v44 = vpop.f32.mrf.mxu2 }
 0xa1c   :  { %3787 = vmatmul.msk.bf16.vlgmr.msra.gmra.mxu0 %vm344_vm8, %v1452_v50 }
 0xa21   :  { %3789 = vmatmul.msk.bf16.vlgmr.msra.gmra.mxu2 %vm344_vm8, %v1454_v4 }
 0xa40   :  { %v1377_v6 = vpop.f32.mrf.mxu3 }
 0xa48   :  { %v1379_v7 = vpop.f32.mrf.mxu3 }
 0xa50   :  { %v1484_v9 = vpop.f32.mrf.mxu3 }
 0xa51   :  { %v1545_v10 = vsel %vm344_vm8, %v1484_v9, -inf }
 0xa52   :  { %1546 = vmax.xlane.f32.xlu0 %v1545_v10 }
 0xa58   :  { %v1486_v12 = vpop.f32.mrf.mxu3 }
 0xa80   :  { %v1415_v15 = vpop.f32.mrf.mxu1 }
 0xa88   :  { %v1417_v17 = vpop.f32.mrf.mxu1 }
 0xa89   :  { %v1396_v18 = vpop.f32.mrf.mxu0 }
 0xa8a   :  { %v1438_v5 = vadd.f32 %v1396_v18, %v1377_v6  ;;  %v1618_v6 = vunpack.c.l.b16 %v4813_v29 }
 0xa8c   :  { %v1439_v19 = vadd.f32 %v1438_v5, %v1415_v15  ;;  %v1619_v7 = vpack.c.b16 %v1618_v6, %v1618_v6 }
 0xa90   :  { %v1522_v23 = vpop.f32.mrf.mxu1 }
 0xa91   :  { %v1398_v52 = vpop.f32.mrf.mxu0  ;;  %v1551_v26 = vsel %vm344_vm8, %v1522_v23, -inf }
 0xa92   :  { %1552 = vmax.xlane.f32.xlu0 %v1551_v26 }
 0xa94   :  { %v1434_v43 = vpop.f32.mrf.mxu2 }
 0xa95   :  { %v1440_v49 = vadd.f32 %v1439_v19, %v1434_v43 }
 0xa97   :  { %v1761_v51 = vadd.f32 %v4841_v16, %v1440_v49 }
 0xa98   :  { %v1524_v30 = vpop.f32.mrf.mxu1 }
 0xa99   :  { %v1503_v31 = vpop.f32.mrf.mxu0  ;;  %v4846_v53 = vadd.f32 %v1761_v51, %v4731_v60 }
 0xa9a   :  { %v1548_v32 = vsel %vm344_vm8, %v1503_v31, -inf }
 0xa9b   :  { %1549 = vmax.xlane.f32.xlu2 %v1548_v32  ;;  %v1767_v34 = vsel %vm302_vm7, %v4846_v53, 0.0 }
 0xa9c   :  { %v1436_v33 = vpop.f32.mrf.mxu2 }
 0xaa1   :  { %v1505_v35 = vpop.f32.mrf.mxu0 }
 0xaa4   :  { %v1541_v45 = vpop.f32.mrf.mxu2 }
 0xaa5   :  { %v1554_v37 = vsel %vm344_vm8, %v1541_v45, -inf }
 0xaa6   :  { %1555 = vmax.xlane.f32.xlu1 %v1554_v37  ;;  %1596 = vrot.lane.b32.xlu0 %v1595_v36, %s4400_s9 }
 0xaac   :  { %v1543_v40 = vpop.f32.mrf.mxu2 }
 0xaae   :  { %1644 = vrot.lane.b32.xlu0 %v1643_v39, %s4400_s9 }
 0xac5   :  { %v1547_v41 = vpop.xlane.xlu0 %1546 }
 0xac6   :  { %v1557_v46 = vsub.f32 %v1484_v9, %v1547_v41 }
 0xac8   :  { %v1561_v20 = vmul.f32 1.442695, %v1557_v46 }
 0xaca   :  { %4082 = vpow2.f32 %v1561_v20 }
 0xad0   :  { %v4083_v8 = vpop.eup %4082 }
 0xad1   :  { %v1569_v21 = vsel %vm344_vm8, %v4083_v8, 0.0 }
 0xad2   :  { %1570 = vadd.xlane.f32.xlu2 %v1569_v21 }
 0xad8   :  { %1768 = vadd.xlane.f32.xlu0 %v1767_v34 }
 0xb05   :  { %v1553_v54 = vpop.xlane.xlu0 %1552 }
 0xb06   :  { %v1559_v57 = vsub.f32 %v1522_v23, %v1553_v54 }
 0xb08   :  { %v1565_v59 = vmul.f32 1.442695, %v1559_v57 }
 0xb0e   :  { %v1550_v55 = vpop.xlane.xlu2 %1549 }
 0xb0f   :  { %v1558_v56 = vsub.f32 %v1503_v31, %v1550_v55 }
 0xb11   :  { %v1563_v58 = vmul.f32 1.442695, %v1558_v56 }
 0xb13   :  { %4084 = vpow2.f32 %v1563_v58 }
 0xb14   :  { %4086 = vpow2.f32 %v1565_v59 }
 0xb18   :  { %v1597_v13 = vpop.permute.xlu0 %1596 }
 0xb19   :  { %v4085_v62 = vpop.eup %4084  ;;  %v1602_v63 = vsel %vm489_vm9, %v1597_v13, 0  ;;  %v1556_v0 = vpop.xlane.xlu1 %1555 }
 0xb1a   :  { %v1560_v24 = vsub.f32 %v1541_v45, %v1556_v0  ;;  %1611 = vmatpush.bf16.msra.mxu3 %v1602_v63  ;;  %v1572_v60 = vsel %vm344_vm8, %v4085_v62, 0.0  ;;  %v4087_v27 = vpop.eup %4086 }
 0xb1b   :  { %1573 = vadd.xlane.f32.xlu2 %v1572_v60  ;;  %v1575_v3 = vsel %vm344_vm8, %v4087_v27, 0.0 }
 0xb1c   :  { %v1567_v1 = vmul.f32 1.442695, %v1560_v24 }
 0xb1e   :  { %1703 = vmatpush.bf16.msrb.mxu3 %v4781_v25  ;;  %4088 = vpow2.f32 %v1567_v1  ;;  %v1666_v25 = vunpack.c.l.b16 %v4808_v42 }
 0xb20   :  { %v1645_v2 = vpop.permute.xlu0 %1644  ;;  %v1667_v9 = vpack.c.b16 %v1666_v25, %v1666_v25 }
 0xb21   :  { %v1650_v44 = vsel %vm489_vm9, %v1645_v2, 0 }
 0xb22   :  { %1659 = vmatpush.bf16.msrb.mxu1 %v1650_v44 }
 0xb23   :  { %1576 = vadd.xlane.f32.xlu2 %v1575_v3 }
 0xb24   :  { %v4089_v50 = vpop.eup %4088 }
 0xb25   :  { %v1578_v4 = vsel %vm344_vm8, %v4089_v50, 0.0 }
 0xb26   :  { %1735 = vmatpush.bf16.msra.mxu1 %v4795_v14  ;;  %1579 = vadd.xlane.f32.xlu1 %v1578_v4  ;;  %v1775_v14 = vmul.f32 %v4846_v53, %v4846_v53 }
 0xb28   :  { %v1777_v29 = vsel %vm302_vm7, %v1775_v14, 0.0 }
 0xb3b   :  { %1620 = vrot.lane.b32.xlu2 %v1619_v7, %s4400_s9  ;;  %v3960_v7 = vld [vmem:[#allocation10] sm:$0xff] }
 0xb3f   :  { %1668 = vrot.lane.b32.xlu1 %v1667_v9, %s4400_s9 }
 0xb45   :  { %v1571_v10 = vpop.xlane.xlu2 %1570 }
 0xb46   :  { %4090 = vrcp.f32 %v1571_v10 }
 0xb4b   :  { %v1769_v2 = vpop.xlane.xlu0 %1768 }
 0xb4c   :  { %v4091_v12 = vpop.eup %4090  ;;  %v1773_v3 = vmul.f32 %v1769_v2, %v4700_v48 }
 0xb4d   :  { %v1585_v15 = vmul.f32 %v4091_v12, %v4083_v8 }
 0xb4e   :  { %v1785_v4 = vmul.f32 %v1773_v3, %v1773_v3 }
 0xb4f   :  { %v1589_v17 = vpack.c.bf16 %v1585_v15, %v1585_v15 }
 0xb51   :  { %3790 = vmatmul.msk.bf16.vlgmr.msra.gmra.mxu3 %vm344_vm8, %v1589_v17 }
 0xb64   :  { %1778 = vadd.xlane.f32.xlu2 %v1777_v29 }
 0xb8e   :  { %v1574_v42 = vpop.xlane.xlu2 %1573 }
 0xb8f   :  { %4092 = vrcp.f32 %v1574_v42 }
 0xb95   :  { %v4093_v5 = vpop.eup %4092 }
 0xb96   :  { %v1577_v18 = vpop.xlane.xlu2 %1576  ;;  %v1586_v23 = vmul.f32 %v4093_v5, %v4085_v62 }
 0xb97   :  { %4094 = vrcp.f32 %v1577_v18 }
 0xb98   :  { %v1590_v31 = vpack.c.bf16 %v1586_v23, %v1586_v23 }
 0xb99   :  { %v1580_v32 = vpop.xlane.xlu1 %1579 }
 0xb9a   :  { %4096 = vrcp.f32 %v1580_v32  ;;  %v1789_v32 = vsub.f32 %v4846_v53, %v1773_v3  ;;  %v3965_v53 = vld [vmem:[%s5299_s8 + $0x18] sm:$0xff] }
 0xb9d   :  { %v4095_v19 = vpop.eup %4094 }
 0xb9e   :  { %v1587_v52 = vmul.f32 %v4095_v19, %v4087_v27  ;;  %v1621_v26 = vpop.permute.xlu2 %1620 }
 0xb9f   :  { %v1626_v43 = vsel %vm489_vm9, %v1621_v26, 0 }
 0xba0   :  { %v1591_v30 = vpack.c.bf16 %v1587_v52, %v1587_v52  ;;  %1635 = vmatpush.bf16.msrb.mxu0 %v1626_v43  ;;  %v4097_v33 = vpop.eup %4096 }
 0xba1   :  { %v1588_v11 = vmul.f32 %v4097_v33, %v4089_v50 }
 0xba2   :  { %3792 = vmatmul.msk.bf16.vlgmr.msrb.gmra.mxu1 %vm344_vm8, %v1591_v30 }
 0xba3   :  { %3791 = vmatmul.msk.bf16.vlgmr.msrb.gmra.mxu0 %vm344_vm8, %v1590_v31  ;;  %v1592_v36 = vpack.c.bf16 %v1588_v11, %v1588_v11  ;;  %v4008_v11 = vld [vmem:[#allocation11 + $0x9] ss:$0 sm:$0xff] }
 0xba4   :  { %1719 = vmatpush.bf16.msra.mxu0 %v4811_v47 }
 0xba8   :  { %1902 = vmatpush.bf16.msrb.mxu0 %v3965_v53 }
 0xbb1   :  { %v1669_v35 = vpop.permute.xlu1 %1668 }
 0xbb2   :  { %v1674_v45 = vsel %vm489_vm9, %v1669_v35, 0 }
 0xbb3   :  { %1683 = vmatpush.bf16.msrb.mxu2 %v1674_v45 }
 0xbb6   :  { %3793 = vmatmul.msk.bf16.vlgmr.msrb.gmra.mxu2 %vm344_vm8, %v1592_v36 }
 0xbb7   :  { %1751 = vmatpush.bf16.msra.mxu2 %v4799_v22 }
 0xbd4   :  { %v1613_v37 = vpop.f32.mrf.mxu3 }
 0xbd5   :  { %v1689_v38 = vpack.c.bf16 %v1613_v37, %v1613_v37 }
 0xbd7   :  { %3794 = vmatmul.msk.bf16.vlgmr.msrb.gmra.mxu3 %vm344_vm8, %v1689_v38  ;;  %v1779_v44 = vpop.xlane.xlu2 %1778  ;;  %v4009_v38 = vld [vmem:[#allocation11 + $0xa] ss:$0 sm:$0xff] }
 0xbd8   :  { %v1783_v50 = vmul.f32 %v1779_v44, %v4700_v48 }
 0xbda   :  { %v1787_v6 = vsub.f32 %v1783_v50, %v1785_v4 }
 0xbdc   :  { %v1615_v47 = vpop.f32.mrf.mxu3  ;;  %v1791_v25 = vadd.f32 1e-05, %v1787_v6  ;;  %v3967_v6 = vld [vmem:[%s5293_s2 + $0x18] sm:$0xff] }
 0xbdd   :  { %2000 = vmatpush.bf16.msrb.mxu1 %v3967_v6 }
 0xbde   :  { %4098 = vrsqrt.f32 %v1791_v25  ;;  %vm1799_vm2 = vweird.f32 %v1791_v25 }
 0xc1f   :  { %v1661_v39 = vpop.f32.mrf.mxu1 }
 0xc20   :  { %v1691_v40 = vpack.c.bf16 %v1661_v39, %v1661_v39  ;;  %v1637_v41 = vpop.f32.mrf.mxu0 }
 0xc21   :  { %v1690_v46 = vpack.c.bf16 %v1637_v41, %v1637_v41 }
 0xc22   :  { %3796 = vmatmul.msk.bf16.vlgmr.msra.gmra.mxu1 %vm344_vm8, %v1691_v40 }
 0xc23   :  { %3795 = vmatmul.msk.bf16.vlgmr.msra.gmra.mxu0 %vm344_vm8, %v1690_v46 }
 0xc27   :  { %v1663_v20 = vpop.f32.mrf.mxu1 }
 0xc28   :  { %v1639_v49 = vpop.f32.mrf.mxu0 }
 0xc29   :  { %v3964_v49 = vld [vmem:[%s5299_s8 + $0x10] sm:$0xff] }
 0xc2a   :  { %1903 = vmatpush.bf16.msrb.mxu0 %v3964_v49 }
 0xc39   :  { %v1685_v8 = vpop.f32.mrf.mxu2 }
 0xc3a   :  { %v1692_v51 = vpack.c.bf16 %v1685_v8, %v1685_v8  ;;  %v3963_v8 = vld [vmem:[%s5299_s8 + $0x8] sm:$0xff] }
 0xc3b   :  { %1904 = vmatpush.bf16.msrb.mxu0 %v3963_v8 }
 0xc3c   :  { %3797 = vmatmul.msk.bf16.vlgmr.msra.gmra.mxu2 %vm344_vm8, %v1692_v51  ;;  %v3962_v51 = vld [vmem:[%s5299_s8] sm:$0xff] }
 0xc3f   :  { %1905 = vmatpush.bf16.msrb.mxu0 %v3962_v51 }
 0xc41   :  { %v1687_v22 = vpop.f32.mrf.mxu2 }
 0xc5a   :  { %v1705_v21 = vpop.f32.mrf.mxu3 }
 0xc62   :  { %v1707_v34 = vpop.f32.mrf.mxu3 }
 0xc9f   :  { %v1737_v54 = vpop.f32.mrf.mxu1 }
 0xca0   :  { %v1721_v55 = vpop.f32.mrf.mxu0 }
 0xca1   :  { %v1757_v58 = vadd.f32 %v1721_v55, %v1705_v21  ;;  %v4010_v21 = vld [vmem:[#allocation11 + $0x5] ss:$0 sm:$0xff] }
 0xca3   :  { %v1758_v59 = vadd.f32 %v1757_v58, %v1737_v54 }
 0xca7   :  { %v1739_v56 = vpop.f32.mrf.mxu1 }
 0xca8   :  { %v1723_v57 = vpop.f32.mrf.mxu0 }
 0xcbf   :  { %v1753_v13 = vpop.f32.mrf.mxu2 }
 0xcc0   :  { %v1759_v62 = vadd.f32 %v1758_v59, %v1753_v13  ;;  %v4011_v59 = vld [vmem:[#allocation11 + $0x6] ss:$0 sm:$0xff] }
 0xcc2   :  { %v1762_v63 = vadd.f32 %v4841_v16, %v1759_v62  ;;  %v3961_v16 = vld [vmem:[#allocation10 + $0x8] sm:$0xff] }
 0xcc3   :  { %1849 = vmatpush.bf16.msra.mxu3 %v3961_v16  ;;  %v3966_v16 = vld [vmem:[%s5293_s2 + $0x10] sm:$0xff] }
 0xcc4   :  { %v1764_v0 = vadd.f32 %v1762_v63, %v4733_v61  ;;  %v4099_v61 = vpop.eup %4098  ;;  %2001 = vmatpush.bf16.msrb.mxu1 %v3966_v16 }
 0xcc5   :  { %v1794_v9 = vmul.f32 %v4099_v61, %v1791_v25  ;;  %vm1800_vm1 = vweird.f32 %v4099_v61 }
 0xcc6   :  { %v1770_v24 = vsel %vm302_vm7, %v1764_v0, 0.0  ;;  %v1776_v60 = vmul.f32 %v1764_v0, %v1764_v0  ;;  %vm1801_vm3 = vmor %vm1799_vm2, %vm1800_vm1 }
 0xcc7   :  { %v1755_v1 = vpop.f32.mrf.mxu2  ;;  %1771 = vadd.xlane.f32.xlu1 %v1770_v24  ;;  %1850 = vmatpush.bf16.msra.mxu3 %v3960_v7  ;;  %v1795_v29 = vmul.f32 %v4099_v61, %v1794_v9 }
 0xcc8   :  { %v1780_v27 = vsel %vm302_vm7, %v1776_v60, 0.0 }
 0xcc9   :  { %1781 = vadd.xlane.f32.xlu0 %v1780_v27  ;;  %v1796_v5 = vmul.f32 0.5, %v1795_v29 }
 0xccb   :  { %v1797_v19 = vsub.f32 1.5, %v1796_v5 }
 0xccd   :  { %v1798_v52 = vmul.f32 %v4099_v61, %v1797_v19 }
 0xccf   :  { %v1802_v30 = vsel %vm1801_vm3, %v4099_v61, %v1798_v52 }
 0xcd0   :  { %v1813_v35 = vmul.f32 %v1802_v30, %v1789_v32 }
 0xcd2   :  { %v1816_v47 = vmul.f32 %v4008_v11, %v1813_v35 }
 0xcd4   :  { %v1819_v41 = vadd.f32 %v4009_v38, %v1816_v47 }
 0xd3a   :  { %v1772_v10 = vpop.xlane.xlu1 %1771 }
 0xd3b   :  { %v1774_v12 = vmul.f32 %v1772_v10, %v4700_v48 }
 0xd3c   :  { %v1782_v15 = vpop.xlane.xlu0 %1781 }
 0xd3d   :  { %v1786_v17 = vmul.f32 %v1774_v12, %v1774_v12  ;;  %v1784_v14 = vmul.f32 %v1782_v15, %v4700_v48  ;;  %v1790_v36 = vsub.f32 %v1764_v0, %v1774_v12 }
 0xd3f   :  { %v1788_v42 = vsub.f32 %v1784_v14, %v1786_v17 }
 0xd41   :  { %v1792_v18 = vadd.f32 1e-05, %v1788_v42 }
 0xd43   :  { %4100 = vrsqrt.f32 %v1792_v18  ;;  %vm1809_vm5 = vweird.f32 %v1792_v18 }
 0xd49   :  { %v4101_v23 = vpop.eup %4100 }
 0xd4a   :  { %v1804_v26 = vmul.f32 %v4101_v23, %v1792_v18  ;;  %vm1810_vm4 = vweird.f32 %v4101_v23 }
 0xd4b   :  { %vm1811_vm6 = vmor %vm1809_vm5, %vm1810_vm4 }
 0xd4c   :  { %v1805_v43 = vmul.f32 %v4101_v23, %v1804_v26 }
 0xd4e   :  { %v1806_v31 = vmul.f32 0.5, %v1805_v43 }
 0xd50   :  { %v1807_v33 = vsub.f32 1.5, %v1806_v31 }
 0xd52   :  { %v1808_v45 = vmul.f32 %v4101_v23, %v1807_v33 }
 0xd54   :  { %v1812_v37 = vsel %vm1811_vm6, %v4101_v23, %v1808_v45 }
 0xd55   :  { %v1814_v39 = vmul.f32 %v1812_v37, %v1790_v36  ;;  %v4012_v36 = vld [vmem:[#allocation11 + $0xb] ss:$0 sm:$0xff] }
 0xd57   :  { %v1817_v40 = vmul.f32 %v4008_v11, %v1814_v39 }
 0xd59   :  { %v1820_v46 = vadd.f32 %v4009_v38, %v1817_v40 }
 0xd5b   :  { %v1825_v20 = vpack.c.bf16 %v1820_v46, %v1819_v41 }
 0xd5d   :  { %3806 = vmatmul.msk.bf16.vlgmr.msra.gmra.mxu3 %vm302_vm7, %v1825_v20 }
 0xde0   :  { %v1852_v22 = vpop.f32.mrf.mxu3 }
 0xde1   :  { %v1853_v34 = vadd.f32 %v4010_v21, %v1852_v22  ;;  %v4014_v22 = vld [vmem:[#allocation11 + $0x10] ss:$0 sm:$0xff] }
 0xde3   :  { %v1857_v56 = vmax.f32 %v1853_v34, 0.0 }
 0xde8   :  { %v1854_v54 = vpop.f32.mrf.mxu3 }
 0xde9   :  { %v1855_v55 = vadd.f32 %v4010_v21, %v1854_v54 }
 0xdeb   :  { %v1858_v57 = vmax.f32 %v1855_v55, 0.0 }
 0xded   :  { %v1867_v58 = vpack.c.bf16 %v1858_v57, %v1857_v56 }
 0xdef   :  { %3823 = vmatmul.msk.bf16.vlgmr.msrb.gmra.mxu0 %vm1894_vm10, %v1867_v58 }
 0xe6c   :  { %v1907_v13 = vpop.f32.mrf.mxu0 }
 0xe6d   :  { %v1908_v62 = vadd.f32 %v4011_v59, %v1907_v13 }
 0xe6f   :  { %v1912_v63 = vadd.f32 %v1908_v62, %v1819_v41  ;;  %v4013_v41 = vld [vmem:[#allocation11 + $0xc] ss:$0 sm:$0xff] }
 0xe71   :  { %v1916_v0 = vsel %vm302_vm7, %v1912_v63, 0.0  ;;  %v1924_v1 = vmul.f32 %v1912_v63, %v1912_v63 }
 0xe72   :  { %1917 = vadd.xlane.f32.xlu1 %v1916_v0 }
 0xe73   :  { %v1926_v44 = vsel %vm302_vm7, %v1924_v1, 0.0 }
 0xe74   :  { %v1909_v24 = vpop.f32.mrf.mxu0 }
 0xe75   :  { %v1910_v60 = vadd.f32 %v4011_v59, %v1909_v24 }
 0xe77   :  { %v1913_v27 = vadd.f32 %v1910_v60, %v1820_v46 }
 0xe79   :  { %v1919_v2 = vsel %vm302_vm7, %v1913_v27, 0.0  ;;  %v1925_v3 = vmul.f32 %v1913_v27, %v1913_v27 }
 0xe7a   :  { %1920 = vadd.xlane.f32.xlu0 %v1919_v2  ;;  %1927 = vadd.xlane.f32.xlu1 %v1926_v44 }
 0xe7b   :  { %v1929_v50 = vsel %vm302_vm7, %v1925_v3, 0.0 }
 0xe7c   :  { %1930 = vadd.xlane.f32.xlu2 %v1929_v50 }
 0xee5   :  { %v1918_v4 = vpop.xlane.xlu1 %1917 }
 0xee6   :  { %v1922_v25 = vmul.f32 %v1918_v4, %v4700_v48 }
 0xee8   :  { %v1934_v9 = vmul.f32 %v1922_v25, %v1922_v25  ;;  %v1938_v45 = vsub.f32 %v1912_v63, %v1922_v25 }
 0xeed   :  { %v1921_v61 = vpop.xlane.xlu0 %1920  ;;  %v1928_v7 = vpop.xlane.xlu1 %1927 }
 0xeee   :  { %v1923_v10 = vmul.f32 %v1921_v61, %v4700_v48  ;;  %v1932_v12 = vmul.f32 %v1928_v7, %v4700_v48 }
 0xeef   :  { %v1931_v15 = vpop.xlane.xlu2 %1930 }
 0xef0   :  { %v1935_v17 = vmul.f32 %v1923_v10, %v1923_v10  ;;  %v1936_v14 = vsub.f32 %v1932_v12, %v1934_v9  ;;  %v1933_v29 = vmul.f32 %v1931_v15, %v4700_v48  ;;  %v1939_v47 = vsub.f32 %v1913_v27, %v1923_v10 }
 0xef2   :  { %v1940_v42 = vadd.f32 1e-05, %v1936_v14  ;;  %v1937_v18 = vsub.f32 %v1933_v29, %v1935_v17 }
 0xef4   :  { %4102 = vrsqrt.f32 %v1940_v42  ;;  %v1941_v5 = vadd.f32 1e-05, %v1937_v18  ;;  %vm1948_vm12 = vweird.f32 %v1940_v42 }
 0xef6   :  { %4104 = vrsqrt.f32 %v1941_v5  ;;  %vm1958_vm15 = vweird.f32 %v1941_v5 }
 0xefa   :  { %v4103_v19 = vpop.eup %4102 }
 0xefb   :  { %v1943_v23 = vmul.f32 %v4103_v19, %v1940_v42  ;;  %vm1949_vm11 = vweird.f32 %v4103_v19 }
 0xefc   :  { %v4105_v52 = vpop.eup %4104  ;;  %vm1950_vm14 = vmor %vm1948_vm12, %vm1949_vm11 }
 0xefd   :  { %v1944_v26 = vmul.f32 %v4103_v19, %v1943_v23  ;;  %v1953_v43 = vmul.f32 %v4105_v52, %v1941_v5  ;;  %vm1959_vm13 = vweird.f32 %v4105_v52 }
 0xefe   :  { %vm1960_vm0 = vmor %vm1958_vm15, %vm1959_vm13 }
 0xeff   :  { %v1945_v30 = vmul.f32 0.5, %v1944_v26  ;;  %v1954_v31 = vmul.f32 %v4105_v52, %v1953_v43 }
 0xf01   :  { %v1946_v32 = vsub.f32 1.5, %v1945_v30  ;;  %v1955_v33 = vmul.f32 0.5, %v1954_v31 }
 0xf03   :  { %v1947_v11 = vmul.f32 %v4103_v19, %v1946_v32  ;;  %v1956_v35 = vsub.f32 1.5, %v1955_v33 }
 0xf05   :  { %v1951_v37 = vsel %vm1950_vm14, %v4103_v19, %v1947_v11  ;;  %v1957_v38 = vmul.f32 %v4105_v52, %v1956_v35 }
 0xf06   :  { %v1962_v39 = vmul.f32 %v1951_v37, %v1938_v45 }
 0xf07   :  { %v1961_v40 = vsel %vm1960_vm0, %v4105_v52, %v1957_v38 }
 0xf08   :  { %v1965_v46 = vmul.f32 %v4012_v36, %v1962_v39  ;;  %v1963_v20 = vmul.f32 %v1961_v40, %v1939_v47 }
 0xf0a   :  { %v1966_v53 = vmul.f32 %v4012_v36, %v1963_v20  ;;  %v4913_v49 = vadd.f32 %v4013_v41, %v1965_v46 }
 0xf0c   :  { %v4915_v8 = vadd.f32 %v4013_v41, %v1966_v53 }
 0xf0e   :  { %v1975_v51 = vpack.c.bf16 %v4915_v8, %v4913_v49 }
 0xf10   :  { %3836 = vmatmul.msk.bf16.vlgmr.msrb.gmra.mxu1 %vm302_vm7, %v1975_v51 }
 0xf8d   :  { %v2003_v21 = vpop.f32.mrf.mxu1 }
 0xf8e   :  { %v2004_v34 = vadd.f32 %v4014_v22, %v2003_v21 }
 0xf90   :  { %2021 = vrot.lane.b32.xlu2 %v2004_v34, %s4397_s18  ;;  %2018 = vrot.lane.b32.xlu1 %v2004_v34, %s4399_s24  ;;  %v2024_v54 = vpack.c.bf16 %v2004_v34, %v2004_v34 }
 0xf91   :  { %2015 = vrot.lane.b32.xlu0 %v2004_v34, %s4398_s23 }
 0xf92   :  { %v2029_v55 = vunpack.c.l.b16 %v2024_v54 }
 0xf94   :  { %v2030_v56 = vpack.c.b16 %v2029_v55, %v2029_v55 }
 0xf95   :  { %v2005_v12 = vpop.f32.mrf.mxu1 }
 0xf96   :  { %v2006_v29 = vadd.f32 %v4014_v22, %v2005_v12  ;;  %v3840_v12 = vld [vmem:[%s5294_s3 + $0x1c] sm:$0xf] }
 0xf98   :  { %v4949_v45 = vpack.c.bf16 %v2006_v29, %v2006_v29 }
 0xf99   :  { %2031 = vrot.lane.b32.xlu0 %v2030_v56, %s4400_s9 }
 0xf9a   :  { %v2354_v37 = vunpack.c.l.b16 %v4949_v45 }
 0xf9c   :  { %v4956_v39 = vpack.c.b16 %v2354_v37, %v2354_v37 }
 0xfea   :  { %v2022_v57 = vpop.permute.xlu2 %2021 }
 0xfeb   :  { %v2027_v58 = vpack.c.bf16 %v2022_v57, %v2022_v57 }
 0xfed   :  { %v2101_v59 = vunpack.c.l.b16 %v2027_v58 }
 0xfef   :  { %v2102_v13 = vpack.c.b16 %v2101_v59, %v2101_v59 }
 0xff1   :  { %2103 = vrot.lane.b32.xlu2 %v2102_v13, %s4400_s9 }
0x1002   :  { %v2019_v62 = vpop.permute.xlu1 %2018 }
0x1003   :  { %v2026_v63 = vpack.c.bf16 %v2019_v62, %v2019_v62  ;;  %v2016_v0 = vpop.permute.xlu0 %2015 }
0x1004   :  { %v2025_v24 = vpack.c.bf16 %v2016_v0, %v2016_v0 }
0x1005   :  { %v2077_v60 = vunpack.c.l.b16 %v2026_v63 }
0x1006   :  { %v2053_v1 = vunpack.c.l.b16 %v2025_v24 }
0x1007   :  { %v4925_v27 = vpack.c.b16 %v2077_v60, %v2077_v60 }
0x1008   :  { %v2054_v2 = vpack.c.b16 %v2053_v1, %v2053_v1 }
0x1009   :  { %2079 = vrot.lane.b32.xlu0 %v4925_v27, %s4400_s9 }
0x100a   :  { %2055 = vrot.lane.b32.xlu1 %v2054_v2, %s4400_s9 }
0x100b   :  { %v2032_v44 = vpop.permute.xlu0 %2031 }
0x100c   :  { %v2037_v3 = vsel %vm344_vm8, %v2032_v44, 0 }
0x100d   :  { %2046 = vmatpush.bf16.xpose.msrb.mxu2 %v2037_v3 }
0x1014   :  { %3841 = vmatmul.msk.bf16.vlgmr.msrb.gmra.mxu2 %vm344_vm8, %v2024_v54 }
0x104b   :  { %v2104_v50 = vpop.permute.xlu2 %2103 }
0x104c   :  { %v2109_v4 = vsel %vm344_vm8, %v2104_v50, 0 }
0x104d   :  { %2118 = vmatpush.bf16.xpose.msra.mxu1 %v2109_v4 }
0x1054   :  { %3844 = vmatmul.msk.bf16.vlgmr.msra.gmra.mxu1 %vm344_vm8, %v2027_v58 }
0x107b   :  { %v2080_v6 = vpop.permute.xlu0 %2079 }
0x107c   :  { %v2056_v25 = vpop.permute.xlu1 %2055  ;;  %v2085_v16 = vsel %vm344_vm8, %v2080_v6, 0 }
0x107d   :  { %v2061_v61 = vsel %vm344_vm8, %v2056_v25, 0  ;;  %2094 = vmatpush.bf16.xpose.msra.mxu0 %v2085_v16 }
0x107e   :  { %2070 = vmatpush.bf16.xpose.msrb.mxu3 %v2061_v61 }
0x1084   :  { %3843 = vmatmul.msk.bf16.vlgmr.msra.gmra.mxu0 %vm344_vm8, %v2026_v63 }
0x1085   :  { %3842 = vmatmul.msk.bf16.vlgmr.msrb.gmra.mxu3 %vm344_vm8, %v2025_v24 }
0x1097   :  { %v2048_v7 = vpop.f32.mrf.mxu2 }
0x1098   :  { %v2124_v9 = vsel %vm344_vm8, %v2048_v7, -inf }
0x1099   :  { %2125 = vmax.xlane.f32.xlu1 %v2124_v9 }
0x109f   :  { %v2050_v10 = vpop.f32.mrf.mxu2 }
0x10d1   :  { %v2120_v15 = vpop.f32.mrf.mxu1 }
0x10d2   :  { %v2133_v17 = vsel %vm344_vm8, %v2120_v15, -inf }
0x10d3   :  { %2134 = vmax.xlane.f32.xlu1 %v2133_v17  ;;  %v3838_v17 = vld [vmem:[%s5294_s3 + $0x14] sm:$0xf] }
0x10d9   :  { %v2122_v14 = vpop.f32.mrf.mxu1 }
0x10da   :  { %v5005_v14 = vsel %vm489_vm9, %v3838_v17, 0 }
0x10ec   :  { %2172 = vrot.lane.b32.xlu1 %v2030_v56, %s4388_s1 }
0x10f4   :  { %2340 = vrot.lane.b32.xlu1 %v2006_v29, %s4398_s23 }
0x10fc   :  { %2346 = vrot.lane.b32.xlu1 %v2006_v29, %s4397_s18 }
0x1101   :  { %v2096_v42 = vpop.f32.mrf.mxu0 }
0x1102   :  { %v2130_v18 = vsel %vm344_vm8, %v2096_v42, -inf }
0x1103   :  { %2131 = vmax.xlane.f32.xlu2 %v2130_v18 }
0x1108   :  { %v2072_v5 = vpop.f32.mrf.mxu3 }
0x1109   :  { %v2127_v19 = vsel %vm344_vm8, %v2072_v5, -inf  ;;  %v2098_v23 = vpop.f32.mrf.mxu0 }
0x110a   :  { %2128 = vmax.xlane.f32.xlu0 %v2127_v19 }
0x110c   :  { %v2126_v26 = vpop.xlane.xlu1 %2125 }
0x110d   :  { %v2136_v43 = vsub.f32 %v2048_v7, %v2126_v26 }
0x110f   :  { %v2140_v30 = vmul.f32 1.442695, %v2136_v43 }
0x1110   :  { %v2074_v52 = vpop.f32.mrf.mxu3 }
0x1111   :  { %4106 = vpow2.f32 %v2140_v30 }
0x1117   :  { %v4107_v31 = vpop.eup %4106 }
0x1118   :  { %v2148_v32 = vsel %vm344_vm8, %v4107_v31, 0.0 }
0x111e   :  { %2193 = vrot.lane.b32.xlu0 %v2054_v2, %s4388_s1  ;;  %v3837_v2 = vld [vmem:[%s5294_s3 + $0x10] sm:$0xf] }
0x111f   :  { %v4981_v44 = vsel %vm489_vm9, %v3837_v2, 0 }
0x1146   :  { %v2135_v33 = vpop.xlane.xlu1 %2134 }
0x1147   :  { %v2139_v21 = vsub.f32 %v2120_v15, %v2135_v33  ;;  %v4998_v15 = vsel %vm489_vm9, %v3840_v12, 0 }
0x1148   :  { %2149 = vadd.xlane.f32.xlu0 %v2148_v32 }
0x1149   :  { %v2146_v54 = vmul.f32 1.442695, %v2139_v21 }
0x115c   :  { %2235 = vrot.lane.b32.xlu0 %v2102_v13, %s4388_s1 }
0x115e   :  { %v2173_v11 = vpop.permute.xlu1 %2172 }
0x115f   :  { %v2178_v35 = vsel %vm489_vm9, %v2173_v11, 0 }
0x1160   :  { %2187 = vmatpush.bf16.msra.mxu2 %v2178_v35 }
0x1164   :  { %2343 = vrot.lane.b32.xlu0 %v2006_v29, %s4399_s24  ;;  %2273 = vmatpush.bf16.msrb.mxu2 %v4981_v44 }
0x1166   :  { %v2341_v36 = vpop.permute.xlu1 %2340 }
0x1167   :  { %v4953_v38 = vpack.c.bf16 %v2341_v36, %v2341_v36 }
0x1169   :  { %v2378_v47 = vunpack.c.l.b16 %v4953_v38 }
0x116b   :  { %v4958_v40 = vpack.c.b16 %v2378_v47, %v2378_v47 }
0x116c   :  { %2356 = vrot.lane.b32.xlu0 %v4956_v39, %s4400_s9 }
0x116d   :  { %2380 = vrot.lane.b32.xlu1 %v4958_v40, %s4400_s9 }
0x116e   :  { %v2347_v41 = vpop.permute.xlu1 %2346 }
0x116f   :  { %v4964_v46 = vpack.c.bf16 %v2347_v41, %v2347_v41  ;;  %v3839_v41 = vld [vmem:[%s5294_s3 + $0x18] sm:$0xf] }
0x1171   :  { %v2426_v20 = vunpack.c.l.b16 %v4964_v46 }
0x1173   :  { %v4967_v53 = vpack.c.b16 %v2426_v20, %v2426_v20  ;;  %v5018_v20 = vsel %vm489_vm9, %v3839_v41, 0 }
0x1175   :  { %2428 = vrot.lane.b32.xlu0 %v4967_v53, %s4400_s9 }
0x1176   :  { %v2132_v51 = vpop.xlane.xlu2 %2131 }
0x1177   :  { %v2138_v22 = vsub.f32 %v2096_v42, %v2132_v51 }
0x1179   :  { %v2144_v34 = vmul.f32 1.442695, %v2138_v22 }
0x117b   :  { %4108 = vpow2.f32 %v2144_v34 }
0x117c   :  { %4110 = vpow2.f32 %v2146_v54 }
0x117d   :  { %v2129_v55 = vpop.xlane.xlu0 %2128 }
0x117e   :  { %v2137_v57 = vsub.f32 %v2072_v5, %v2129_v55 }
0x1180   :  { %v2142_v59 = vmul.f32 1.442695, %v2137_v57 }
0x1181   :  { %v4109_v56 = vpop.eup %4108 }
0x1182   :  { %v2154_v58 = vsel %vm344_vm8, %v4109_v56, 0.0  ;;  %v4111_v13 = vpop.eup %4110  ;;  %4112 = vpow2.f32 %v2142_v59 }
0x1183   :  { %2155 = vadd.xlane.f32.xlu2 %v2154_v58  ;;  %v2157_v62 = vsel %vm344_vm8, %v4111_v13, 0.0 }
0x1188   :  { %v4113_v63 = vpop.eup %4112 }
0x1189   :  { %v2151_v60 = vsel %vm344_vm8, %v4113_v63, 0.0 }
0x118b   :  { %2158 = vadd.xlane.f32.xlu2 %v2157_v62 }
0x1190   :  { %v2194_v0 = vpop.permute.xlu0 %2193 }
0x1191   :  { %v2199_v24 = vsel %vm489_vm9, %v2194_v0, 0 }
0x1192   :  { %2208 = vmatpush.bf16.msra.mxu3 %v2199_v24 }
0x1193   :  { %2152 = vadd.xlane.f32.xlu2 %v2151_v60 }
0x1196   :  { %2292 = vmatpush.bf16.msrb.mxu3 %v5005_v14 }
0x11ab   :  { %2214 = vrot.lane.b32.xlu2 %v4925_v27, %s4388_s1 }
0x11bb   :  { %v2150_v1 = vpop.xlane.xlu0 %2149 }
0x11bc   :  { %4114 = vrcp.f32 %v2150_v1 }
0x11c2   :  { %v4115_v3 = vpop.eup %4114 }
0x11c3   :  { %v2164_v50 = vmul.f32 %v4115_v3, %v4107_v31 }
0x11c5   :  { %v2168_v4 = vpack.c.bf16 %v2164_v50, %v2164_v50 }
0x11c7   :  { %3845 = vmatmul.msk.bf16.vlgmr.msra.gmra.mxu2 %vm344_vm8, %v2168_v4 }
0x11ce   :  { %v2236_v6 = vpop.permute.xlu0 %2235 }
0x11cf   :  { %v2241_v25 = vsel %vm489_vm9, %v2236_v6, 0 }
0x11d0   :  { %2250 = vmatpush.bf16.msrb.mxu1 %v2241_v25 }
0x11d4   :  { %2330 = vmatpush.bf16.msra.mxu1 %v4998_v15 }
0x11d6   :  { %v2344_v27 = vpop.permute.xlu0 %2343 }
0x11d7   :  { %v4986_v16 = vpack.c.bf16 %v2344_v27, %v2344_v27 }
0x11d9   :  { %v2402_v61 = vunpack.c.l.b16 %v4986_v16 }
0x11db   :  { %v4989_v7 = vpack.c.b16 %v2402_v61, %v2402_v61 }
0x11dd   :  { %2404 = vrot.lane.b32.xlu2 %v4989_v7, %s4400_s9 }
0x11de   :  { %v2357_v9 = vpop.permute.xlu0 %2356 }
0x11df   :  { %v2362_v10 = vsel %vm344_vm8, %v2357_v9, 0  ;;  %v2381_v11 = vpop.permute.xlu1 %2380 }
0x11e0   :  { %2371 = vmatpush.bf16.xpose.msra.mxu2 %v2362_v10  ;;  %v2386_v47 = vsel %vm344_vm8, %v2381_v11, 0 }
0x11e7   :  { %v2429_v23 = vpop.permute.xlu0 %2428 }
0x11e8   :  { %v2434_v43 = vsel %vm344_vm8, %v2429_v23, 0 }
0x11f6   :  { %v2156_v29 = vpop.xlane.xlu2 %2155 }
0x11fe   :  { %v2159_v42 = vpop.xlane.xlu2 %2158 }
0x11ff   :  { %4116 = vrcp.f32 %v2159_v42 }
0x1200   :  { %4118 = vrcp.f32 %v2156_v29 }
0x1205   :  { %v4117_v18 = vpop.eup %4116 }
0x1206   :  { %v2167_v5 = vmul.f32 %v4117_v18, %v4111_v13  ;;  %v2153_v19 = vpop.xlane.xlu2 %2152  ;;  %v4119_v26 = vpop.eup %4118 }
0x1207   :  { %4120 = vrcp.f32 %v2153_v19  ;;  %v2166_v31 = vmul.f32 %v4119_v26, %v4109_v56 }
0x1208   :  { %v2171_v52 = vpack.c.bf16 %v2167_v5, %v2167_v5 }
0x1209   :  { %v2170_v37 = vpack.c.bf16 %v2166_v31, %v2166_v31 }
0x120a   :  { %3848 = vmatmul.msk.bf16.vlgmr.msrb.gmra.mxu1 %vm344_vm8, %v2171_v52 }
0x120b   :  { %2443 = vmatpush.bf16.xpose.msrb.mxu1 %v2434_v43 }
0x120d   :  { %v4121_v30 = vpop.eup %4120 }
0x120e   :  { %v2165_v32 = vmul.f32 %v4121_v30, %v4113_v63  ;;  %v2215_v33 = vpop.permute.xlu2 %2214 }
0x120f   :  { %v2220_v35 = vsel %vm489_vm9, %v2215_v33, 0 }
0x1210   :  { %v2169_v36 = vpack.c.bf16 %v2165_v32, %v2165_v32  ;;  %2229 = vmatpush.bf16.msrb.mxu0 %v2220_v35  ;;  %v5045_v32 = vld [vmem:[#allocation11 + $0x11] ss:$0 sm:$0xff] }
0x1212   :  { %3846 = vmatmul.msk.bf16.vlgmr.msra.gmra.mxu3 %vm344_vm8, %v2169_v36 }
0x1213   :  { %2395 = vmatpush.bf16.xpose.msra.mxu3 %v2386_v47  ;;  %3847 = vmatmul.msk.bf16.vlgmr.msrb.gmra.mxu0 %vm344_vm8, %v2170_v37 }
0x1214   :  { %2311 = vmatpush.bf16.msra.mxu0 %v5018_v20 }
0x1237   :  { %v2405_v51 = vpop.permute.xlu2 %2404 }
0x1238   :  { %v2410_v22 = vsel %vm344_vm8, %v2405_v51, 0 }
0x1239   :  { %2419 = vmatpush.bf16.xpose.msrb.mxu0 %v2410_v22 }
0x124a   :  { %v2189_v21 = vpop.f32.mrf.mxu2 }
0x124b   :  { %v2256_v34 = vpack.c.bf16 %v2189_v21, %v2189_v21 }
0x124d   :  { %3849 = vmatmul.msk.bf16.vlgmr.msrb.gmra.mxu2 %vm344_vm8, %v2256_v34 }
0x1252   :  { %v2191_v54 = vpop.f32.mrf.mxu2 }
0x125d   :  { %3853 = vmatmul.msk.bf16.vlgmr.msra.gmra.mxu2 %vm344_vm8, %v4949_v45 }
0x1287   :  { %v2252_v55 = vpop.f32.mrf.mxu1 }
0x1288   :  { %v2259_v56 = vpack.c.bf16 %v2252_v55, %v2252_v55 }
0x128a   :  { %3852 = vmatmul.msk.bf16.vlgmr.msra.gmra.mxu1 %vm344_vm8, %v2259_v56 }
0x128f   :  { %v2254_v57 = vpop.f32.mrf.mxu1 }
0x1290   :  { %v2231_v58 = vpop.f32.mrf.mxu0 }
0x1291   :  { %v2258_v59 = vpack.c.bf16 %v2231_v58, %v2231_v58 }
0x1293   :  { %3851 = vmatmul.msk.bf16.vlgmr.msra.gmra.mxu0 %vm344_vm8, %v2258_v59 }
0x1295   :  { %v2210_v13 = vpop.f32.mrf.mxu3 }
0x1296   :  { %v2257_v62 = vpack.c.bf16 %v2210_v13, %v2210_v13 }
0x1298   :  { %v2233_v63 = vpop.f32.mrf.mxu0  ;;  %3850 = vmatmul.msk.bf16.vlgmr.msrb.gmra.mxu3 %vm344_vm8, %v2257_v62 }
0x129a   :  { %3856 = vmatmul.msk.bf16.vlgmr.msrb.gmra.mxu1 %vm344_vm8, %v4964_v46 }
0x129d   :  { %v2212_v0 = vpop.f32.mrf.mxu3 }
0x12a3   :  { %3855 = vmatmul.msk.bf16.vlgmr.msrb.gmra.mxu0 %vm344_vm8, %v4986_v16 }
0x12a8   :  { %3854 = vmatmul.msk.bf16.vlgmr.msra.gmra.mxu3 %vm344_vm8, %v4953_v38 }
0x12d0   :  { %v2275_v45 = vpop.f32.mrf.mxu2 }
0x12d8   :  { %v2277_v24 = vpop.f32.mrf.mxu2 }
0x12e0   :  { %v2373_v60 = vpop.f32.mrf.mxu2 }
0x12e1   :  { %v2449_v1 = vsel %vm344_vm8, %v2373_v60, -inf }
0x12e2   :  { %2450 = vmax.xlane.f32.xlu1 %v2449_v1 }
0x12e8   :  { %v2375_v2 = vpop.f32.mrf.mxu2 }
0x1307   :  { %v2332_v3 = vpop.f32.mrf.mxu1 }
0x130f   :  { %v2334_v50 = vpop.f32.mrf.mxu1 }
0x1310   :  { %v2313_v4 = vpop.f32.mrf.mxu0 }
0x1317   :  { %v2445_v6 = vpop.f32.mrf.mxu1 }
0x1318   :  { %v2315_v25 = vpop.f32.mrf.mxu0  ;;  %v2458_v46 = vsel %vm344_vm8, %v2445_v6, -inf }
0x1319   :  { %2459 = vmax.xlane.f32.xlu1 %v2458_v46 }
0x131b   :  { %v2294_v27 = vpop.f32.mrf.mxu3 }
0x131c   :  { %v2336_v16 = vadd.f32 %v2294_v27, %v2275_v45 }
0x131e   :  { %v2337_v61 = vadd.f32 %v2336_v16, %v2313_v4 }
0x131f   :  { %v2447_v9 = vpop.f32.mrf.mxu1 }
0x1320   :  { %v2338_v38 = vadd.f32 %v2337_v61, %v2332_v3  ;;  %v2421_v10 = vpop.f32.mrf.mxu0 }
0x1321   :  { %v2455_v12 = vsel %vm344_vm8, %v2421_v10, -inf }
0x1322   :  { %2456 = vmax.xlane.f32.xlu0 %v2455_v12 }
0x1323   :  { %v2296_v17 = vpop.f32.mrf.mxu3 }
0x1328   :  { %v2423_v29 = vpop.f32.mrf.mxu0 }
0x132b   :  { %v2397_v42 = vpop.f32.mrf.mxu3 }
0x132c   :  { %v2452_v18 = vsel %vm344_vm8, %v2397_v42, -inf }
0x132d   :  { %2453 = vmax.xlane.f32.xlu2 %v2452_v18 }
0x1332   :  { %2497 = vrot.lane.b32.xlu1 %v4956_v39, %s4388_s1 }
0x1333   :  { %v2399_v5 = vpop.f32.mrf.mxu3 }
0x133a   :  { %2560 = vrot.lane.b32.xlu1 %v4967_v53, %s4388_s1  ;;  %v2653_v53 = vadd.f32 %v5045_v32, %v2338_v38 }
0x133c   :  { %v5049_v36 = vadd.f32 %v2653_v53, %v4913_v49 }
0x133e   :  { %v2659_v51 = vsel %vm302_vm7, %v5049_v36, 0.0 }
0x1355   :  { %v2451_v19 = vpop.xlane.xlu1 %2450 }
0x1356   :  { %v2461_v23 = vsub.f32 %v2373_v60, %v2451_v19 }
0x1358   :  { %v2465_v52 = vmul.f32 1.442695, %v2461_v23 }
0x135a   :  { %4122 = vpow2.f32 %v2465_v52 }
0x1360   :  { %v4123_v26 = vpop.eup %4122 }
0x1361   :  { %v2473_v43 = vsel %vm344_vm8, %v4123_v26, 0.0 }
0x1362   :  { %2474 = vadd.xlane.f32.xlu2 %v2473_v43  ;;  %v3971_v43 = vld [vmem:[#allocation7 + $0x18] sm:$0xff] }
0x137a   :  { %2518 = vrot.lane.b32.xlu2 %v4958_v40, %s4388_s1 }
0x138c   :  { %v2460_v30 = vpop.xlane.xlu1 %2459 }
0x138d   :  { %v2464_v33 = vsub.f32 %v2445_v6, %v2460_v30  ;;  %v3970_v30 = vld [vmem:[#allocation7 + $0x10] sm:$0xff] }
0x138f   :  { %v2471_v35 = vmul.f32 1.442695, %v2464_v33 }
0x1395   :  { %v2457_v31 = vpop.xlane.xlu0 %2456 }
0x1396   :  { %v2463_v39 = vsub.f32 %v2421_v10, %v2457_v31 }
0x1398   :  { %v2469_v11 = vmul.f32 1.442695, %v2463_v39 }
0x139a   :  { %4124 = vpow2.f32 %v2469_v11 }
0x139b   :  { %4126 = vpow2.f32 %v2471_v35 }
0x13a0   :  { %v4125_v37 = vpop.eup %4124  ;;  %v2454_v47 = vpop.xlane.xlu2 %2453 }
0x13a1   :  { %v2462_v41 = vsub.f32 %v2397_v42, %v2454_v47  ;;  %v2479_v40 = vsel %vm344_vm8, %v4125_v37, 0.0  ;;  %v4127_v54 = vpop.eup %4126 }
0x13a2   :  { %2480 = vadd.xlane.f32.xlu0 %v2479_v40  ;;  %v2482_v49 = vsel %vm344_vm8, %v4127_v54, 0.0 }
0x13a3   :  { %2660 = vadd.xlane.f32.xlu2 %v2659_v51  ;;  %v2467_v22 = vmul.f32 1.442695, %v2462_v41 }
0x13a4   :  { %v2498_v21 = vpop.permute.xlu1 %2497 }
0x13a5   :  { %v2503_v34 = vsel %vm489_vm9, %v2498_v21, 0  ;;  %4128 = vpow2.f32 %v2467_v22 }
0x13a6   :  { %2512 = vmatpush.bf16.msrb.mxu2 %v2503_v34 }
0x13aa   :  { %2595 = vmatpush.bf16.msra.mxu2 %v4981_v44  ;;  %2483 = vadd.xlane.f32.xlu0 %v2482_v49 }
0x13ab   :  { %v4129_v57 = vpop.eup %4128 }
0x13ac   :  { %v2561_v55 = vpop.permute.xlu1 %2560  ;;  %v2476_v58 = vsel %vm344_vm8, %v4129_v57, 0.0 }
0x13ad   :  { %v2566_v56 = vsel %vm489_vm9, %v2561_v55, 0 }
0x13ae   :  { %2575 = vmatpush.bf16.msra.mxu1 %v2566_v56 }
0x13b2   :  { %2643 = vmatpush.bf16.msrb.mxu1 %v4998_v15  ;;  %2477 = vadd.xlane.f32.xlu0 %v2476_v58  ;;  %v2667_v15 = vmul.f32 %v5049_v36, %v5049_v36  ;;  %v3968_v58 = vld [vmem:[%s5295_s4 + $0x10] sm:$0xff] }
0x13b4   :  { %v2669_v45 = vsel %vm302_vm7, %v2667_v15, 0.0  ;;  %v5093_v15 = vld [vmem:[#allocation11 + $0x13] ss:$0 sm:$0xff] }
0x13c6   :  { %2539 = vrot.lane.b32.xlu0 %v4989_v7, %s4388_s1 }
0x13d5   :  { %v2475_v59 = vpop.xlane.xlu2 %2474 }
0x13d6   :  { %4130 = vrcp.f32 %v2475_v59 }
0x13dc   :  { %v4131_v44 = vpop.eup %4130 }
0x13dd   :  { %v2489_v13 = vmul.f32 %v4131_v44, %v4123_v26  ;;  %v2519_v62 = vpop.permute.xlu2 %2518 }
0x13de   :  { %v2524_v63 = vsel %vm489_vm9, %v2519_v62, 0 }
0x13df   :  { %v2493_v0 = vpack.c.bf16 %v2489_v13, %v2489_v13  ;;  %2533 = vmatpush.bf16.msrb.mxu3 %v2524_v63 }
0x13e1   :  { %3857 = vmatmul.msk.bf16.vlgmr.msrb.gmra.mxu2 %vm344_vm8, %v2493_v0 }
0x13e3   :  { %2611 = vmatpush.bf16.msra.mxu3 %v5005_v14 }
0x13f0   :  { %2670 = vadd.xlane.f32.xlu0 %v2669_v45 }
0x1415   :  { %v2481_v7 = vpop.xlane.xlu0 %2480 }
0x1416   :  { %v2661_v34 = vpop.xlane.xlu2 %2660 }
0x141d   :  { %v2484_v24 = vpop.xlane.xlu0 %2483 }
0x141e   :  { %4132 = vrcp.f32 %v2484_v24 }
0x1424   :  { %v4133_v60 = vpop.eup %4132 }
0x1425   :  { %v2492_v1 = vmul.f32 %v4133_v60, %v4127_v54  ;;  %v2478_v2 = vpop.xlane.xlu0 %2477  ;;  %v2665_v54 = vmul.f32 %v2661_v34, %v4700_v48 }
0x1426   :  { %4134 = vrcp.f32 %v2478_v2 }
0x1427   :  { %v2496_v3 = vpack.c.bf16 %v2492_v1, %v2492_v1  ;;  %4136 = vrcp.f32 %v2481_v7  ;;  %v2677_v55 = vmul.f32 %v2665_v54, %v2665_v54 }
0x1429   :  { %3860 = vmatmul.msk.bf16.vlgmr.msra.gmra.mxu1 %vm344_vm8, %v2496_v3 }
0x142c   :  { %v4135_v50 = vpop.eup %4134 }
0x142d   :  { %v2490_v14 = vmul.f32 %v4135_v50, %v4129_v57  ;;  %v4137_v6 = vpop.eup %4136 }
0x142e   :  { %v2491_v25 = vmul.f32 %v4137_v6, %v4125_v37 }
0x142f   :  { %v2494_v4 = vpack.c.bf16 %v2490_v14, %v2490_v14 }
0x1430   :  { %v2495_v16 = vpack.c.bf16 %v2491_v25, %v2491_v25 }
0x1431   :  { %3858 = vmatmul.msk.bf16.vlgmr.msrb.gmra.mxu3 %vm344_vm8, %v2494_v4 }
0x1432   :  { %2775 = vmatpush.bf16.msrb.mxu3 %v3971_v43 }
0x1436   :  { %2776 = vmatpush.bf16.msrb.mxu3 %v3970_v30 }
0x1438   :  { %v2540_v46 = vpop.permute.xlu0 %2539 }
0x1439   :  { %v2545_v27 = vsel %vm489_vm9, %v2540_v46, 0 }
0x143a   :  { %2554 = vmatpush.bf16.msra.mxu0 %v2545_v27 }
0x143d   :  { %3859 = vmatmul.msk.bf16.vlgmr.msra.gmra.mxu0 %vm344_vm8, %v2495_v16 }
0x143e   :  { %2627 = vmatpush.bf16.msrb.mxu0 %v5018_v20 }
0x1464   :  { %v2514_v61 = vpop.f32.mrf.mxu2 }
0x1465   :  { %v2581_v9 = vpack.c.bf16 %v2514_v61, %v2514_v61  ;;  %v2681_v61 = vsub.f32 %v5049_v36, %v2665_v54 }
0x1467   :  { %3861 = vmatmul.msk.bf16.vlgmr.msra.gmra.mxu2 %vm344_vm8, %v2581_v9 }
0x146c   :  { %v2516_v38 = vpop.f32.mrf.mxu2 }
0x146d   :  { %v4016_v38 = vld [vmem:[#allocation11 + $0x17] ss:$0 sm:$0xff] }
0x14a6   :  { %v2577_v10 = vpop.f32.mrf.mxu1 }
0x14a7   :  { %v2584_v12 = vpack.c.bf16 %v2577_v10, %v2577_v10 }
0x14a9   :  { %3864 = vmatmul.msk.bf16.vlgmr.msrb.gmra.mxu1 %vm344_vm8, %v2584_v12 }
0x14ae   :  { %v2579_v17 = vpop.f32.mrf.mxu1 }
0x14b4   :  { %v2535_v29 = vpop.f32.mrf.mxu3 }
0x14b5   :  { %v2582_v42 = vpack.c.bf16 %v2535_v29, %v2535_v29 }
0x14b7   :  { %3862 = vmatmul.msk.bf16.vlgmr.msra.gmra.mxu3 %vm344_vm8, %v2582_v42  ;;  %v4017_v42 = vld [vmem:[#allocation11 + $0x18] ss:$0 sm:$0xff] }
0x14ba   :  { %v2556_v18 = vpop.f32.mrf.mxu0 }
0x14bb   :  { %v2583_v5 = vpack.c.bf16 %v2556_v18, %v2556_v18 }
0x14bc   :  { %v2537_v19 = vpop.f32.mrf.mxu3 }
0x14bd   :  { %3863 = vmatmul.msk.bf16.vlgmr.msrb.gmra.mxu0 %vm344_vm8, %v2583_v5 }
0x14c2   :  { %v2558_v20 = vpop.f32.mrf.mxu0 }
0x14c7   :  { %3886 = vmatmul.msk.bf16.vlgmr.msrb.gmra.mxu3 %vm302_vm7, %v4717_v28  ;;  %v2671_v28 = vpop.xlane.xlu0 %2670 }
0x14c8   :  { %v2675_v49 = vmul.f32 %v2671_v28, %v4700_v48 }
0x14ca   :  { %v2679_v56 = vsub.f32 %v2675_v49, %v2677_v55 }
0x14ea   :  { %v2597_v23 = vpop.f32.mrf.mxu2 }
0x14f2   :  { %v2599_v52 = vpop.f32.mrf.mxu2 }
0x1526   :  { %v2645_v26 = vpop.f32.mrf.mxu1 }
0x152e   :  { %v2647_v31 = vpop.f32.mrf.mxu1 }
0x153a   :  { %v2613_v39 = vpop.f32.mrf.mxu3  ;;  %v2629_v33 = vpop.f32.mrf.mxu0 }
0x153b   :  { %v2649_v11 = vadd.f32 %v2613_v39, %v2597_v23 }
0x153d   :  { %v2650_v53 = vadd.f32 %v2649_v11, %v2629_v33  ;;  %v4019_v33 = vld [vmem:[#allocation11 + $0x12] ss:$0 sm:$0xff] }
0x153f   :  { %v2651_v35 = vadd.f32 %v2650_v53, %v2645_v26 }
0x1541   :  { %v2654_v37 = vadd.f32 %v5045_v32, %v2651_v35  ;;  %v2683_v32 = vadd.f32 1e-05, %v2679_v56 }
0x1542   :  { %v2615_v47 = vpop.f32.mrf.mxu3  ;;  %v2631_v41 = vpop.f32.mrf.mxu0 }
0x1543   :  { %v2656_v40 = vadd.f32 %v2654_v37, %v4915_v8  ;;  %4138 = vrsqrt.f32 %v2683_v32  ;;  %v3969_v8 = vld [vmem:[%s5295_s4 + $0x18] sm:$0xff]  ;;  %vm2691_vm2 = vweird.f32 %v2683_v32 }
0x1544   :  { %2742 = vmatpush.bf16.msrb.mxu2 %v3969_v8 }
0x1545   :  { %v2662_v51 = vsel %vm302_vm7, %v2656_v40, 0.0  ;;  %v2668_v22 = vmul.f32 %v2656_v40, %v2656_v40 }
0x1546   :  { %2663 = vadd.xlane.f32.xlu1 %v2662_v51 }
0x1547   :  { %v2672_v21 = vsel %vm302_vm7, %v2668_v22, 0.0 }
0x1548   :  { %2673 = vadd.xlane.f32.xlu2 %v2672_v21  ;;  %2743 = vmatpush.bf16.msrb.mxu2 %v3968_v58 }
0x1549   :  { %v4139_v57 = vpop.eup %4138 }
0x154a   :  { %v2686_v59 = vmul.f32 %v4139_v57, %v2683_v32  ;;  %v2778_v45 = vpop.f32.mrf.mxu3  ;;  %vm2692_vm1 = vweird.f32 %v4139_v57 }
0x154b   :  { %v2779_v60 = vadd.f32 %v5093_v15, %v2778_v45  ;;  %vm2693_vm3 = vmor %vm2691_vm2, %vm2692_vm1 }
0x154c   :  { %v2687_v7 = vmul.f32 %v4139_v57, %v2686_v59 }
0x154d   :  { %v5098_v2 = vpack.c.bf16 %v2779_v60, %v2779_v60 }
0x154e   :  { %v2688_v3 = vmul.f32 0.5, %v2687_v7 }
0x154f   :  { %v2821_v50 = vsel %vm344_vm8, %v5098_v2, 0 }
0x1550   :  { %2830 = vmatpush.bf16.xpose.msra.mxu0 %v2821_v50  ;;  %v2689_v14 = vsub.f32 1.5, %v2688_v3 }
0x1552   :  { %v2690_v6 = vmul.f32 %v4139_v57, %v2689_v14  ;;  %v2780_v56 = vpop.f32.mrf.mxu3 }
0x1554   :  { %v2694_v27 = vsel %vm2693_vm3, %v4139_v57, %v2690_v6  ;;  %v5135_v6 = vadd.f32 %v5093_v15, %v2780_v56 }
0x1555   :  { %v2705_v10 = vmul.f32 %v2694_v27, %v2681_v61 }
0x1557   :  { %v2708_v18 = vmul.f32 %v4016_v38, %v2705_v10 }
0x1559   :  { %v5104_v20 = vadd.f32 %v4017_v42, %v2708_v18 }
0x155f   :  { %2810 = vrot.lane.b32.xlu1 %v2779_v60, %s4397_s18 }
0x1560   :  { %2807 = vrot.lane.b32.xlu2 %v2779_v60, %s4399_s24 }
0x1567   :  { %2804 = vrot.lane.b32.xlu1 %v2779_v60, %s4398_s23 }
0x15b9   :  { %v2664_v44 = vpop.xlane.xlu1 %2663 }
0x15ba   :  { %v2666_v13 = vmul.f32 %v2664_v44, %v4700_v48 }
0x15bb   :  { %v2674_v62 = vpop.xlane.xlu2 %2673 }
0x15bc   :  { %v2678_v63 = vmul.f32 %v2666_v13, %v2666_v13  ;;  %v2676_v0 = vmul.f32 %v2674_v62, %v4700_v48  ;;  %v2682_v17 = vsub.f32 %v2656_v40, %v2666_v13 }
0x15be   :  { %v2680_v24 = vsub.f32 %v2676_v0, %v2678_v63 }
0x15c0   :  { %v2684_v1 = vadd.f32 1e-05, %v2680_v24 }
0x15c2   :  { %4140 = vrsqrt.f32 %v2684_v1  ;;  %vm2701_vm5 = vweird.f32 %v2684_v1 }
0x15c3   :  { %v2808_v52 = vpop.permute.xlu2 %2807 }
0x15c4   :  { %v2815_v43 = vpack.c.bf16 %v2808_v52, %v2808_v52 }
0x15c6   :  { %v2859_v31 = vsel %vm344_vm8, %v2815_v43, 0  ;;  %v2990_v3 = vunpack.c.l.b16 %v2815_v43 }
0x15c7   :  { %2868 = vmatpush.bf16.xpose.msra.mxu2 %v2859_v31 }
0x15c8   :  { %v4141_v4 = vpop.eup %4140  ;;  %v2991_v50 = vpack.c.b16 %v2990_v3, %v2990_v3 }
0x15c9   :  { %v2696_v25 = vmul.f32 %v4141_v4, %v2684_v1  ;;  %vm2702_vm4 = vweird.f32 %v4141_v4 }
0x15ca   :  { %vm2703_vm6 = vmor %vm2701_vm5, %vm2702_vm4  ;;  %vm3656_vm4 = vcmask 1040384   ;;  %vm3698_vm5 = vcmask 253952  }
0x15cb   :  { %v2697_v46 = vmul.f32 %v4141_v4, %v2696_v25 }
0x15cd   :  { %v2698_v16 = vmul.f32 0.5, %v2697_v46 }
0x15cf   :  { %v2699_v9 = vsub.f32 1.5, %v2698_v16 }
0x15d1   :  { %v2700_v12 = vmul.f32 %v4141_v4, %v2699_v9  ;;  %v2811_v26 = vpop.permute.xlu1 %2810 }
0x15d2   :  { %v5111_v30 = vpack.c.bf16 %v2811_v26, %v2811_v26 }
0x15d3   :  { %v2704_v29 = vsel %vm2703_vm6, %v4141_v4, %v2700_v12 }
0x15d4   :  { %v2706_v5 = vmul.f32 %v2704_v29, %v2682_v17  ;;  %v2878_v39 = vsel %vm344_vm8, %v5111_v30, 0  ;;  %v3014_v31 = vunpack.c.l.b16 %v5111_v30 }
0x15d5   :  { %2887 = vmatpush.bf16.xpose.msra.mxu3 %v2878_v39 }
0x15d6   :  { %v2709_v19 = vmul.f32 %v4016_v38, %v2706_v5  ;;  %v3015_v39 = vpack.c.b16 %v3014_v31, %v3014_v31 }
0x15d8   :  { %v5106_v23 = vadd.f32 %v4017_v42, %v2709_v19 }
0x15d9   :  { %v2805_v37 = vpop.permute.xlu1 %2804 }
0x15da   :  { %v2718_v36 = vpack.c.bf16 %v5106_v23, %v5104_v20  ;;  %v2814_v47 = vpack.c.bf16 %v2805_v37, %v2805_v37 }
0x15dc   :  { %3877 = vmatmul.msk.bf16.vlgmr.msrb.gmra.mxu2 %vm302_vm7, %v2718_v36  ;;  %v2840_v41 = vsel %vm344_vm8, %v2814_v47, 0  ;;  %v2966_v14 = vunpack.c.l.b16 %v2814_v47 }
0x15dd   :  { %2849 = vmatpush.bf16.xpose.msra.mxu1 %v2840_v41 }
0x15de   :  { %v2967_v4 = vpack.c.b16 %v2966_v14, %v2966_v14  ;;  %v5191_v14 = vpack.c.bf16 %v5135_v6, %v5135_v6 }
0x165f   :  { %v2745_v11 = vpop.f32.mrf.mxu2 }
0x1660   :  { %v2746_v53 = vadd.f32 %v4019_v33, %v2745_v11 }
0x1662   :  { %v2799_v35 = vpack.c.bf16 %v2746_v53, %v2746_v53  ;;  %2796 = vrot.lane.b32.xlu2 %v2746_v53, %s4397_s18  ;;  %2793 = vrot.lane.b32.xlu0 %v2746_v53, %s4399_s24 }
0x1664   :  { %3887 = vmatmul.msk.bf16.vlgmr.msra.gmra.mxu0 %vm344_vm8, %v2799_v35  ;;  %v2786_v35 = vld [vmem:[#allocation8 + $0x18] sm:$0xf] }
0x1667   :  { %v2747_v58 = vpop.f32.mrf.mxu2 }
0x1668   :  { %v5139_v25 = vadd.f32 %v4019_v33, %v2747_v58  ;;  %v2942_v33 = vunpack.c.l.b16 %v5098_v2  ;;  %v5161_v2 = vsel %vm489_vm9, %v2786_v35, 0 }
0x166a   :  { %2790 = vrot.lane.b32.xlu0 %v2746_v53, %s4398_s23  ;;  %v2943_v11 = vpack.c.b16 %v2942_v33, %v2942_v33 }
0x16bc   :  { %v2797_v40 = vpop.permute.xlu2 %2796 }
0x16bd   :  { %v2802_v51 = vpack.c.bf16 %v2797_v40, %v2797_v40 }
0x16bf   :  { %3890 = vmatmul.msk.bf16.vlgmr.msra.gmra.mxu3 %vm344_vm8, %v2802_v51  ;;  %v2785_v51 = vld [vmem:[#allocation8 + $0x14] sm:$0xf] }
0x16d4   :  { %v2794_v22 = vpop.permute.xlu0 %2793 }
0x16d5   :  { %v2801_v21 = vpack.c.bf16 %v2794_v22, %v2794_v22  ;;  %v5166_v22 = vsel %vm489_vm9, %v2785_v51, 0 }
0x16d7   :  { %3889 = vmatmul.msk.bf16.vlgmr.msra.gmra.mxu2 %vm344_vm8, %v2801_v21 }
0x16dc   :  { %v2791_v34 = vpop.permute.xlu0 %2790 }
0x16dd   :  { %v2800_v28 = vpack.c.bf16 %v2791_v34, %v2791_v34 }
0x16df   :  { %3888 = vmatmul.msk.bf16.vlgmr.msra.gmra.mxu1 %vm344_vm8, %v2800_v28 }
0x16e1   :  { %v2832_v54 = vpop.f32.mrf.mxu0 }
0x16e2   :  { %v2893_v49 = vsel %vm344_vm8, %v2832_v54, -inf }
0x16e3   :  { %2894 = vmax.xlane.f32.xlu0 %v2893_v49  ;;  %v2787_v49 = vld [vmem:[#allocation8 + $0x1c] sm:$0xf] }
0x16e9   :  { %v2834_v55 = vpop.f32.mrf.mxu0 }
0x1742   :  { %v2889_v32 = vpop.f32.mrf.mxu3 }
0x1743   :  { %v2902_v8 = vsel %vm344_vm8, %v2889_v32, -inf }
0x1744   :  { %2903 = vmax.xlane.f32.xlu1 %v2902_v8 }
0x174a   :  { %v2891_v57 = vpop.f32.mrf.mxu3 }
0x174b   :  { %v5171_v57 = vsel %vm489_vm9, %v2787_v49, 0 }
0x1756   :  { %v2895_v59 = vpop.xlane.xlu0 %2894 }
0x1757   :  { %v2905_v44 = vsub.f32 %v2832_v54, %v2895_v59 }
0x1759   :  { %v2909_v13 = vmul.f32 1.442695, %v2905_v44 }
0x175a   :  { %v2870_v62 = vpop.f32.mrf.mxu2 }
0x175b   :  { %4142 = vpow2.f32 %v2909_v13  ;;  %v2899_v63 = vsel %vm344_vm8, %v2870_v62, -inf }
0x175c   :  { %2900 = vmax.xlane.f32.xlu2 %v2899_v63  ;;  %v2851_v0 = vpop.f32.mrf.mxu1 }
0x175d   :  { %v2896_v60 = vsel %vm344_vm8, %v2851_v0, -inf }
0x1761   :  { %v5127_v45 = vpop.eup %4142 }
0x1762   :  { %v2872_v7 = vpop.f32.mrf.mxu2  ;;  %v2917_v24 = vsel %vm344_vm8, %v5127_v45, 0.0 }
0x1763   :  { %2918 = vadd.xlane.f32.xlu0 %v2917_v24 }
0x1764   :  { %2897 = vmax.xlane.f32.xlu2 %v2896_v60  ;;  %v2853_v1 = vpop.f32.mrf.mxu1 }
0x177c   :  { %2992 = vrot.lane.b32.xlu2 %v2991_v50, %s4400_s9 }
0x1784   :  { %2968 = vrot.lane.b32.xlu2 %v2967_v4, %s4400_s9 }
0x178c   :  { %3141 = vrot.lane.b32.xlu2 %v5135_v6, %s4397_s18 }
0x1794   :  { %3127 = vrot.lane.b32.xlu2 %v5139_v25, %s4397_s18 }
0x17b7   :  { %v2904_v61 = vpop.xlane.xlu1 %2903 }
0x17b8   :  { %v2908_v12 = vsub.f32 %v2889_v32, %v2904_v61 }
0x17ba   :  { %v2915_v29 = vmul.f32 1.442695, %v2908_v12 }
0x17cf   :  { %v2901_v46 = vpop.xlane.xlu2 %2900 }
0x17d0   :  { %v2907_v27 = vsub.f32 %v2870_v62, %v2901_v46 }
0x17d2   :  { %v2913_v16 = vmul.f32 1.442695, %v2907_v27 }
0x17d4   :  { %4144 = vpow2.f32 %v2913_v16 }
0x17d6   :  { %v2919_v30 = vpop.xlane.xlu0 %2918 }
0x17d7   :  { %v2898_v9 = vpop.xlane.xlu2 %2897 }
0x17d8   :  { %v2906_v38 = vsub.f32 %v2851_v0, %v2898_v9  ;;  %v2784_v0 = vld [vmem:[#allocation8 + $0x10] sm:$0xf] }
0x17d9   :  { %v5186_v3 = vsel %vm489_vm9, %v2784_v0, 0 }
0x17da   :  { %v4145_v10 = vpop.eup %4144  ;;  %v2911_v17 = vmul.f32 1.442695, %v2906_v38 }
0x17db   :  { %v2923_v15 = vsel %vm344_vm8, %v4145_v10, 0.0 }
0x17dc   :  { %4146 = vpow2.f32 %v2911_v17  ;;  %2924 = vadd.xlane.f32.xlu1 %v2923_v15 }
0x17dd   :  { %4148 = vpow2.f32 %v2915_v29 }
0x17df   :  { %v2993_v42 = vpop.permute.xlu2 %2992 }
0x17e0   :  { %v2998_v18 = vsel %vm489_vm9, %v2993_v42, 0 }
0x17e1   :  { %3007 = vmatpush.bf16.msrb.mxu2 %v2998_v18 }
0x17e2   :  { %v4147_v5 = vpop.eup %4146 }
0x17e3   :  { %v2920_v19 = vsel %vm344_vm8, %v4147_v5, 0.0  ;;  %v4149_v52 = vpop.eup %4148 }
0x17e4   :  { %2921 = vadd.xlane.f32.xlu0 %v2920_v19  ;;  %v2926_v43 = vsel %vm344_vm8, %v4149_v52, 0.0 }
0x17e5   :  { %3092 = vmatpush.bf16.msra.mxu2 %v5161_v2 }
0x17e7   :  { %v2969_v36 = vpop.permute.xlu2 %2968 }
0x17e8   :  { %v2974_v26 = vsel %vm489_vm9, %v2969_v36, 0 }
0x17e9   :  { %2983 = vmatpush.bf16.msrb.mxu1 %v2974_v26 }
0x17ec   :  { %2927 = vadd.xlane.f32.xlu0 %v2926_v43 }
0x17ed   :  { %3073 = vmatpush.bf16.msra.mxu1 %v5166_v22 }
0x17ef   :  { %v3142_v55 = vpop.permute.xlu2 %3141 }
0x17f0   :  { %v5173_v58 = vpack.c.bf16 %v3142_v55, %v3142_v55 }
0x17f2   :  { %v3209_v13 = vsel %vm344_vm8, %v5173_v58, 0 }
0x17f5   :  { %3016 = vrot.lane.b32.xlu1 %v3015_v39, %s4400_s9  ;;  %v3130_v39 = vpack.c.bf16 %v5139_v25, %v5139_v25 }
0x17f7   :  { %v3128_v43 = vpop.permute.xlu2 %3127 }
0x17f8   :  { %v3133_v31 = vpack.c.bf16 %v3128_v43, %v3128_v43 }
0x17fd   :  { %3138 = vrot.lane.b32.xlu1 %v5135_v6, %s4399_s24 }
0x1800   :  { %2944 = vrot.lane.b32.xlu0 %v2943_v11, %s4400_s9 }
0x1805   :  { %3124 = vrot.lane.b32.xlu1 %v5139_v25, %s4399_s24 }
0x1808   :  { %3135 = vrot.lane.b32.xlu0 %v5135_v6, %s4398_s23 }
0x180d   :  { %3121 = vrot.lane.b32.xlu1 %v5139_v25, %s4398_s23 }
0x184f   :  { %v2925_v53 = vpop.xlane.xlu1 %2924 }
0x1850   :  { %4150 = vrcp.f32 %v2925_v53 }
0x1856   :  { %v4151_v37 = vpop.eup %4150 }
0x1857   :  { %v2935_v47 = vmul.f32 %v4151_v37, %v4145_v10  ;;  %v2922_v41 = vpop.xlane.xlu0 %2921 }
0x1858   :  { %4152 = vrcp.f32 %v2922_v41 }
0x1859   :  { %v2939_v40 = vpack.c.bf16 %v2935_v47, %v2935_v47 }
0x185b   :  { %3893 = vmatmul.msk.bf16.vlgmr.msrb.gmra.mxu2 %vm344_vm8, %v2939_v40 }
0x185e   :  { %v4153_v21 = vpop.eup %4152 }
0x185f   :  { %v2934_v34 = vmul.f32 %v4153_v21, %v4147_v5  ;;  %v2928_v28 = vpop.xlane.xlu0 %2927 }
0x1860   :  { %4154 = vrcp.f32 %v2928_v28 }
0x1861   :  { %v2938_v54 = vpack.c.bf16 %v2934_v34, %v2934_v34  ;;  %4156 = vrcp.f32 %v2919_v30 }
0x1863   :  { %3892 = vmatmul.msk.bf16.vlgmr.msrb.gmra.mxu1 %vm344_vm8, %v2938_v54 }
0x1866   :  { %v4155_v56 = vpop.eup %4154 }
0x1867   :  { %v2936_v32 = vmul.f32 %v4155_v56, %v4149_v52  ;;  %v3017_v8 = vpop.permute.xlu1 %3016  ;;  %v4157_v62 = vpop.eup %4156 }
0x1868   :  { %v3022_v59 = vsel %vm489_vm9, %v3017_v8, 0  ;;  %v2933_v24 = vmul.f32 %v4157_v62, %v5127_v45  ;;  %v3152_v45 = vsel %vm344_vm8, %v5191_v14, 0 }
0x1869   :  { %v2940_v44 = vpack.c.bf16 %v2936_v32, %v2936_v32  ;;  %3031 = vmatpush.bf16.msrb.mxu3 %v3022_v59 }
0x186a   :  { %v2937_v4 = vpack.c.bf16 %v2933_v24, %v2933_v24 }
0x186c   :  { %3894 = vmatmul.msk.bf16.vlgmr.msrb.gmra.mxu3 %vm344_vm8, %v2940_v44 }
0x186d   :  { %3111 = vmatpush.bf16.msra.mxu3 %v5171_v57 }
0x186f   :  { %v3139_v63 = vpop.permute.xlu1 %3138 }
0x1870   :  { %v5180_v7 = vpack.c.bf16 %v3139_v63, %v3139_v63 }
0x1871   :  { %3218 = vmatpush.bf16.xpose.msrb.mxu3 %v3209_v13 }
0x1872   :  { %v3190_v60 = vsel %vm344_vm8, %v5180_v7, 0  ;;  %v2945_v1 = vpop.permute.xlu0 %2944  ;;  %v3321_v62 = vunpack.c.l.b16 %v5180_v7 }
0x1873   :  { %v2950_v50 = vsel %vm489_vm9, %v2945_v1, 0  ;;  %3199 = vmatpush.bf16.xpose.msrb.mxu2 %v3190_v60 }
0x1874   :  { %2959 = vmatpush.bf16.msrb.mxu0 %v2950_v50  ;;  %v3322_v63 = vpack.c.b16 %v3321_v62, %v3321_v62 }
0x1877   :  { %3891 = vmatmul.msk.bf16.vlgmr.msrb.gmra.mxu0 %vm344_vm8, %v2937_v4  ;;  %v3125_v10 = vpop.permute.xlu1 %3124 }
0x1878   :  { %3054 = vmatpush.bf16.msra.mxu0 %v5186_v3  ;;  %v3132_v29 = vpack.c.bf16 %v3125_v10, %v3125_v10 }
0x187a   :  { %v3136_v46 = vpop.permute.xlu0 %3135 }
0x187b   :  { %v3145_v27 = vpack.c.bf16 %v3136_v46, %v3136_v46 }
0x187c   :  { %3161 = vmatpush.bf16.xpose.msrb.mxu0 %v3152_v45 }
0x187d   :  { %v3171_v16 = vsel %vm344_vm8, %v3145_v27, 0  ;;  %v3297_v0 = vunpack.c.l.b16 %v3145_v27 }
0x187e   :  { %3180 = vmatpush.bf16.xpose.msrb.mxu1 %v3171_v16 }
0x187f   :  { %v3122_v15 = vpop.permute.xlu1 %3121  ;;  %v3298_v24 = vpack.c.b16 %v3297_v0, %v3297_v0 }
0x1880   :  { %v3131_v5 = vpack.c.bf16 %v3122_v15, %v3122_v15 }
0x18de   :  { %v3009_v61 = vpop.f32.mrf.mxu2 }
0x18df   :  { %v3039_v9 = vpack.c.bf16 %v3009_v61, %v3009_v61 }
0x18e0   :  { %v2985_v38 = vpop.f32.mrf.mxu1 }
0x18e1   :  { %v3038_v6 = vpack.c.bf16 %v2985_v38, %v2985_v38  ;;  %3897 = vmatmul.msk.bf16.vlgmr.msra.gmra.mxu2 %vm344_vm8, %v3039_v9 }
0x18e3   :  { %3896 = vmatmul.msk.bf16.vlgmr.msra.gmra.mxu1 %vm344_vm8, %v3038_v6 }
0x18e6   :  { %v3011_v12 = vpop.f32.mrf.mxu2 }
0x18e8   :  { %v2987_v17 = vpop.f32.mrf.mxu1 }
0x18ef   :  { %v3033_v42 = vpop.f32.mrf.mxu3 }
0x18f0   :  { %v3040_v18 = vpack.c.bf16 %v3033_v42, %v3033_v42 }
0x18f1   :  { %3901 = vmatmul.msk.bf16.vlgmr.msrb.gmra.mxu2 %vm344_vm8, %v3132_v29 }
0x18f2   :  { %3898 = vmatmul.msk.bf16.vlgmr.msra.gmra.mxu3 %vm344_vm8, %v3040_v18 }
0x18f3   :  { %3900 = vmatmul.msk.bf16.vlgmr.msrb.gmra.mxu1 %vm344_vm8, %v3131_v5 }
0x18f4   :  { %v2961_v19 = vpop.f32.mrf.mxu0 }
0x18f5   :  { %v3037_v36 = vpack.c.bf16 %v2961_v19, %v2961_v19 }
0x18f7   :  { %v3035_v52 = vpop.f32.mrf.mxu3  ;;  %3895 = vmatmul.msk.bf16.vlgmr.msra.gmra.mxu0 %vm344_vm8, %v3037_v36 }
0x18f8   :  { %v3273_v52 = vunpack.c.l.b16 %v5191_v14 }
0x18fa   :  { %v3274_v43 = vpack.c.b16 %v3273_v52, %v3273_v52 }
0x18fc   :  { %v2963_v26 = vpop.f32.mrf.mxu0 }
0x18fd   :  { %v3345_v26 = vunpack.c.l.b16 %v5173_v58 }
0x1902   :  { %3902 = vmatmul.msk.bf16.vlgmr.msrb.gmra.mxu3 %vm344_vm8, %v3133_v31  ;;  %v3346_v31 = vpack.c.b16 %v3345_v26, %v3345_v26 }
0x1907   :  { %3899 = vmatmul.msk.bf16.vlgmr.msrb.gmra.mxu0 %vm344_vm8, %v3130_v39 }
0x1960   :  { %v3075_v33 = vpop.f32.mrf.mxu1 }
0x1964   :  { %v3094_v11 = vpop.f32.mrf.mxu2 }
0x1968   :  { %v3077_v30 = vpop.f32.mrf.mxu1 }
0x196c   :  { %v3096_v53 = vpop.f32.mrf.mxu2 }
0x1970   :  { %v3182_v35 = vpop.f32.mrf.mxu1 }
0x1971   :  { %v3227_v55 = vsel %vm344_vm8, %v3182_v35, -inf }
0x1974   :  { %v3056_v37 = vpop.f32.mrf.mxu0  ;;  %v3201_v47 = vpop.f32.mrf.mxu2 }
0x1975   :  { %v3117_v41 = vadd.f32 %v3075_v33, %v3056_v37  ;;  %v3113_v40 = vpop.f32.mrf.mxu3  ;;  %v3230_v51 = vsel %vm344_vm8, %v3201_v47, -inf }
0x1976   :  { %3231 = vmax.xlane.f32.xlu2 %v3230_v51 }
0x1977   :  { %v3118_v21 = vadd.f32 %v3117_v41, %v3094_v11 }
0x1978   :  { %v3184_v34 = vpop.f32.mrf.mxu1 }
0x1979   :  { %v5209_v28 = vadd.f32 %v3118_v21, %v3113_v40 }
0x197c   :  { %v3058_v54 = vpop.f32.mrf.mxu0  ;;  %v3203_v25 = vpop.f32.mrf.mxu2 }
0x197d   :  { %v3115_v49 = vpop.f32.mrf.mxu3 }
0x197e   :  { %3228 = vmax.xlane.f32.xlu2 %v3227_v55 }
0x1984   :  { %v3163_v56 = vpop.f32.mrf.mxu0 }
0x1985   :  { %v3220_v32 = vpop.f32.mrf.mxu3  ;;  %v3224_v8 = vsel %vm344_vm8, %v3163_v56, -inf }
0x1986   :  { %3225 = vmax.xlane.f32.xlu1 %v3224_v8  ;;  %v3233_v59 = vsel %vm344_vm8, %v3220_v32, -inf }
0x1987   :  { %3234 = vmax.xlane.f32.xlu0 %v3233_v59 }
0x198c   :  { %v3165_v44 = vpop.f32.mrf.mxu0 }
0x198d   :  { %v3222_v13 = vpop.f32.mrf.mxu3 }
0x1996   :  { %3323 = vrot.lane.b32.xlu2 %v3322_v63, %s4400_s9 }
0x199e   :  { %3299 = vrot.lane.b32.xlu2 %v3298_v24, %s4400_s9 }
0x19e9   :  { %v3232_v60 = vpop.xlane.xlu2 %3231 }
0x19ea   :  { %v3238_v6 = vsub.f32 %v3201_v47, %v3232_v60 }
0x19ec   :  { %v3244_v17 = vmul.f32 1.442695, %v3238_v6 }
0x19f1   :  { %v3229_v1 = vpop.xlane.xlu2 %3228 }
0x19f2   :  { %v3237_v50 = vsub.f32 %v3182_v35, %v3229_v1 }
0x19f4   :  { %v3242_v4 = vmul.f32 1.442695, %v3237_v50 }
0x19f6   :  { %4158 = vpow2.f32 %v3242_v4 }
0x19f9   :  { %v3324_v45 = vpop.permute.xlu2 %3323  ;;  %v3226_v46 = vpop.xlane.xlu1 %3225 }
0x19fa   :  { %v3329_v16 = vsel %vm489_vm9, %v3324_v45, 0  ;;  %v3236_v61 = vsub.f32 %v3163_v56, %v3226_v46  ;;  %v3235_v9 = vpop.xlane.xlu0 %3234 }
0x19fb   :  { %v3239_v38 = vsub.f32 %v3220_v32, %v3235_v9  ;;  %3338 = vmatpush.bf16.msra.mxu2 %v3329_v16 }
0x19fc   :  { %v4159_v7 = vpop.eup %4158  ;;  %v3240_v10 = vmul.f32 1.442695, %v3236_v61 }
0x19fd   :  { %v3246_v27 = vmul.f32 1.442695, %v3239_v38  ;;  %v3251_v12 = vsel %vm344_vm8, %v4159_v7, 0.0 }
0x19fe   :  { %4160 = vpow2.f32 %v3240_v10  ;;  %3252 = vadd.xlane.f32.xlu1 %v3251_v12 }
0x19ff   :  { %3414 = vmatpush.bf16.msrb.mxu2 %v5161_v2  ;;  %4162 = vpow2.f32 %v3246_v27 }
0x1a00   :  { %4164 = vpow2.f32 %v3244_v17 }
0x1a01   :  { %v3300_v15 = vpop.permute.xlu2 %3299 }
0x1a02   :  { %v3305_v29 = vsel %vm489_vm9, %v3300_v15, 0 }
0x1a03   :  { %3314 = vmatpush.bf16.msra.mxu1 %v3305_v29 }
0x1a04   :  { %v4161_v42 = vpop.eup %4160 }
0x1a05   :  { %v4163_v18 = vpop.eup %4162  ;;  %v3248_v5 = vsel %vm344_vm8, %v4161_v42, 0.0 }
0x1a06   :  { %3249 = vadd.xlane.f32.xlu0 %v3248_v5  ;;  %v3257_v2 = vsel %vm344_vm8, %v4163_v18, 0.0  ;;  %v4165_v19 = vpop.eup %4164 }
0x1a07   :  { %3398 = vmatpush.bf16.msrb.mxu1 %v5166_v22  ;;  %3258 = vadd.xlane.f32.xlu1 %v3257_v2  ;;  %v3254_v36 = vsel %vm344_vm8, %v4165_v19, 0.0  ;;  %v5229_v22 = vld [vmem:[#allocation11 + $0x14] ss:$0 sm:$0xff] }
0x1a08   :  { %v3440_v39 = vadd.f32 %v5229_v22, %v5209_v28 }
0x1a0a   :  { %v5234_v33 = vadd.f32 %v3440_v39, %v5104_v20 }
0x1a0c   :  { %v3454_v11 = vmul.f32 %v5234_v33, %v5234_v33  ;;  %v3446_v58 = vsel %vm302_vm7, %v5234_v33, 0.0 }
0x1a0e   :  { %3255 = vadd.xlane.f32.xlu0 %v3254_v36  ;;  %v3456_v14 = vsel %vm302_vm7, %v3454_v11, 0.0 }
0x1a20   :  { %3275 = vrot.lane.b32.xlu1 %v3274_v43, %s4400_s9 }
0x1a22   :  { %3347 = vrot.lane.b32.xlu0 %v3346_v31, %s4400_s9  ;;  %v3973_v31 = vld [vmem:[#allocation10 + $0x18] sm:$0xff] }
0x1a4a   :  { %3457 = vadd.xlane.f32.xlu1 %v3456_v14 }
0x1a4c   :  { %3447 = vadd.xlane.f32.xlu0 %v3446_v58 }
0x1a71   :  { %v3253_v30 = vpop.xlane.xlu1 %3252 }
0x1a72   :  { %4166 = vrcp.f32 %v3253_v30 }
0x1a78   :  { %v4167_v53 = vpop.eup %4166 }
0x1a79   :  { %v3265_v35 = vmul.f32 %v4167_v53, %v4159_v7  ;;  %v3250_v37 = vpop.xlane.xlu0 %3249 }
0x1a7a   :  { %v3259_v41 = vpop.xlane.xlu1 %3258 }
0x1a7b   :  { %v3269_v47 = vpack.c.bf16 %v3265_v35, %v3265_v35 }
0x1a7d   :  { %3904 = vmatmul.msk.bf16.vlgmr.msra.gmra.mxu1 %vm344_vm8, %v3269_v47 }
0x1a81   :  { %v3256_v20 = vpop.xlane.xlu0 %3255 }
0x1a82   :  { %4168 = vrcp.f32 %v3256_v20 }
0x1a83   :  { %4170 = vrcp.f32 %v3250_v37 }
0x1a84   :  { %4172 = vrcp.f32 %v3259_v41 }
0x1a88   :  { %v4169_v40 = vpop.eup %4168 }
0x1a89   :  { %v3266_v51 = vmul.f32 %v4169_v40, %v4165_v19  ;;  %v4171_v34 = vpop.eup %4170 }
0x1a8a   :  { %v4173_v28 = vpop.eup %4172  ;;  %v3264_v54 = vmul.f32 %v4171_v34, %v4161_v42 }
0x1a8b   :  { %v3270_v21 = vpack.c.bf16 %v3266_v51, %v3266_v51  ;;  %v3267_v49 = vmul.f32 %v4173_v28, %v4163_v18 }
0x1a8c   :  { %v3268_v32 = vpack.c.bf16 %v3264_v54, %v3264_v54 }
0x1a8d   :  { %3905 = vmatmul.msk.bf16.vlgmr.msra.gmra.mxu2 %vm344_vm8, %v3270_v21  ;;  %v3271_v59 = vpack.c.bf16 %v3267_v49, %v3267_v49 }
0x1a92   :  { %v3276_v25 = vpop.permute.xlu1 %3275 }
0x1a93   :  { %v3281_v55 = vsel %vm489_vm9, %v3276_v25, 0 }
0x1a94   :  { %v3348_v56 = vpop.permute.xlu0 %3347  ;;  %3290 = vmatpush.bf16.msra.mxu0 %v3281_v55  ;;  %v4021_v55 = vld [vmem:[#allocation11 + $0x19] ss:$0 sm:$0xff] }
0x1a95   :  { %v3353_v8 = vsel %vm489_vm9, %v3348_v56, 0 }
0x1a96   :  { %3362 = vmatpush.bf16.msra.mxu3 %v3353_v8 }
0x1a97   :  { %3903 = vmatmul.msk.bf16.vlgmr.msra.gmra.mxu0 %vm344_vm8, %v3268_v32 }
0x1a98   :  { %3382 = vmatpush.bf16.msrb.mxu0 %v5186_v3 }
0x1a99   :  { %3906 = vmatmul.msk.bf16.vlgmr.msra.gmra.mxu3 %vm344_vm8, %v3271_v59 }
0x1a9a   :  { %3430 = vmatpush.bf16.msrb.mxu3 %v5171_v57 }
0x1a9c   :  { %3529 = vmatpush.bf16.msra.mxu0 %v3973_v31 }
0x1abd   :  { %v3458_v19 = vpop.xlane.xlu1 %3457 }
0x1abe   :  { %v3462_v52 = vmul.f32 %v3458_v19, %v4700_v48 }
0x1abf   :  { %v3448_v5 = vpop.xlane.xlu0 %3447 }
0x1ac0   :  { %v3452_v2 = vmul.f32 %v3448_v5, %v4700_v48 }
0x1ac2   :  { %v3464_v36 = vmul.f32 %v3452_v2, %v3452_v2  ;;  %v3468_v25 = vsub.f32 %v5234_v33, %v3452_v2  ;;  %v3977_v33 = vld [vmem:[%s5299_s8 + $0x38] sm:$0xff] }
0x1ac3   :  { %3582 = vmatpush.bf16.msra.mxu1 %v3977_v33 }
0x1ac4   :  { %v3466_v26 = vsub.f32 %v3462_v52, %v3464_v36 }
0x1ac6   :  { %v3470_v43 = vadd.f32 1e-05, %v3466_v26 }
0x1ac8   :  { %4174 = vrsqrt.f32 %v3470_v43  ;;  %vm3478_vm9 = vweird.f32 %v3470_v43 }
0x1afa   :  { %v3316_v44 = vpop.f32.mrf.mxu1 }
0x1afb   :  { %v3369_v13 = vpack.c.bf16 %v3316_v44, %v3316_v44  ;;  %v4022_v44 = vld [vmem:[#allocation11 + $0x1a] ss:$0 sm:$0xff] }
0x1afd   :  { %3908 = vmatmul.msk.bf16.vlgmr.msrb.gmra.mxu1 %vm344_vm8, %v3369_v13 }
0x1b02   :  { %v3318_v62 = vpop.f32.mrf.mxu1 }
0x1b10   :  { %v3340_v63 = vpop.f32.mrf.mxu2 }
0x1b11   :  { %v3370_v0 = vpack.c.bf16 %v3340_v63, %v3340_v63 }
0x1b13   :  { %3909 = vmatmul.msk.bf16.vlgmr.msrb.gmra.mxu2 %vm344_vm8, %v3370_v0 }
0x1b14   :  { %v3292_v24 = vpop.f32.mrf.mxu0 }
0x1b15   :  { %v3368_v60 = vpack.c.bf16 %v3292_v24, %v3292_v24 }
0x1b17   :  { %3907 = vmatmul.msk.bf16.vlgmr.msrb.gmra.mxu0 %vm344_vm8, %v3368_v60 }
0x1b18   :  { %v3342_v3 = vpop.f32.mrf.mxu2 }
0x1b19   :  { %v3976_v3 = vld [vmem:[%s5299_s8 + $0x30] sm:$0xff] }
0x1b1a   :  { %3583 = vmatpush.bf16.msra.mxu1 %v3976_v3 }
0x1b1c   :  { %v3294_v1 = vpop.f32.mrf.mxu0  ;;  %v3364_v50 = vpop.f32.mrf.mxu3 }
0x1b1d   :  { %v3371_v4 = vpack.c.bf16 %v3364_v50, %v3364_v50  ;;  %v3975_v1 = vld [vmem:[%s5299_s8 + $0x28] sm:$0xff]  ;;  %v3974_v50 = vld [vmem:[%s5299_s8 + $0x20] sm:$0xff] }
0x1b1e   :  { %3584 = vmatpush.bf16.msra.mxu1 %v3975_v1 }
0x1b1f   :  { %3910 = vmatmul.msk.bf16.vlgmr.msrb.gmra.mxu3 %vm344_vm8, %v3371_v4 }
0x1b22   :  { %3585 = vmatpush.bf16.msra.mxu1 %v3974_v50 }
0x1b24   :  { %v3366_v57 = vpop.f32.mrf.mxu3 }
0x1b25   :  { %v4023_v57 = vld [vmem:[#allocation11 + $0x15] ss:$0 sm:$0xff] }
0x1b7a   :  { %v3400_v45 = vpop.f32.mrf.mxu1 }
0x1b82   :  { %v3402_v46 = vpop.f32.mrf.mxu1 }
0x1b94   :  { %v3384_v16 = vpop.f32.mrf.mxu0 }
0x1b95   :  { %v3436_v38 = vadd.f32 %v3400_v45, %v3384_v16 }
0x1b96   :  { %v3416_v61 = vpop.f32.mrf.mxu2 }
0x1b97   :  { %v3437_v6 = vadd.f32 %v3436_v38, %v3416_v61 }
0x1b9c   :  { %v3386_v9 = vpop.f32.mrf.mxu0 }
0x1b9e   :  { %v3418_v7 = vpop.f32.mrf.mxu2 }
0x1b9f   :  { %v4024_v7 = vld [vmem:[#allocation11 + $0x16] ss:$0 sm:$0xff] }
0x1ba2   :  { %v3432_v10 = vpop.f32.mrf.mxu3 }
0x1ba3   :  { %v3438_v27 = vadd.f32 %v3437_v6, %v3432_v10 }
0x1ba5   :  { %v3441_v12 = vadd.f32 %v5229_v22, %v3438_v27  ;;  %v3972_v22 = vld [vmem:[#allocation10 + $0x10] sm:$0xff] }
0x1ba6   :  { %3530 = vmatpush.bf16.msra.mxu0 %v3972_v22  ;;  %v3979_v22 = vld [vmem:[#allocation13 + $0x8] sm:$0xff] }
0x1ba7   :  { %v3443_v17 = vadd.f32 %v3441_v12, %v5106_v23  ;;  %v4175_v23 = vpop.eup %4174  ;;  %3688 = vmatpush.bf16.msra.mxu2 %v3979_v22 }
0x1ba8   :  { %v3473_v39 = vmul.f32 %v4175_v23, %v3470_v43  ;;  %vm3479_vm8 = vweird.f32 %v4175_v23 }
0x1ba9   :  { %v3449_v15 = vsel %vm302_vm7, %v3443_v17, 0.0  ;;  %v3455_v29 = vmul.f32 %v3443_v17, %v3443_v17  ;;  %vm3480_vm11 = vmor %vm3478_vm9, %vm3479_vm8 }
0x1baa   :  { %v3434_v42 = vpop.f32.mrf.mxu3  ;;  %3450 = vadd.xlane.f32.xlu2 %v3449_v15  ;;  %v3474_v35 = vmul.f32 %v4175_v23, %v3473_v39 }
0x1bab   :  { %v3459_v18 = vsel %vm302_vm7, %v3455_v29, 0.0 }
0x1bac   :  { %3460 = vadd.xlane.f32.xlu0 %v3459_v18  ;;  %v3475_v20 = vmul.f32 0.5, %v3474_v35 }
0x1bae   :  { %v3476_v41 = vsub.f32 1.5, %v3475_v20 }
0x1bb0   :  { %v3477_v51 = vmul.f32 %v4175_v23, %v3476_v41 }
0x1bb2   :  { %v3481_v28 = vsel %vm3480_vm11, %v4175_v23, %v3477_v51 }
0x1bb3   :  { %v3492_v56 = vmul.f32 %v3481_v28, %v3468_v25 }
0x1bb5   :  { %v3495_v13 = vmul.f32 %v4021_v55, %v3492_v56 }
0x1bb7   :  { %v3498_v0 = vadd.f32 %v4022_v44, %v3495_v13 }
0x1c1d   :  { %v3451_v11 = vpop.xlane.xlu2 %3450 }
0x1c1e   :  { %v3453_v14 = vmul.f32 %v3451_v11, %v4700_v48 }
0x1c1f   :  { %v3461_v58 = vpop.xlane.xlu0 %3460 }
0x1c20   :  { %v3465_v30 = vmul.f32 %v3453_v14, %v3453_v14  ;;  %v3463_v53 = vmul.f32 %v3461_v58, %v4700_v48  ;;  %v3469_v8 = vsub.f32 %v3443_v17, %v3453_v14  ;;  %v3978_v58 = vld [vmem:[#allocation13] sm:$0xff] }
0x1c21   :  { %3689 = vmatpush.bf16.msra.mxu2 %v3978_v58 }
0x1c22   :  { %v3467_v37 = vsub.f32 %v3463_v53, %v3465_v30 }
0x1c24   :  { %v3471_v47 = vadd.f32 1e-05, %v3467_v37 }
0x1c26   :  { %4176 = vrsqrt.f32 %v3471_v47  ;;  %vm3488_vm13 = vweird.f32 %v3471_v47 }
0x1c2c   :  { %v4177_v40 = vpop.eup %4176 }
0x1c2d   :  { %v3483_v21 = vmul.f32 %v4177_v40, %v3471_v47  ;;  %vm3489_vm12 = vweird.f32 %v4177_v40 }
0x1c2e   :  { %vm3490_vm14 = vmor %vm3488_vm13, %vm3489_vm12 }
0x1c2f   :  { %v3484_v34 = vmul.f32 %v4177_v40, %v3483_v21 }
0x1c31   :  { %v3485_v54 = vmul.f32 0.5, %v3484_v34 }
0x1c33   :  { %v3486_v49 = vsub.f32 1.5, %v3485_v54 }
0x1c35   :  { %v3487_v32 = vmul.f32 %v4177_v40, %v3486_v49 }
0x1c37   :  { %v3491_v59 = vsel %vm3490_vm14, %v4177_v40, %v3487_v32 }
0x1c38   :  { %v3493_v62 = vmul.f32 %v3491_v59, %v3469_v8 }
0x1c3a   :  { %v3496_v63 = vmul.f32 %v4021_v55, %v3493_v62 }
0x1c3c   :  { %v3499_v24 = vadd.f32 %v4022_v44, %v3496_v63  ;;  %v4026_v44 = vld [vmem:[#allocation11 + $0x1c] ss:$0 sm:$0xff] }
0x1c3e   :  { %v3505_v60 = vpack.c.bf16 %v3499_v24, %v3498_v0 }
0x1c40   :  { %3919 = vmatmul.msk.bf16.vlgmr.msra.gmra.mxu0 %vm302_vm7, %v3505_v60 }
0x1cbd   :  { %v3532_v4 = vpop.f32.mrf.mxu0 }
0x1cbe   :  { %v3533_v45 = vadd.f32 %v4023_v57, %v3532_v4 }
0x1cc0   :  { %v3537_v61 = vmax.f32 %v3533_v45, 0.0 }
0x1cc5   :  { %v3534_v46 = vpop.f32.mrf.mxu0 }
0x1cc6   :  { %v3535_v16 = vadd.f32 %v4023_v57, %v3534_v46  ;;  %v4027_v57 = vld [vmem:[%s5302_s11] ss:$0 sm:$0xff] }
0x1cc8   :  { %v3538_v9 = vmax.f32 %v3535_v16, 0.0 }
0x1cca   :  { %v3548_v38 = vpack.c.bf16 %v3538_v9, %v3537_v61 }
0x1ccc   :  { %3944 = vmatmul.msk.bf16.vlgmr.msra.gmra.mxu1 %vm1894_vm10, %v3548_v38 }
0x1d49   :  { %v3587_v6 = vpop.f32.mrf.mxu1 }
0x1d4a   :  { %v3588_v10 = vadd.f32 %v4024_v7, %v3587_v6 }
0x1d4c   :  { %v3592_v27 = vadd.f32 %v3588_v10, %v3498_v0 }
0x1d4e   :  { %v3596_v12 = vsel %vm302_vm7, %v3592_v27, 0.0  ;;  %v3604_v17 = vmul.f32 %v3592_v27, %v3592_v27 }
0x1d4f   :  { %3597 = vadd.xlane.f32.xlu2 %v3596_v12 }
0x1d50   :  { %v3606_v15 = vsel %vm302_vm7, %v3604_v17, 0.0 }
0x1d51   :  { %v3589_v29 = vpop.f32.mrf.mxu1  ;;  %3607 = vadd.xlane.f32.xlu0 %v3606_v15 }
0x1d52   :  { %v3590_v42 = vadd.f32 %v4024_v7, %v3589_v29 }
0x1d54   :  { %v3593_v18 = vadd.f32 %v3590_v42, %v3499_v24 }
0x1d56   :  { %v3599_v5 = vsel %vm302_vm7, %v3593_v18, 0.0  ;;  %v3605_v2 = vmul.f32 %v3593_v18, %v3593_v18 }
0x1d57   :  { %3600 = vadd.xlane.f32.xlu1 %v3599_v5 }
0x1d58   :  { %v3609_v19 = vsel %vm302_vm7, %v3605_v2, 0.0 }
0x1d59   :  { %3610 = vadd.xlane.f32.xlu2 %v3609_v19 }
0x1dc2   :  { %v3598_v36 = vpop.xlane.xlu2 %3597 }
0x1dc3   :  { %v3602_v52 = vmul.f32 %v3598_v36, %v4700_v48 }
0x1dc4   :  { %v3608_v26 = vpop.xlane.xlu0 %3607 }
0x1dc5   :  { %v3614_v43 = vmul.f32 %v3602_v52, %v3602_v52  ;;  %v3612_v31 = vmul.f32 %v3608_v26, %v4700_v48  ;;  %v3618_v55 = vsub.f32 %v3592_v27, %v3602_v52 }
0x1dc7   :  { %v3616_v23 = vsub.f32 %v3612_v31, %v3614_v43 }
0x1dc9   :  { %v3620_v39 = vadd.f32 1e-05, %v3616_v23 }
0x1dca   :  { %v3601_v11 = vpop.xlane.xlu1 %3600 }
0x1dcb   :  { %4178 = vrsqrt.f32 %v3620_v39  ;;  %v3603_v14 = vmul.f32 %v3601_v11, %v4700_v48  ;;  %vm3628_vm15 = vweird.f32 %v3620_v39 }
0x1dcc   :  { %v3611_v30 = vpop.xlane.xlu2 %3610 }
0x1dcd   :  { %v3615_v53 = vmul.f32 %v3603_v14, %v3603_v14  ;;  %v3613_v35 = vmul.f32 %v3611_v30, %v4700_v48  ;;  %v4025_v48 = vld [vmem:[#allocation11 + $0x1b] ss:$0 sm:$0xff]  ;;  %v3619_v62 = vsub.f32 %v3593_v18, %v3603_v14 }
0x1dcf   :  { %v3617_v37 = vsub.f32 %v3613_v35, %v3615_v53 }
0x1dd1   :  { %v4179_v47 = vpop.eup %4178  ;;  %v3621_v20 = vadd.f32 1e-05, %v3617_v37 }
0x1dd2   :  { %v3623_v41 = vmul.f32 %v4179_v47, %v3620_v39  ;;  %vm3629_vm10 = vweird.f32 %v4179_v47 }
0x1dd3   :  { %4180 = vrsqrt.f32 %v3621_v20  ;;  %vm3630_vm0 = vmor %vm3628_vm15, %vm3629_vm10  ;;  %vm3638_vm2 = vweird.f32 %v3621_v20 }
0x1dd4   :  { %v3624_v40 = vmul.f32 %v4179_v47, %v3623_v41 }
0x1dd6   :  { %v3625_v51 = vmul.f32 0.5, %v3624_v40 }
0x1dd8   :  { %v3626_v21 = vsub.f32 1.5, %v3625_v51 }
0x1dd9   :  { %v4181_v34 = vpop.eup %4180 }
0x1dda   :  { %v3627_v28 = vmul.f32 %v4179_v47, %v3626_v21  ;;  %v3633_v54 = vmul.f32 %v4181_v34, %v3621_v20  ;;  %vm3639_vm1 = vweird.f32 %v4181_v34 }
0x1ddb   :  { %vm3640_vm3 = vmor %vm3638_vm2, %vm3639_vm1 }
0x1ddc   :  { %v3631_v25 = vsel %vm3630_vm0, %v4179_v47, %v3627_v28  ;;  %v3634_v49 = vmul.f32 %v4181_v34, %v3633_v54 }
0x1ddd   :  { %v3642_v32 = vmul.f32 %v3631_v25, %v3618_v55 }
0x1dde   :  { %v3635_v56 = vmul.f32 0.5, %v3634_v49 }
0x1ddf   :  { %v3645_v13 = vmul.f32 %v4025_v48, %v3642_v32 }
0x1de0   :  { %v3636_v8 = vsub.f32 1.5, %v3635_v56 }
0x1de1   :  { %v3648_v24 = vadd.f32 %v4026_v44, %v3645_v13 }
0x1de2   :  { %v3637_v59 = vmul.f32 %v4181_v34, %v3636_v8 }
0x1de3   :  { %v3651_v3 = vrot.slane %v3648_v24, 7 }
0x1de4   :  { %v3641_v63 = vsel %vm3640_vm3, %v4181_v34, %v3637_v59 }
0x1de5   :  { %v3643_v0 = vmul.f32 %v3641_v63, %v3619_v62 }
0x1de7   :  { %v3646_v60 = vmul.f32 %v4025_v48, %v3643_v0 }
0x1de9   :  { %v3649_v33 = vadd.f32 %v4026_v44, %v3646_v60 }
0x1deb   :  { %v3654_v1 = vrot.slane %v3649_v33, 6 }
0x1ded   :  { %v3657_v50 = vsel %vm3656_vm4, %v3651_v3, %v3654_v1 }
0x1dee   :  { %v3662_v4 = vpack.c.bf16 %v3657_v50, %v3657_v50 }
0x1df0   :  { %3953 = vmatmul.msk.bf16.vlgmr.msra.gmra.mxu2 %vm302_vm7, %v3662_v4 }
0x1e73   :  { %v3691_v45 = vpop.f32.mrf.mxu2 }
0x1e74   :  { %v3692_v46 = vadd.f32 %v4027_v57, %v3691_v45 }
0x1e76   :  { %v3696_v16 = vrot.slane %v3692_v46, 1  ;;  %3699 = vst.msk [vmem:[#allocation14] sm:$0x1] %vm3698_vm5, %v3692_v46 }
0x1e78   :  { %3700 = vst.msk [vmem:[#allocation14 + $0x1] sm:$0x1] %vm3698_vm5, %v3696_v16 }
0x1e79   :  { %3713 = dma.vmem_to_hbm [thread:$0]  %s3706_s6, 32, %s3708_s28, [#allocation4], %s4403_s29, %s4403_s29, %s4404_s13  }
0x1e7b   :  { %v3693_v61 = vpop.f32.mrf.mxu2 }
0x1e7c   :  { %4382 = dma.done.wait [#allocation4], 32  }
0x1e7d   :  { %4383 = vsyncadd [#allocation4], 4294967264 }
0x1e7e   :  { %3718 = vsyncpa [#allocation3], 1 }
0x1e7f   :  { %3719 = vsyncpa [#allocation6], 1 }
0x1e80   :  { %3720 = vsyncpa [#allocation9], 1 }
0x1e81   :  { %3721 = vsyncpa [#allocation12], 1 }
0x1e82   :  { %3722 = vsyncpa [#allocation4], 1 }

</bundles_post_ra>
